<compile_context>
chip_gen: v6e
topology: v6e:2x2x1
jax: 0.10.0
libtpu: 0.0.40
codegen_flags: <defaults>
</compile_context>

<pallas_src>
import functools

import jax
import jax.numpy as jnp
import numpy as np
from jax.experimental import pallas as pl
from jax.experimental.pallas import tpu as pltpu

EPS = 1e-5
EXPANSION = 4
MAX_ROW_TILE = 512
MIN_ROW_TILE = 256

_PAR1 = pltpu.CompilerParams(dimension_semantics=("parallel",))
_PAR2 = pltpu.CompilerParams(dimension_semantics=("parallel", "parallel"))


# ----------------------------- small helpers ------------------------------ #

def _r128(c):
    return max(128, ((c + 127) // 128) * 128)


def _row_tile(m):
    """Row tile (multiple of 8), biased toward >=256 rows so the 256-wide MXUs
    of v6e/v7x stay full.  Prefers an exact divisor of m; otherwise pads."""
    m8 = ((m + 7) // 8) * 8
    if m8 <= MAX_ROW_TILE:
        return m8, m8
    for t in range(MAX_ROW_TILE, MIN_ROW_TILE - 1, -8):
        if m % t == 0:
            return t, m
    t = MAX_ROW_TILE
    return t, ((m + t - 1) // t) * t


def _pick_band(h2, w2, ws, target=512):
    """Output-row band height for the 3x3 conv: the smallest divisor of h2
    whose padded row count (band*ws) reaches `target` (keeps MXU tiles big
    while giving O(N*h2/band) parallel grid steps)."""
    cands = [t for t in range(1, h2 + 1)
             if h2 % t == 0 and (t == h2 or (t * w2) % 8 == 0)]
    for t in cands:
        if t * ws >= target:
            return t
    return h2


def _pad_rows(a, mp):
    return a if a.shape[0] == mp else jnp.pad(a, ((0, mp - a.shape[0]), (0, 0)))


def _pad_last(a, cp):
    pads = [(0, 0)] * (a.ndim - 1) + [(0, cp - a.shape[-1])]
    return a if a.shape[-1] == cp else jnp.pad(a, pads)


def prep_w_1x1(w, cinp, coutp):
    """PyTorch (out,in,1,1) -> (cinp, coutp) bf16, zero padded."""
    wt = w[:, :, 0, 0].T
    wt = jnp.pad(wt, ((0, cinp - wt.shape[0]), (0, coutp - wt.shape[1])))
    return wt.astype(jnp.bfloat16)


def prep_w_3x3(w, cinp, coutp):
    """PyTorch (out,in,3,3) -> (9, cinp, coutp) bf16, tap index = kh*3+kw."""
    wt = jnp.transpose(w, (2, 3, 1, 0)).reshape(9, w.shape[1], w.shape[0])
    wt = jnp.pad(wt, ((0, 0), (0, cinp - wt.shape[1]), (0, coutp - wt.shape[2])))
    return wt.astype(jnp.bfloat16)


def fold_bn(stats, count, gamma, beta, cpad):
    """stats = [sum(y); sum(y^2)] per channel -> per-channel scale/shift (f32).
    Padded channels (y == 0 everywhere) get scale = shift = 0."""
    g = jnp.pad(gamma.astype(jnp.float32), (0, cpad - gamma.shape[0]))
    b = jnp.pad(beta.astype(jnp.float32), (0, cpad - beta.shape[0]))
    mean = stats[0] / count
    var = jnp.maximum(stats[1] / count - mean * mean, 0.0)
    scale = g * jax.lax.rsqrt(var + EPS)
    shift = b - mean * scale
    return scale.reshape(1, cpad), shift.reshape(1, cpad)


def _stats2(y):
    """(rows, C) f32 -> (2, C) = [sum(y); sum(y^2)]."""
    return jnp.concatenate([jnp.sum(y, axis=0, keepdims=True),
                            jnp.sum(y * y, axis=0, keepdims=True)], axis=0)


# ----------------------------- Pallas kernels ------------------------------ #

def _conv1x1_stats_kernel(x_ref, w_ref, y_ref, st_ref):
    # y = x @ w  (matmul issued once) ; emit raw y bf16 + partial BN stats.
    y = jnp.dot(x_ref[...], w_ref[...], preferred_element_type=jnp.float32)
    y_ref[...] = y.astype(y_ref.dtype)
    st_ref[0] = _stats2(y)


def _bn_relu_kernel(y_ref, sc_ref, sh_ref, o_ref):
    # VPU-only epilogue: relu(y * scale + shift)
    o_ref[...] = jnp.maximum(
        y_ref[...].astype(jnp.float32) * sc_ref[...] + sh_ref[...], 0.0
    ).astype(o_ref.dtype)


def _conv3x3_stats_kernel(ph_ref, w_ref, y_ref, st_ref, *, th, w2, ws, stride, nb):
    # 9 accumulated MXU matmuls over contiguous flat windows of the
    # phase-decomposed, spatially padded input (accumulate at padded width ws,
    # slice the junk columns once at the end).  Emits raw y2 + partial stats.
    r0 = 0 if nb == 1 else pl.program_id(1) * th
    co = w_ref.shape[-1]
    acc = None
    for kh in range(3):
        for kw in range(3):
            p = (kh % stride) * stride + (kw % stride)
            i0, j0 = kh // stride, kw // stride
            start = (i0 + r0) * ws + j0
            patch = ph_ref[p, 0, pl.ds(start, th * ws), :]
            t = jnp.dot(patch, w_ref[kh * 3 + kw],
                        preferred_element_type=jnp.float32)
            acc = t if acc is None else acc + t
    y = acc.reshape(th, ws, co)[:, :w2, :].reshape(th * w2, co)
    y_ref[0] = y.astype(y_ref.dtype)
    st_ref[0] = _stats2(y)


def _final_proj_kernel(y2_ref, sc2_ref, sh2_ref, w3_ref, xs_ref, ws_ref,
                       y3_ref, ys_ref, st3_ref, sts_ref, *, m_valid, tm):
    # BN2+ReLU prologue on raw y2 (so conv2's activation is matmul'd exactly
    # once), then conv3 + projection-shortcut matmuls + their BN stats.
    a = jnp.maximum(y2_ref[...].astype(jnp.float32) * sc2_ref[...] + sh2_ref[...],
                    0.0)
    if m_valid is not None:                       # keep padded rows at zero
        rows = pl.program_id(0) * tm + jax.lax.broadcasted_iota(
            jnp.int32, a.shape, 0)
        a = jnp.where(rows < m_valid, a, 0.0)
    y3 = jnp.dot(a.astype(jnp.bfloat16), w3_ref[...],
                 preferred_element_type=jnp.float32)
    ys = jnp.dot(xs_ref[...], ws_ref[...], preferred_element_type=jnp.float32)
    y3_ref[...] = y3.astype(y3_ref.dtype)
    ys_ref[...] = ys.astype(ys_ref.dtype)
    st3_ref[0] = _stats2(y3)
    sts_ref[0] = _stats2(ys)


def _final_id_kernel(y2_ref, sc2_ref, sh2_ref, w3_ref, y3_ref, st3_ref,
                     *, m_valid, tm):
    a = jnp.maximum(y2_ref[...].astype(jnp.float32) * sc2_ref[...] + sh2_ref[...],
                    0.0)
    if m_valid is not None:
        rows = pl.program_id(0) * tm + jax.lax.broadcasted_iota(
            jnp.int32, a.shape, 0)
        a = jnp.where(rows < m_valid, a, 0.0)
    y3 = jnp.dot(a.astype(jnp.bfloat16), w3_ref[...],
                 preferred_element_type=jnp.float32)
    y3_ref[...] = y3.astype(y3_ref.dtype)
    st3_ref[0] = _stats2(y3)


def _epilogue_proj_kernel(y3_ref, sc3_ref, sh3_ref, ys_ref, scs_ref, shs_ref,
                          o_ref):
    # VPU-only: relu( bn3(y3) + bns(ys) ), bf16 output
    out = (y3_ref[...].astype(jnp.float32) * sc3_ref[...] + sh3_ref[...]
           + ys_ref[...].astype(jnp.float32) * scs_ref[...] + shs_ref[...])
    o_ref[...] = jnp.maximum(out, 0.0).astype(o_ref.dtype)


def _epilogue_id_kernel(y3_ref, sc3_ref, sh3_ref, res_ref, o_ref):
    # VPU-only: relu( bn3(y3) + x ), bf16 output
    out = (y3_ref[...].astype(jnp.float32) * sc3_ref[...] + sh3_ref[...]
           + res_ref[...].astype(jnp.float32))
    o_ref[...] = jnp.maximum(out, 0.0).astype(o_ref.dtype)


# ----------------------------- kernel wrappers ----------------------------- #

def conv1x1_stats(x, w, tm):
    mp, k = x.shape
    c = w.shape[1]
    g = mp // tm
    y, part = pl.pallas_call(
        _conv1x1_stats_kernel,
        out_shape=(jax.ShapeDtypeStruct((mp, c), jnp.bfloat16),
                   jax.ShapeDtypeStruct((g, 2, c), jnp.float32)),
        grid=(g,),
        in_specs=[pl.BlockSpec((tm, k), lambda i: (i, 0)),
                  pl.BlockSpec((k, c), lambda i: (0, 0))],
        out_specs=(pl.BlockSpec((tm, c), lambda i: (i, 0)),
                   pl.BlockSpec((1, 2, c), lambda i: (i, 0, 0))),
        compiler_params=_PAR1,
    )(x, w)
    return y, part.sum(axis=0)


def bn_relu(y, sc, sh, tm):
    mp, c = y.shape
    g = mp // tm
    return pl.pallas_call(
        _bn_relu_kernel,
        out_shape=jax.ShapeDtypeStruct((mp, c), jnp.bfloat16),
        grid=(g,),
        in_specs=[pl.BlockSpec((tm, c), lambda i: (i, 0)),
                  pl.BlockSpec((1, c), lambda i: (0, 0)),
                  pl.BlockSpec((1, c), lambda i: (0, 0))],
        out_specs=pl.BlockSpec((tm, c), lambda i: (i, 0)),
        compiler_params=_PAR1,
    )(y, sc, sh)


def conv3x3_stats(ph, w, h2, w2, ws, stride, th):
    ss, n, hws, c = ph.shape
    co = w.shape[-1]
    nb = h2 // th
    y, part = pl.pallas_call(
        functools.partial(_conv3x3_stats_kernel, th=th, w2=w2, ws=ws,
                          stride=stride, nb=nb),
        out_shape=(jax.ShapeDtypeStruct((n, h2 * w2, co), jnp.bfloat16),
                   jax.ShapeDtypeStruct((n * nb, 2, co), jnp.float32)),
        grid=(n, nb),
        in_specs=[pl.BlockSpec((ss, 1, hws, c), lambda ni, bi: (0, ni, 0, 0)),
                  pl.BlockSpec((9, c, co), lambda ni, bi: (0, 0, 0))],
        out_specs=(pl.BlockSpec((1, th * w2, co), lambda ni, bi: (ni, bi, 0)),
                   pl.BlockSpec((1, 2, co), lambda ni, bi: (ni * nb + bi, 0, 0))),
        compiler_params=_PAR2,
    )(ph, w)
    return y, part.sum(axis=0)


def final_proj(y2f, sc2, sh2, w3, xs, wsp, tm, m_valid):
    mp, ka = y2f.shape
    kb = xs.shape[1]
    c = w3.shape[1]
    g = mp // tm
    y3, ys, p3, ps = pl.pallas_call(
        functools.partial(_final_proj_kernel, m_valid=m_valid, tm=tm),
        out_shape=(jax.ShapeDtypeStruct((mp, c), jnp.bfloat16),
                   jax.ShapeDtypeStruct((mp, c), jnp.bfloat16),
                   jax.ShapeDtypeStruct((g, 2, c), jnp.float32),
                   jax.ShapeDtypeStruct((g, 2, c), jnp.float32)),
        grid=(g,),
        in_specs=[pl.BlockSpec((tm, ka), lambda i: (i, 0)),
                  pl.BlockSpec((1, ka), lambda i: (0, 0)),
                  pl.BlockSpec((1, ka), lambda i: (0, 0)),
                  pl.BlockSpec((ka, c), lambda i: (0, 0)),
                  pl.BlockSpec((tm, kb), lambda i: (i, 0)),
                  pl.BlockSpec((kb, c), lambda i: (0, 0))],
        out_specs=(pl.BlockSpec((tm, c), lambda i: (i, 0)),
                   pl.BlockSpec((tm, c), lambda i: (i, 0)),
                   pl.BlockSpec((1, 2, c), lambda i: (i, 0, 0)),
                   pl.BlockSpec((1, 2, c), lambda i: (i, 0, 0))),
        compiler_params=_PAR1,
    )(y2f, sc2, sh2, w3, xs, wsp)
    return y3, ys, p3.sum(axis=0), ps.sum(axis=0)


def final_id(y2f, sc2, sh2, w3, tm, m_valid):
    mp, ka = y2f.shape
    c = w3.shape[1]
    g = mp // tm
    y3, p3 = pl.pallas_call(
        functools.partial(_final_id_kernel, m_valid=m_valid, tm=tm),
        out_shape=(jax.ShapeDtypeStruct((mp, c), jnp.bfloat16),
                   jax.ShapeDtypeStruct((g, 2, c), jnp.float32)),
        grid=(g,),
        in_specs=[pl.BlockSpec((tm, ka), lambda i: (i, 0)),
                  pl.BlockSpec((1, ka), lambda i: (0, 0)),
                  pl.BlockSpec((1, ka), lambda i: (0, 0)),
                  pl.BlockSpec((ka, c), lambda i: (0, 0))],
        out_specs=(pl.BlockSpec((tm, c), lambda i: (i, 0)),
                   pl.BlockSpec((1, 2, c), lambda i: (i, 0, 0))),
        compiler_params=_PAR1,
    )(y2f, sc2, sh2, w3)
    return y3, p3.sum(axis=0)


def epilogue_proj(y3, sc3, sh3, ys, scs, shs, tm):
    mp, c = y3.shape
    g = mp // tm
    return pl.pallas_call(
        _epilogue_proj_kernel,
        out_shape=jax.ShapeDtypeStruct((mp, c), jnp.bfloat16),
        grid=(g,),
        in_specs=[pl.BlockSpec((tm, c), lambda i: (i, 0)),
                  pl.BlockSpec((1, c), lambda i: (0, 0)),
                  pl.BlockSpec((1, c), lambda i: (0, 0)),
                  pl.BlockSpec((tm, c), lambda i: (i, 0)),
                  pl.BlockSpec((1, c), lambda i: (0, 0)),
                  pl.BlockSpec((1, c), lambda i: (0, 0))],
        out_specs=pl.BlockSpec((tm, c), lambda i: (i, 0)),
        compiler_params=_PAR1,
    )(y3, sc3, sh3, ys, scs, shs)


def epilogue_id(y3, sc3, sh3, res, tm):
    mp, c = y3.shape
    g = mp // tm
    return pl.pallas_call(
        _epilogue_id_kernel,
        out_shape=jax.ShapeDtypeStruct((mp, c), jnp.bfloat16),
        grid=(g,),
        in_specs=[pl.BlockSpec((tm, c), lambda i: (i, 0)),
                  pl.BlockSpec((1, c), lambda i: (0, 0)),
                  pl.BlockSpec((1, c), lambda i: (0, 0)),
                  pl.BlockSpec((tm, c), lambda i: (i, 0))],
        out_specs=pl.BlockSpec((tm, c), lambda i: (i, 0)),
        compiler_params=_PAR1,
    )(y3, sc3, sh3, res)


# ------------------------------ JAX glue ----------------------------------- #

def make_phases(x_nhwc, stride):
    """Spatially pad (pad=1) and phase-decompose so every 3x3 tap becomes a
    contiguous flat row-window.  Phases are returned flattened as
    (s*s, N, (Hs+1)*Ws, C); the extra block-row keeps every tap window
    in-bounds.  Total bytes ~= input (no 9x im2col blowup)."""
    n, h, w, c = x_nhwc.shape
    s = stride
    h2 = (h - 1) // s + 1
    w2 = (w - 1) // s + 1
    xp = jnp.pad(x_nhwc, ((0, 0), (1, 1), (1, 1), (0, 0)))
    hp, wp = h + 2, w + 2
    hs = -(-hp // s) + 1
    ws = -(-wp // s)
    xp = jnp.pad(xp, ((0, 0), (0, hs * s - hp), (0, ws * s - wp), (0, 0)))
    xr = xp.reshape(n, hs, s, ws, s, c)
    ph = jnp.transpose(xr, (2, 4, 0, 1, 3, 5)).reshape(s * s, n, hs * ws, c)
    return ph, h2, w2, ws


def init_bottleneck_params(key, in_planes, planes):
    """Deterministic synthetic parameters; shapes match the PyTorch module."""
    exp_planes = EXPANSION * planes
    ks = jax.random.split(key, 12)
    return {
        "w1": 0.3 * jax.random.normal(ks[0], (planes, in_planes, 1, 1), jnp.float32),
        "g1": 1.0 + 0.1 * jax.random.normal(ks[1], (planes,), jnp.float32),
        "b1": 0.1 * jax.random.normal(ks[2], (planes,), jnp.float32),
        "w2": 0.2 * jax.random.normal(ks[3], (planes, planes, 3, 3), jnp.float32),
        "g2": 1.0 + 0.1 * jax.random.normal(ks[4], (planes,), jnp.float32),
        "b2": 0.1 * jax.random.normal(ks[5], (planes,), jnp.float32),
        "w3": 0.3 * jax.random.normal(ks[6], (exp_planes, planes, 1, 1), jnp.float32),
        "g3": 1.0 + 0.1 * jax.random.normal(ks[7], (exp_planes,), jnp.float32),
        "b3": 0.1 * jax.random.normal(ks[8], (exp_planes,), jnp.float32),
        "ws": 0.3 * jax.random.normal(ks[9], (exp_planes, in_planes, 1, 1), jnp.float32),
        "gs": 1.0 + 0.1 * jax.random.normal(ks[10], (exp_planes,), jnp.float32),
        "bs": 0.1 * jax.random.normal(ks[11], (exp_planes,), jnp.float32),
    }


def bottleneck_forward(params, x_nchw, stride):
    """Pallas implementation of Bottleneck.forward. Input/output NCHW, f32."""
    x = jnp.transpose(x_nchw, (0, 2, 3, 1))                    # NHWC f32
    n, h, w, cin = x.shape
    planes = params["w1"].shape[0]
    exp_planes = params["w3"].shape[0]
    cinp, pp, ep = _r128(cin), _r128(planes), _r128(exp_planes)

    x_p = _pad_last(x, cinp).astype(jnp.bfloat16)               # lane-dense bf16

    # ---- stage 1: conv1 (1x1) — matmul once, raw y1 + stats ---------------
    m1 = n * h * w
    tm1, m1p = _row_tile(m1)
    xf = _pad_rows(x_p.reshape(m1, cinp), m1p)
    w1 = prep_w_1x1(params["w1"], cinp, pp)
    y1, st1 = conv1x1_stats(xf, w1, tm1)
    sc1, sh1 = fold_bn(st1, m1, params["g1"], params["b1"], pp)
    out1 = bn_relu(y1, sc1, sh1, tm1)[:m1].reshape(n, h, w, pp)  # VPU epilogue

    # ---- stage 2: conv2 (3x3, stride, pad=1) — matmul once, raw y2 + stats -
    ph, h2, w2, ws_pad = make_phases(out1, stride)
    wk2 = prep_w_3x3(params["w2"], pp, pp)
    th = _pick_band(h2, w2, ws_pad)
    y2, st2 = conv3x3_stats(ph, wk2, h2, w2, ws_pad, stride, th)
    m2 = n * h2 * w2
    sc2, sh2 = fold_bn(st2, m2, params["g2"], params["b2"], pp)

    # ---- stage 3: conv3 (1x1) + shortcut — BN2+ReLU prologue fused,
    #      matmul once, then VPU-only add+ReLU epilogue (bf16 out). ----------
    tm2, m2p = _row_tile(m2)
    m_valid = None if m2p == m2 else m2
    a = _pad_rows(y2.reshape(m2, pp), m2p)
    w3 = prep_w_1x1(params["w3"], pp, ep)
    has_proj = (stride != 1) or (cin != exp_planes)
    if has_proj:
        # TODO(synk): read x with a strided index_map instead of this XLA slice.
        xs = _pad_rows(x_p[:, ::stride, ::stride, :].reshape(m2, cinp), m2p)
        wsp = prep_w_1x1(params["ws"], cinp, ep)
        y3, ys, st3, sts = final_proj(a, sc2, sh2, w3, xs, wsp, tm2, m_valid)
        sc3, sh3 = fold_bn(st3, m2, params["g3"], params["b3"], ep)
        scs, shs = fold_bn(sts, m2, params["gs"], params["bs"], ep)
        out3 = epilogue_proj(y3, sc3, sh3, ys, scs, shs, tm2)
    else:
        res = _pad_rows(x_p.reshape(m1, cinp), m2p)             # cinp == ep here
        y3, st3 = final_id(a, sc2, sh2, w3, tm2, m_valid)
        sc3, sh3 = fold_bn(st3, m2, params["g3"], params["b3"], ep)
        out3 = epilogue_id(y3, sc3, sh3, res, tm2)

    out3 = out3[:m2, :exp_planes].reshape(n, h2, w2, exp_planes)
    return jnp.transpose(out3, (0, 3, 1, 2)).astype(jnp.float32)   # NCHW


# ------------------------- pure-JAX reference ------------------------------ #

def bottleneck_reference(params, x_nchw, stride):
    def conv(x, w, s=1, pad=0):
        return jax.lax.conv_general_dilated(
            x, w, (s, s), [(pad, pad), (pad, pad)],
            dimension_numbers=("NCHW", "OIHW", "NCHW"),
            precision=jax.lax.Precision.HIGHEST)

    def bn(x, g, b):
        mean = jnp.mean(x, axis=(0, 2, 3), keepdims=True)
        var = jnp.mean(jnp.square(x - mean), axis=(0, 2, 3), keepdims=True)
        return ((x - mean) * jax.lax.rsqrt(var + EPS)
                * g.reshape(1, -1, 1, 1) + b.reshape(1, -1, 1, 1))

    out = jax.nn.relu(bn(conv(x_nchw, params["w1"]), params["g1"], params["b1"]))
    out = jax.nn.relu(bn(conv(out, params["w2"], s=stride, pad=1),
                         params["g2"], params["b2"]))
    out = bn(conv(out, params["w3"]), params["g3"], params["b3"])
    if stride != 1 or x_nchw.shape[1] != params["w3"].shape[0]:
        sc = bn(conv(x_nchw, params["ws"], s=stride), params["gs"], params["bs"])
    else:
        sc = x_nchw
    return jax.nn.relu(out + sc)


# --------------------------------- main ------------------------------------ #

if __name__ == "__main__":
    key = jax.random.PRNGKey(0)
    k_x, k_p, k_x2, k_p2 = jax.random.split(key, 4)

    # 1) projection-shortcut case (stride 2)
    batch, in_planes, planes, hw, stride = 2, 4, 4, 16, 2
    x = jax.random.normal(k_x, (batch, in_planes, hw, hw), jnp.float32)  # NCHW
    params = init_bottleneck_params(k_p, in_planes, planes)
    fwd = jax.jit(functools.partial(bottleneck_forward, stride=stride))
    out = jax.block_until_ready(fwd(params, x))
    expected_shape = (batch, EXPANSION * planes, hw // stride, hw // stride)
    assert out.shape == expected_shape, (out.shape, expected_shape)
    ref = jax.block_until_ready(bottleneck_reference(params, x, stride))
    np.testing.assert_allclose(np.asarray(out), np.asarray(ref),
                               rtol=5e-2, atol=5e-2)

    # 2) identity-shortcut case (stride 1, in_planes == expansion*planes)
    batch2, in_planes2, planes2, hw2 = 2, 16, 4, 8
    x2 = jax.random.normal(k_x2, (batch2, in_planes2, hw2, hw2), jnp.float32)
    params2 = init_bottleneck_params(k_p2, in_planes2, planes2)
    fwd2 = jax.jit(functools.partial(bottleneck_forward, stride=1))
    out2 = jax.block_until_ready(fwd2(params2, x2))
    assert out2.shape == (batch2, EXPANSION * planes2, hw2, hw2)
    ref2 = jax.block_until_ready(bottleneck_reference(params2, x2, 1))
    np.testing.assert_allclose(np.asarray(out2), np.asarray(ref2),
                               rtol=5e-2, atol=5e-2)

    print("KERNEL_OK")
</pallas_src>

<mosaic_0001>
module attributes {stable_mosaic.version = 11 : i64} {
  func.func @_conv1x1_stats_kernel(%arg0: i32, %arg1: memref<512x128xbf16, #tpu.memory_space<vmem>>, %arg2: memref<128x128xbf16, #tpu.memory_space<vmem>>, %arg3: memref<512x128xbf16, #tpu.memory_space<vmem>>, %arg4: memref<1x2x128xf32, #tpu.memory_space<vmem>>) attributes {dimension_semantics = [#tpu.dimension_semantics<parallel>], iteration_bounds = array<i64: 1>, scalar_prefetch = 0 : i64, scratch_operands = 0 : i64, tpu.core_type = #tpu.core_type<tc>, window_params = [{transform_indices = @transform_0, window_bounds = array<i64: 512, 128>}, {pipeline_mode = #tpu.pipeline_mode<synchronous>, transform_indices = @transform_1, window_bounds = array<i64: 128, 128>}, {transform_indices = @transform_2, window_bounds = array<i64: 512, 128>}, {transform_indices = @transform_3, window_bounds = array<i64: 1, 2, 128>}]} {
    %c0 = arith.constant 0 : index
    %c0_0 = arith.constant 0 : index
    %0 = vector.load %arg1[%c0, %c0_0] : memref<512x128xbf16, #tpu.memory_space<vmem>>, vector<512x128xbf16>
    %c0_1 = arith.constant 0 : index
    %c0_2 = arith.constant 0 : index
    %1 = vector.load %arg2[%c0_1, %c0_2] : memref<128x128xbf16, #tpu.memory_space<vmem>>, vector<128x128xbf16>
    %cst = arith.constant dense<0.000000e+00> : vector<512x128xf32>
    %2 = tpu.matmul %0, %1, %cst {dimension_numbers = #tpu.dot_dimension_numbers<[1], [0], [0], [1], [0, 0, 1, 1], [], []>} : vector<512x128xbf16>, vector<128x128xbf16>, vector<512x128xf32> -> vector<512x128xf32>
    %3 = arith.truncf %2 : vector<512x128xf32> to vector<512x128xbf16>
    %c0_3 = arith.constant 0 : index
    %c0_4 = arith.constant 0 : index
    %4 = vector.load %arg3[%c0_3, %c0_4] : memref<512x128xbf16, #tpu.memory_space<vmem>>, vector<512x128xbf16>
    tpu.vector_store %arg3[%c0_3, %c0_4], %3 {strides = array<i32>} : memref<512x128xbf16, #tpu.memory_space<vmem>>, vector<512x128xbf16>,
    %cst_5 = arith.constant dense<0.000000e+00> : vector<128xf32>
    %5 = vector.multi_reduction <add>, %2, %cst_5 [0] : vector<512x128xf32> to vector<128xf32>
    %6 = vector.shape_cast %5 : vector<128xf32> to vector<1x128xf32>
    %7 = arith.mulf %2, %2 : vector<512x128xf32>
    %cst_6 = arith.constant dense<0.000000e+00> : vector<128xf32>
    %8 = vector.multi_reduction <add>, %7, %cst_6 [0] : vector<512x128xf32> to vector<128xf32>
    %9 = vector.shape_cast %8 : vector<128xf32> to vector<1x128xf32>
    %10 = tpu.concatenate %6, %9 in 0 : vector<1x128xf32>, vector<1x128xf32> -> vector<2x128xf32>
    %c0_7 = arith.constant 0 : index
    %c0_8 = arith.constant 0 : index
    %c0_9 = arith.constant 0 : index
    %11 = vector.load %arg4[%c0_7, %c0_8, %c0_9] : memref<1x2x128xf32, #tpu.memory_space<vmem>>, vector<1x2x128xf32>
    %12 = vector.shape_cast %11 : vector<1x2x128xf32> to vector<2x128xf32>
    %13 = vector.shape_cast %10 : vector<2x128xf32> to vector<1x2x128xf32>
    tpu.vector_store %arg4[%c0_7, %c0_8, %c0_9], %13 {strides = array<i32>} : memref<1x2x128xf32, #tpu.memory_space<vmem>>, vector<1x2x128xf32>,
    return
  }
  func.func @transform_0(%arg0: i32) -> (i32, i32) {
    %c0_i32 = arith.constant 0 : i32
    %c0_i32_0 = arith.constant 0 : i32
    return %arg0, %c0_i32 : i32, i32
  }
  func.func @transform_1(%arg0: i32) -> (i32, i32) {
    %c0_i32 = arith.constant 0 : i32
    %c0_i32_0 = arith.constant 0 : i32
    %c0_i32_1 = arith.constant 0 : i32
    return %c0_i32, %c0_i32_0 : i32, i32
  }
  func.func @transform_2(%arg0: i32) -> (i32, i32) {
    %c0_i32 = arith.constant 0 : i32
    %c0_i32_0 = arith.constant 0 : i32
    return %arg0, %c0_i32 : i32, i32
  }
  func.func @transform_3(%arg0: i32) -> (i32, i32, i32) {
    %c0_i32 = arith.constant 0 : i32
    %c0_i32_0 = arith.constant 0 : i32
    %c0_i32_1 = arith.constant 0 : i32
    return %arg0, %c0_i32, %c0_i32_0 : i32, i32, i32
  }
}

module attributes {stable_mosaic.version = 11 : i64} {
  func.func @_bn_relu_kernel(%arg0: i32, %arg1: memref<512x128xbf16, #tpu.memory_space<vmem>>, %arg2: memref<1x128xf32, #tpu.memory_space<vmem>>, %arg3: memref<1x128xf32, #tpu.memory_space<vmem>>, %arg4: memref<512x128xbf16, #tpu.memory_space<vmem>>) attributes {dimension_semantics = [#tpu.dimension_semantics<parallel>], iteration_bounds = array<i64: 1>, scalar_prefetch = 0 : i64, scratch_operands = 0 : i64, tpu.core_type = #tpu.core_type<tc>, window_params = [{transform_indices = @transform_0, window_bounds = array<i64: 512, 128>}, {pipeline_mode = #tpu.pipeline_mode<synchronous>, transform_indices = @transform_1, window_bounds = array<i64: 1, 128>}, {pipeline_mode = #tpu.pipeline_mode<synchronous>, transform_indices = @transform_2, window_bounds = array<i64: 1, 128>}, {transform_indices = @transform_3, window_bounds = array<i64: 512, 128>}]} {
    %c0 = arith.constant 0 : index
    %c0_0 = arith.constant 0 : index
    %0 = vector.load %arg1[%c0, %c0_0] : memref<512x128xbf16, #tpu.memory_space<vmem>>, vector<512x128xbf16>
    %1 = arith.extf %0 : vector<512x128xbf16> to vector<512x128xf32>
    %c0_1 = arith.constant 0 : index
    %c0_2 = arith.constant 0 : index
    %2 = vector.load %arg2[%c0_1, %c0_2] : memref<1x128xf32, #tpu.memory_space<vmem>>, vector<1x128xf32>
    %3 = vector.broadcast %2 : vector<1x128xf32> to vector<512x128xf32>
    %4 = arith.mulf %1, %3 : vector<512x128xf32>
    %c0_3 = arith.constant 0 : index
    %c0_4 = arith.constant 0 : index
    %5 = vector.load %arg3[%c0_3, %c0_4] : memref<1x128xf32, #tpu.memory_space<vmem>>, vector<1x128xf32>
    %6 = vector.broadcast %5 : vector<1x128xf32> to vector<512x128xf32>
    %7 = arith.addf %4, %6 : vector<512x128xf32>
    %cst = arith.constant 0.000000e+00 : f32
    %8 = vector.broadcast %cst : f32 to vector<512x128xf32>
    %9 = arith.maximumf %7, %8 : vector<512x128xf32>
    %10 = arith.truncf %9 : vector<512x128xf32> to vector<512x128xbf16>
    %c0_5 = arith.constant 0 : index
    %c0_6 = arith.constant 0 : index
    %11 = vector.load %arg4[%c0_5, %c0_6] : memref<512x128xbf16, #tpu.memory_space<vmem>>, vector<512x128xbf16>
    tpu.vector_store %arg4[%c0_5, %c0_6], %10 {strides = array<i32>} : memref<512x128xbf16, #tpu.memory_space<vmem>>, vector<512x128xbf16>,
    return
  }
  func.func @transform_0(%arg0: i32) -> (i32, i32) {
    %c0_i32 = arith.constant 0 : i32
    %c0_i32_0 = arith.constant 0 : i32
    return %arg0, %c0_i32 : i32, i32
  }
  func.func @transform_1(%arg0: i32) -> (i32, i32) {
    %c0_i32 = arith.constant 0 : i32
    %c0_i32_0 = arith.constant 0 : i32
    %c0_i32_1 = arith.constant 0 : i32
    return %c0_i32, %c0_i32_0 : i32, i32
  }
  func.func @transform_2(%arg0: i32) -> (i32, i32) {
    %c0_i32 = arith.constant 0 : i32
    %c0_i32_0 = arith.constant 0 : i32
    %c0_i32_1 = arith.constant 0 : i32
    return %c0_i32, %c0_i32_0 : i32, i32
  }
  func.func @transform_3(%arg0: i32) -> (i32, i32) {
    %c0_i32 = arith.constant 0 : i32
    %c0_i32_0 = arith.constant 0 : i32
    return %arg0, %c0_i32 : i32, i32
  }
}

module attributes {stable_mosaic.version = 11 : i64} {
  func.func @_conv3x3_stats_kernel(%arg0: i32, %arg1: i32, %arg2: memref<4x1x90x128xbf16, #tpu.memory_space<vmem>>, %arg3: memref<9x128x128xbf16, #tpu.memory_space<vmem>>, %arg4: memref<1x64x128xbf16, #tpu.memory_space<vmem>>, %arg5: memref<1x2x128xf32, #tpu.memory_space<vmem>>) attributes {dimension_semantics = [#tpu.dimension_semantics<parallel>, #tpu.dimension_semantics<parallel>], iteration_bounds = array<i64: 2, 1>, scalar_prefetch = 0 : i64, scratch_operands = 0 : i64, tpu.core_type = #tpu.core_type<tc>, window_params = [{transform_indices = @transform_0, window_bounds = array<i64: 4, 1, 90, 128>}, {pipeline_mode = #tpu.pipeline_mode<synchronous>, transform_indices = @transform_1, window_bounds = array<i64: 9, 128, 128>}, {transform_indices = @transform_2, window_bounds = array<i64: 1, 64, 128>}, {transform_indices = @transform_3, window_bounds = array<i64: 1, 2, 128>}]} {
    %c0 = arith.constant 0 : index
    %c0_0 = arith.constant 0 : index
    %c0_1 = arith.constant 0 : index
    %c0_2 = arith.constant 0 : index
    %0 = vector.load %arg2[%c0, %c0_0, %c0_1, %c0_2] : memref<4x1x90x128xbf16, #tpu.memory_space<vmem>>, vector<1x1x72x128xbf16>
    %1 = vector.shape_cast %0 : vector<1x1x72x128xbf16> to vector<72x128xbf16>
    %c0_3 = arith.constant 0 : index
    %c0_4 = arith.constant 0 : index
    %c0_5 = arith.constant 0 : index
    %2 = vector.load %arg3[%c0_3, %c0_4, %c0_5] : memref<9x128x128xbf16, #tpu.memory_space<vmem>>, vector<1x128x128xbf16>
    %3 = vector.shape_cast %2 : vector<1x128x128xbf16> to vector<128x128xbf16>
    %cst = arith.constant dense<0.000000e+00> : vector<72x128xf32>
    %4 = tpu.matmul %1, %3, %cst {dimension_numbers = #tpu.dot_dimension_numbers<[1], [0], [0], [1], [0, 0, 1, 1], [], []>} : vector<72x128xbf16>, vector<128x128xbf16>, vector<72x128xf32> -> vector<72x128xf32>
    %c1 = arith.constant 1 : index
    %c0_6 = arith.constant 0 : index
    %c0_7 = arith.constant 0 : index
    %c0_8 = arith.constant 0 : index
    %5 = vector.load %arg2[%c1, %c0_6, %c0_7, %c0_8] : memref<4x1x90x128xbf16, #tpu.memory_space<vmem>>, vector<1x1x72x128xbf16>
    %6 = vector.shape_cast %5 : vector<1x1x72x128xbf16> to vector<72x128xbf16>
    %c1_9 = arith.constant 1 : index
    %c0_10 = arith.constant 0 : index
    %c0_11 = arith.constant 0 : index
    %7 = vector.load %arg3[%c1_9, %c0_10, %c0_11] : memref<9x128x128xbf16, #tpu.memory_space<vmem>>, vector<1x128x128xbf16>
    %8 = vector.shape_cast %7 : vector<1x128x128xbf16> to vector<128x128xbf16>
    %cst_12 = arith.constant dense<0.000000e+00> : vector<72x128xf32>
    %9 = tpu.matmul %6, %8, %cst_12 {dimension_numbers = #tpu.dot_dimension_numbers<[1], [0], [0], [1], [0, 0, 1, 1], [], []>} : vector<72x128xbf16>, vector<128x128xbf16>, vector<72x128xf32> -> vector<72x128xf32>
    %10 = arith.addf %4, %9 : vector<72x128xf32>
    %c0_13 = arith.constant 0 : index
    %c0_14 = arith.constant 0 : index
    %c1_15 = arith.constant 1 : index
    %c0_16 = arith.constant 0 : index
    %11 = vector.load %arg2[%c0_13, %c0_14, %c1_15, %c0_16] : memref<4x1x90x128xbf16, #tpu.memory_space<vmem>>, vector<1x1x72x128xbf16>
    %12 = vector.shape_cast %11 : vector<1x1x72x128xbf16> to vector<72x128xbf16>
    %c2 = arith.constant 2 : index
    %c0_17 = arith.constant 0 : index
    %c0_18 = arith.constant 0 : index
    %13 = vector.load %arg3[%c2, %c0_17, %c0_18] : memref<9x128x128xbf16, #tpu.memory_space<vmem>>, vector<1x128x128xbf16>
    %14 = vector.shape_cast %13 : vector<1x128x128xbf16> to vector<128x128xbf16>
    %cst_19 = arith.constant dense<0.000000e+00> : vector<72x128xf32>
    %15 = tpu.matmul %12, %14, %cst_19 {dimension_numbers = #tpu.dot_dimension_numbers<[1], [0], [0], [1], [0, 0, 1, 1], [], []>} : vector<72x128xbf16>, vector<128x128xbf16>, vector<72x128xf32> -> vector<72x128xf32>
    %16 = arith.addf %10, %15 : vector<72x128xf32>
    %c2_20 = arith.constant 2 : index
    %c0_21 = arith.constant 0 : index
    %c0_22 = arith.constant 0 : index
    %c0_23 = arith.constant 0 : index
    %17 = vector.load %arg2[%c2_20, %c0_21, %c0_22, %c0_23] : memref<4x1x90x128xbf16, #tpu.memory_space<vmem>>, vector<1x1x72x128xbf16>
    %18 = vector.shape_cast %17 : vector<1x1x72x128xbf16> to vector<72x128xbf16>
    %c3 = arith.constant 3 : index
    %c0_24 = arith.constant 0 : index
    %c0_25 = arith.constant 0 : index
    %19 = vector.load %arg3[%c3, %c0_24, %c0_25] : memref<9x128x128xbf16, #tpu.memory_space<vmem>>, vector<1x128x128xbf16>
    %20 = vector.shape_cast %19 : vector<1x128x128xbf16> to vector<128x128xbf16>
    %cst_26 = arith.constant dense<0.000000e+00> : vector<72x128xf32>
    %21 = tpu.matmul %18, %20, %cst_26 {dimension_numbers = #tpu.dot_dimension_numbers<[1], [0], [0], [1], [0, 0, 1, 1], [], []>} : vector<72x128xbf16>, vector<128x128xbf16>, vector<72x128xf32> -> vector<72x128xf32>
    %22 = arith.addf %16, %21 : vector<72x128xf32>
    %c3_27 = arith.constant 3 : index
    %c0_28 = arith.constant 0 : index
    %c0_29 = arith.constant 0 : index
    %c0_30 = arith.constant 0 : index
    %23 = vector.load %arg2[%c3_27, %c0_28, %c0_29, %c0_30] : memref<4x1x90x128xbf16, #tpu.memory_space<vmem>>, vector<1x1x72x128xbf16>
    %24 = vector.shape_cast %23 : vector<1x1x72x128xbf16> to vector<72x128xbf16>
    %c4 = arith.constant 4 : index
    %c0_31 = arith.constant 0 : index
    %c0_32 = arith.constant 0 : index
    %25 = vector.load %arg3[%c4, %c0_31, %c0_32] : memref<9x128x128xbf16, #tpu.memory_space<vmem>>, vector<1x128x128xbf16>
    %26 = vector.shape_cast %25 : vector<1x128x128xbf16> to vector<128x128xbf16>
    %cst_33 = arith.constant dense<0.000000e+00> : vector<72x128xf32>
    %27 = tpu.matmul %24, %26, %cst_33 {dimension_numbers = #tpu.dot_dimension_numbers<[1], [0], [0], [1], [0, 0, 1, 1], [], []>} : vector<72x128xbf16>, vector<128x128xbf16>, vector<72x128xf32> -> vector<72x128xf32>
    %28 = arith.addf %22, %27 : vector<72x128xf32>
    %c2_34 = arith.constant 2 : index
    %c0_35 = arith.constant 0 : index
    %c1_36 = arith.constant 1 : index
    %c0_37 = arith.constant 0 : index
    %29 = vector.load %arg2[%c2_34, %c0_35, %c1_36, %c0_37] : memref<4x1x90x128xbf16, #tpu.memory_space<vmem>>, vector<1x1x72x128xbf16>
    %30 = vector.shape_cast %29 : vector<1x1x72x128xbf16> to vector<72x128xbf16>
    %c5 = arith.constant 5 : index
    %c0_38 = arith.constant 0 : index
    %c0_39 = arith.constant 0 : index
    %31 = vector.load %arg3[%c5, %c0_38, %c0_39] : memref<9x128x128xbf16, #tpu.memory_space<vmem>>, vector<1x128x128xbf16>
    %32 = vector.shape_cast %31 : vector<1x128x128xbf16> to vector<128x128xbf16>
    %cst_40 = arith.constant dense<0.000000e+00> : vector<72x128xf32>
    %33 = tpu.matmul %30, %32, %cst_40 {dimension_numbers = #tpu.dot_dimension_numbers<[1], [0], [0], [1], [0, 0, 1, 1], [], []>} : vector<72x128xbf16>, vector<128x128xbf16>, vector<72x128xf32> -> vector<72x128xf32>
    %34 = arith.addf %28, %33 : vector<72x128xf32>
    %c0_41 = arith.constant 0 : index
    %c0_42 = arith.constant 0 : index
    %c9 = arith.constant 9 : index
    %c0_43 = arith.constant 0 : index
    %35 = vector.load %arg2[%c0_41, %c0_42, %c9, %c0_43] : memref<4x1x90x128xbf16, #tpu.memory_space<vmem>>, vector<1x1x72x128xbf16>
    %36 = vector.shape_cast %35 : vector<1x1x72x128xbf16> to vector<72x128xbf16>
    %c6 = arith.constant 6 : index
    %c0_44 = arith.constant 0 : index
    %c0_45 = arith.constant 0 : index
    %37 = vector.load %arg3[%c6, %c0_44, %c0_45] : memref<9x128x128xbf16, #tpu.memory_space<vmem>>, vector<1x128x128xbf16>
    %38 = vector.shape_cast %37 : vector<1x128x128xbf16> to vector<128x128xbf16>
    %cst_46 = arith.constant dense<0.000000e+00> : vector<72x128xf32>
    %39 = tpu.matmul %36, %38, %cst_46 {dimension_numbers = #tpu.dot_dimension_numbers<[1], [0], [0], [1], [0, 0, 1, 1], [], []>} : vector<72x128xbf16>, vector<128x128xbf16>, vector<72x128xf32> -> vector<72x128xf32>
    %40 = arith.addf %34, %39 : vector<72x128xf32>
    %c1_47 = arith.constant 1 : index
    %c0_48 = arith.constant 0 : index
    %c9_49 = arith.constant 9 : index
    %c0_50 = arith.constant 0 : index
    %41 = vector.load %arg2[%c1_47, %c0_48, %c9_49, %c0_50] : memref<4x1x90x128xbf16, #tpu.memory_space<vmem>>, vector<1x1x72x128xbf16>
    %42 = vector.shape_cast %41 : vector<1x1x72x128xbf16> to vector<72x128xbf16>
    %c7 = arith.constant 7 : index
    %c0_51 = arith.constant 0 : index
    %c0_52 = arith.constant 0 : index
    %43 = vector.load %arg3[%c7, %c0_51, %c0_52] : memref<9x128x128xbf16, #tpu.memory_space<vmem>>, vector<1x128x128xbf16>
    %44 = vector.shape_cast %43 : vector<1x128x128xbf16> to vector<128x128xbf16>
    %cst_53 = arith.constant dense<0.000000e+00> : vector<72x128xf32>
    %45 = tpu.matmul %42, %44, %cst_53 {dimension_numbers = #tpu.dot_dimension_numbers<[1], [0], [0], [1], [0, 0, 1, 1], [], []>} : vector<72x128xbf16>, vector<128x128xbf16>, vector<72x128xf32> -> vector<72x128xf32>
    %46 = arith.addf %40, %45 : vector<72x128xf32>
    %c0_54 = arith.constant 0 : index
    %c0_55 = arith.constant 0 : index
    %c10 = arith.constant 10 : index
    %c0_56 = arith.constant 0 : index
    %47 = vector.load %arg2[%c0_54, %c0_55, %c10, %c0_56] : memref<4x1x90x128xbf16, #tpu.memory_space<vmem>>, vector<1x1x72x128xbf16>
    %48 = vector.shape_cast %47 : vector<1x1x72x128xbf16> to vector<72x128xbf16>
    %c8 = arith.constant 8 : index
    %c0_57 = arith.constant 0 : index
    %c0_58 = arith.constant 0 : index
    %49 = vector.load %arg3[%c8, %c0_57, %c0_58] : memref<9x128x128xbf16, #tpu.memory_space<vmem>>, vector<1x128x128xbf16>
    %50 = vector.shape_cast %49 : vector<1x128x128xbf16> to vector<128x128xbf16>
    %cst_59 = arith.constant dense<0.000000e+00> : vector<72x128xf32>
    %51 = tpu.matmul %48, %50, %cst_59 {dimension_numbers = #tpu.dot_dimension_numbers<[1], [0], [0], [1], [0, 0, 1, 1], [], []>} : vector<72x128xbf16>, vector<128x128xbf16>, vector<72x128xf32> -> vector<72x128xf32>
    %52 = arith.addf %46, %51 : vector<72x128xf32>
    %53 = vector.shape_cast %52 : vector<72x128xf32> to vector<8x9x128xf32>
    %54 = vector.extract_strided_slice %53 {offsets = [0, 0, 0], sizes = [8, 8, 128], strides = [1, 1, 1]} : vector<8x9x128xf32> to vector<8x8x128xf32>
    %55 = vector.shape_cast %54 : vector<8x8x128xf32> to vector<64x128xf32>
    %56 = arith.truncf %55 : vector<64x128xf32> to vector<64x128xbf16>
    %c0_60 = arith.constant 0 : index
    %c0_61 = arith.constant 0 : index
    %c0_62 = arith.constant 0 : index
    %57 = vector.load %arg4[%c0_60, %c0_61, %c0_62] : memref<1x64x128xbf16, #tpu.memory_space<vmem>>, vector<1x64x128xbf16>
    %58 = vector.shape_cast %57 : vector<1x64x128xbf16> to vector<64x128xbf16>
    %59 = vector.shape_cast %56 : vector<64x128xbf16> to vector<1x64x128xbf16>
    tpu.vector_store %arg4[%c0_60, %c0_61, %c0_62], %59 {strides = array<i32>} : memref<1x64x128xbf16, #tpu.memory_space<vmem>>, vector<1x64x128xbf16>,
    %cst_63 = arith.constant dense<0.000000e+00> : vector<128xf32>
    %60 = vector.multi_reduction <add>, %55, %cst_63 [0] : vector<64x128xf32> to vector<128xf32>
    %61 = vector.shape_cast %60 : vector<128xf32> to vector<1x128xf32>
    %62 = arith.mulf %55, %55 : vector<64x128xf32>
    %cst_64 = arith.constant dense<0.000000e+00> : vector<128xf32>
    %63 = vector.multi_reduction <add>, %62, %cst_64 [0] : vector<64x128xf32> to vector<128xf32>
    %64 = vector.shape_cast %63 : vector<128xf32> to vector<1x128xf32>
    %65 = tpu.concatenate %61, %64 in 0 : vector<1x128xf32>, vector<1x128xf32> -> vector<2x128xf32>
    %c0_65 = arith.constant 0 : index
    %c0_66 = arith.constant 0 : index
    %c0_67 = arith.constant 0 : index
    %66 = vector.load %arg5[%c0_65, %c0_66, %c0_67] : memref<1x2x128xf32, #tpu.memory_space<vmem>>, vector<1x2x128xf32>
    %67 = vector.shape_cast %66 : vector<1x2x128xf32> to vector<2x128xf32>
    %68 = vector.shape_cast %65 : vector<2x128xf32> to vector<1x2x128xf32>
    tpu.vector_store %arg5[%c0_65, %c0_66, %c0_67], %68 {strides = array<i32>} : memref<1x2x128xf32, #tpu.memory_space<vmem>>, vector<1x2x128xf32>,
    return
  }
  func.func @transform_0(%arg0: i32, %arg1: i32) -> (i32, i32, i32, i32) {
    %c0_i32 = arith.constant 0 : i32
    %c0_i32_0 = arith.constant 0 : i32
    %c0_i32_1 = arith.constant 0 : i32
    %c0_i32_2 = arith.constant 0 : i32
    return %c0_i32, %arg0, %c0_i32_0, %c0_i32_1 : i32, i32, i32, i32
  }
  func.func @transform_1(%arg0: i32, %arg1: i32) -> (i32, i32, i32) {
    %c0_i32 = arith.constant 0 : i32
    %c0_i32_0 = arith.constant 0 : i32
    %c0_i32_1 = arith.constant 0 : i32
    %c0_i32_2 = arith.constant 0 : i32
    return %c0_i32, %c0_i32_0, %c0_i32_1 : i32, i32, i32
  }
  func.func @transform_2(%arg0: i32, %arg1: i32) -> (i32, i32, i32) {
    %c0_i32 = arith.constant 0 : i32
    %c0_i32_0 = arith.constant 0 : i32
    return %arg0, %arg1, %c0_i32 : i32, i32, i32
  }
  func.func @transform_3(%arg0: i32, %arg1: i32) -> (i32, i32, i32) {
    %c1_i32 = arith.constant 1 : i32
    %0 = arith.muli %arg0, %c1_i32 : i32
    %1 = arith.addi %0, %arg1 : i32
    %c0_i32 = arith.constant 0 : i32
    %c0_i32_0 = arith.constant 0 : i32
    %c0_i32_1 = arith.constant 0 : i32
    return %1, %c0_i32, %c0_i32_0 : i32, i32, i32
  }
}

module attributes {stable_mosaic.version = 11 : i64} {
  func.func @_final_proj_kernel(%arg0: i32, %arg1: memref<128x128xbf16, #tpu.memory_space<vmem>>, %arg2: memref<1x128xf32, #tpu.memory_space<vmem>>, %arg3: memref<1x128xf32, #tpu.memory_space<vmem>>, %arg4: memref<128x128xbf16, #tpu.memory_space<vmem>>, %arg5: memref<128x128xbf16, #tpu.memory_space<vmem>>, %arg6: memref<128x128xbf16, #tpu.memory_space<vmem>>, %arg7: memref<128x128xbf16, #tpu.memory_space<vmem>>, %arg8: memref<128x128xbf16, #tpu.memory_space<vmem>>, %arg9: memref<1x2x128xf32, #tpu.memory_space<vmem>>, %arg10: memref<1x2x128xf32, #tpu.memory_space<vmem>>) attributes {dimension_semantics = [#tpu.dimension_semantics<parallel>], iteration_bounds = array<i64: 1>, scalar_prefetch = 0 : i64, scratch_operands = 0 : i64, tpu.core_type = #tpu.core_type<tc>, window_params = [{transform_indices = @transform_0, window_bounds = array<i64: 128, 128>}, {pipeline_mode = #tpu.pipeline_mode<synchronous>, transform_indices = @transform_1, window_bounds = array<i64: 1, 128>}, {pipeline_mode = #tpu.pipeline_mode<synchronous>, transform_indices = @transform_2, window_bounds = array<i64: 1, 128>}, {pipeline_mode = #tpu.pipeline_mode<synchronous>, transform_indices = @transform_3, window_bounds = array<i64: 128, 128>}, {transform_indices = @transform_4, window_bounds = array<i64: 128, 128>}, {pipeline_mode = #tpu.pipeline_mode<synchronous>, transform_indices = @transform_5, window_bounds = array<i64: 128, 128>}, {transform_indices = @transform_6, window_bounds = array<i64: 128, 128>}, {transform_indices = @transform_7, window_bounds = array<i64: 128, 128>}, {transform_indices = @transform_8, window_bounds = array<i64: 1, 2, 128>}, {transform_indices = @transform_9, window_bounds = array<i64: 1, 2, 128>}]} {
    %c0 = arith.constant 0 : index
    %c0_0 = arith.constant 0 : index
    %0 = vector.load %arg1[%c0, %c0_0] : memref<128x128xbf16, #tpu.memory_space<vmem>>, vector<128x128xbf16>
    %1 = arith.extf %0 : vector<128x128xbf16> to vector<128x128xf32>
    %c0_1 = arith.constant 0 : index
    %c0_2 = arith.constant 0 : index
    %2 = vector.load %arg2[%c0_1, %c0_2] : memref<1x128xf32, #tpu.memory_space<vmem>>, vector<1x128xf32>
    %3 = vector.broadcast %2 : vector<1x128xf32> to vector<128x128xf32>
    %4 = arith.mulf %1, %3 : vector<128x128xf32>
    %c0_3 = arith.constant 0 : index
    %c0_4 = arith.constant 0 : index
    %5 = vector.load %arg3[%c0_3, %c0_4] : memref<1x128xf32, #tpu.memory_space<vmem>>, vector<1x128xf32>
    %6 = vector.broadcast %5 : vector<1x128xf32> to vector<128x128xf32>
    %7 = arith.addf %4, %6 : vector<128x128xf32>
    %cst = arith.constant 0.000000e+00 : f32
    %8 = vector.broadcast %cst : f32 to vector<128x128xf32>
    %9 = arith.maximumf %7, %8 : vector<128x128xf32>
    %10 = arith.truncf %9 : vector<128x128xf32> to vector<128x128xbf16>
    %c0_5 = arith.constant 0 : index
    %c0_6 = arith.constant 0 : index
    %11 = vector.load %arg4[%c0_5, %c0_6] : memref<128x128xbf16, #tpu.memory_space<vmem>>, vector<128x128xbf16>
    %cst_7 = arith.constant dense<0.000000e+00> : vector<128x128xf32>
    %12 = tpu.matmul %10, %11, %cst_7 {dimension_numbers = #tpu.dot_dimension_numbers<[1], [0], [0], [1], [0, 0, 1, 1], [], []>} : vector<128x128xbf16>, vector<128x128xbf16>, vector<128x128xf32> -> vector<128x128xf32>
    %c0_8 = arith.constant 0 : index
    %c0_9 = arith.constant 0 : index
    %13 = vector.load %arg5[%c0_8, %c0_9] : memref<128x128xbf16, #tpu.memory_space<vmem>>, vector<128x128xbf16>
    %c0_10 = arith.constant 0 : index
    %c0_11 = arith.constant 0 : index
    %14 = vector.load %arg6[%c0_10, %c0_11] : memref<128x128xbf16, #tpu.memory_space<vmem>>, vector<128x128xbf16>
    %cst_12 = arith.constant dense<0.000000e+00> : vector<128x128xf32>
    %15 = tpu.matmul %13, %14, %cst_12 {dimension_numbers = #tpu.dot_dimension_numbers<[1], [0], [0], [1], [0, 0, 1, 1], [], []>} : vector<128x128xbf16>, vector<128x128xbf16>, vector<128x128xf32> -> vector<128x128xf32>
    %16 = arith.truncf %12 : vector<128x128xf32> to vector<128x128xbf16>
    %c0_13 = arith.constant 0 : index
    %c0_14 = arith.constant 0 : index
    %17 = vector.load %arg7[%c0_13, %c0_14] : memref<128x128xbf16, #tpu.memory_space<vmem>>, vector<128x128xbf16>
    tpu.vector_store %arg7[%c0_13, %c0_14], %16 {strides = array<i32>} : memref<128x128xbf16, #tpu.memory_space<vmem>>, vector<128x128xbf16>,
    %18 = arith.truncf %15 : vector<128x128xf32> to vector<128x128xbf16>
    %c0_15 = arith.constant 0 : index
    %c0_16 = arith.constant 0 : index
    %19 = vector.load %arg8[%c0_15, %c0_16] : memref<128x128xbf16, #tpu.memory_space<vmem>>, vector<128x128xbf16>
    tpu.vector_store %arg8[%c0_15, %c0_16], %18 {strides = array<i32>} : memref<128x128xbf16, #tpu.memory_space<vmem>>, vector<128x128xbf16>,
    %cst_17 = arith.constant dense<0.000000e+00> : vector<128xf32>
    %20 = vector.multi_reduction <add>, %12, %cst_17 [0] : vector<128x128xf32> to vector<128xf32>
    %21 = vector.shape_cast %20 : vector<128xf32> to vector<1x128xf32>
    %22 = arith.mulf %12, %12 : vector<128x128xf32>
    %cst_18 = arith.constant dense<0.000000e+00> : vector<128xf32>
    %23 = vector.multi_reduction <add>, %22, %cst_18 [0] : vector<128x128xf32> to vector<128xf32>
    %24 = vector.shape_cast %23 : vector<128xf32> to vector<1x128xf32>
    %25 = tpu.concatenate %21, %24 in 0 : vector<1x128xf32>, vector<1x128xf32> -> vector<2x128xf32>
    %c0_19 = arith.constant 0 : index
    %c0_20 = arith.constant 0 : index
    %c0_21 = arith.constant 0 : index
    %26 = vector.load %arg9[%c0_19, %c0_20, %c0_21] : memref<1x2x128xf32, #tpu.memory_space<vmem>>, vector<1x2x128xf32>
    %27 = vector.shape_cast %26 : vector<1x2x128xf32> to vector<2x128xf32>
    %28 = vector.shape_cast %25 : vector<2x128xf32> to vector<1x2x128xf32>
    tpu.vector_store %arg9[%c0_19, %c0_20, %c0_21], %28 {strides = array<i32>} : memref<1x2x128xf32, #tpu.memory_space<vmem>>, vector<1x2x128xf32>,
    %cst_22 = arith.constant dense<0.000000e+00> : vector<128xf32>
    %29 = vector.multi_reduction <add>, %15, %cst_22 [0] : vector<128x128xf32> to vector<128xf32>
    %30 = vector.shape_cast %29 : vector<128xf32> to vector<1x128xf32>
    %31 = arith.mulf %15, %15 : vector<128x128xf32>
    %cst_23 = arith.constant dense<0.000000e+00> : vector<128xf32>
    %32 = vector.multi_reduction <add>, %31, %cst_23 [0] : vector<128x128xf32> to vector<128xf32>
    %33 = vector.shape_cast %32 : vector<128xf32> to vector<1x128xf32>
    %34 = tpu.concatenate %30, %33 in 0 : vector<1x128xf32>, vector<1x128xf32> -> vector<2x128xf32>
    %c0_24 = arith.constant 0 : index
    %c0_25 = arith.constant 0 : index
    %c0_26 = arith.constant 0 : index
    %35 = vector.load %arg10[%c0_24, %c0_25, %c0_26] : memref<1x2x128xf32, #tpu.memory_space<vmem>>, vector<1x2x128xf32>
    %36 = vector.shape_cast %35 : vector<1x2x128xf32> to vector<2x128xf32>
    %37 = vector.shape_cast %34 : vector<2x128xf32> to vector<1x2x128xf32>
    tpu.vector_store %arg10[%c0_24, %c0_25, %c0_26], %37 {strides = array<i32>} : memref<1x2x128xf32, #tpu.memory_space<vmem>>, vector<1x2x128xf32>,
    return
  }
  func.func @transform_0(%arg0: i32) -> (i32, i32) {
    %c0_i32 = arith.constant 0 : i32
    %c0_i32_0 = arith.constant 0 : i32
    return %arg0, %c0_i32 : i32, i32
  }
  func.func @transform_1(%arg0: i32) -> (i32, i32) {
    %c0_i32 = arith.constant 0 : i32
    %c0_i32_0 = arith.constant 0 : i32
    %c0_i32_1 = arith.constant 0 : i32
    return %c0_i32, %c0_i32_0 : i32, i32
  }
  func.func @transform_2(%arg0: i32) -> (i32, i32) {
    %c0_i32 = arith.constant 0 : i32
    %c0_i32_0 = arith.constant 0 : i32
    %c0_i32_1 = arith.constant 0 : i32
    return %c0_i32, %c0_i32_0 : i32, i32
  }
  func.func @transform_3(%arg0: i32) -> (i32, i32) {
    %c0_i32 = arith.constant 0 : i32
    %c0_i32_0 = arith.constant 0 : i32
    %c0_i32_1 = arith.constant 0 : i32
    return %c0_i32, %c0_i32_0 : i32, i32
  }
  func.func @transform_4(%arg0: i32) -> (i32, i32) {
    %c0_i32 = arith.constant 0 : i32
    %c0_i32_0 = arith.constant 0 : i32
    return %arg0, %c0_i32 : i32, i32
  }
  func.func @transform_5(%arg0: i32) -> (i32, i32) {
    %c0_i32 = arith.constant 0 : i32
    %c0_i32_0 = arith.constant 0 : i32
    %c0_i32_1 = arith.constant 0 : i32
    return %c0_i32, %c0_i32_0 : i32, i32
  }
  func.func @transform_6(%arg0: i32) -> (i32, i32) {
    %c0_i32 = arith.constant 0 : i32
    %c0_i32_0 = arith.constant 0 : i32
    return %arg0, %c0_i32 : i32, i32
  }
  func.func @transform_7(%arg0: i32) -> (i32, i32) {
    %c0_i32 = arith.constant 0 : i32
    %c0_i32_0 = arith.constant 0 : i32
    return %arg0, %c0_i32 : i32, i32
  }
  func.func @transform_8(%arg0: i32) -> (i32, i32, i32) {
    %c0_i32 = arith.constant 0 : i32
    %c0_i32_0 = arith.constant 0 : i32
    %c0_i32_1 = arith.constant 0 : i32
    return %arg0, %c0_i32, %c0_i32_0 : i32, i32, i32
  }
  func.func @transform_9(%arg0: i32) -> (i32, i32, i32) {
    %c0_i32 = arith.constant 0 : i32
    %c0_i32_0 = arith.constant 0 : i32
    %c0_i32_1 = arith.constant 0 : i32
    return %arg0, %c0_i32, %c0_i32_0 : i32, i32, i32
  }
}

module attributes {stable_mosaic.version = 11 : i64} {
  func.func @_epilogue_proj_kernel(%arg0: i32, %arg1: memref<128x128xbf16, #tpu.memory_space<vmem>>, %arg2: memref<1x128xf32, #tpu.memory_space<vmem>>, %arg3: memref<1x128xf32, #tpu.memory_space<vmem>>, %arg4: memref<128x128xbf16, #tpu.memory_space<vmem>>, %arg5: memref<1x128xf32, #tpu.memory_space<vmem>>, %arg6: memref<1x128xf32, #tpu.memory_space<vmem>>, %arg7: memref<128x128xbf16, #tpu.memory_space<vmem>>) attributes {dimension_semantics = [#tpu.dimension_semantics<parallel>], iteration_bounds = array<i64: 1>, scalar_prefetch = 0 : i64, scratch_operands = 0 : i64, tpu.core_type = #tpu.core_type<tc>, window_params = [{transform_indices = @transform_0, window_bounds = array<i64: 128, 128>}, {pipeline_mode = #tpu.pipeline_mode<synchronous>, transform_indices = @transform_1, window_bounds = array<i64: 1, 128>}, {pipeline_mode = #tpu.pipeline_mode<synchronous>, transform_indices = @transform_2, window_bounds = array<i64: 1, 128>}, {transform_indices = @transform_3, window_bounds = array<i64: 128, 128>}, {pipeline_mode = #tpu.pipeline_mode<synchronous>, transform_indices = @transform_4, window_bounds = array<i64: 1, 128>}, {pipeline_mode = #tpu.pipeline_mode<synchronous>, transform_indices = @transform_5, window_bounds = array<i64: 1, 128>}, {transform_indices = @transform_6, window_bounds = array<i64: 128, 128>}]} {
    %c0 = arith.constant 0 : index
    %c0_0 = arith.constant 0 : index
    %0 = vector.load %arg1[%c0, %c0_0] : memref<128x128xbf16, #tpu.memory_space<vmem>>, vector<128x128xbf16>
    %1 = arith.extf %0 : vector<128x128xbf16> to vector<128x128xf32>
    %c0_1 = arith.constant 0 : index
    %c0_2 = arith.constant 0 : index
    %2 = vector.load %arg2[%c0_1, %c0_2] : memref<1x128xf32, #tpu.memory_space<vmem>>, vector<1x128xf32>
    %3 = vector.broadcast %2 : vector<1x128xf32> to vector<128x128xf32>
    %4 = arith.mulf %1, %3 : vector<128x128xf32>
    %c0_3 = arith.constant 0 : index
    %c0_4 = arith.constant 0 : index
    %5 = vector.load %arg3[%c0_3, %c0_4] : memref<1x128xf32, #tpu.memory_space<vmem>>, vector<1x128xf32>
    %6 = vector.broadcast %5 : vector<1x128xf32> to vector<128x128xf32>
    %7 = arith.addf %4, %6 : vector<128x128xf32>
    %c0_5 = arith.constant 0 : index
    %c0_6 = arith.constant 0 : index
    %8 = vector.load %arg4[%c0_5, %c0_6] : memref<128x128xbf16, #tpu.memory_space<vmem>>, vector<128x128xbf16>
    %9 = arith.extf %8 : vector<128x128xbf16> to vector<128x128xf32>
    %c0_7 = arith.constant 0 : index
    %c0_8 = arith.constant 0 : index
    %10 = vector.load %arg5[%c0_7, %c0_8] : memref<1x128xf32, #tpu.memory_space<vmem>>, vector<1x128xf32>
    %11 = vector.broadcast %10 : vector<1x128xf32> to vector<128x128xf32>
    %12 = arith.mulf %9, %11 : vector<128x128xf32>
    %13 = arith.addf %7, %12 : vector<128x128xf32>
    %c0_9 = arith.constant 0 : index
    %c0_10 = arith.constant 0 : index
    %14 = vector.load %arg6[%c0_9, %c0_10] : memref<1x128xf32, #tpu.memory_space<vmem>>, vector<1x128xf32>
    %15 = vector.broadcast %14 : vector<1x128xf32> to vector<128x128xf32>
    %16 = arith.addf %13, %15 : vector<128x128xf32>
    %cst = arith.constant 0.000000e+00 : f32
    %17 = vector.broadcast %cst : f32 to vector<128x128xf32>
    %18 = arith.maximumf %16, %17 : vector<128x128xf32>
    %19 = arith.truncf %18 : vector<128x128xf32> to vector<128x128xbf16>
    %c0_11 = arith.constant 0 : index
    %c0_12 = arith.constant 0 : index
    %20 = vector.load %arg7[%c0_11, %c0_12] : memref<128x128xbf16, #tpu.memory_space<vmem>>, vector<128x128xbf16>
    tpu.vector_store %arg7[%c0_11, %c0_12], %19 {strides = array<i32>} : memref<128x128xbf16, #tpu.memory_space<vmem>>, vector<128x128xbf16>,
    return
  }
  func.func @transform_0(%arg0: i32) -> (i32, i32) {
    %c0_i32 = arith.constant 0 : i32
    %c0_i32_0 = arith.constant 0 : i32
    return %arg0, %c0_i32 : i32, i32
  }
  func.func @transform_1(%arg0: i32) -> (i32, i32) {
    %c0_i32 = arith.constant 0 : i32
    %c0_i32_0 = arith.constant 0 : i32
    %c0_i32_1 = arith.constant 0 : i32
    return %c0_i32, %c0_i32_0 : i32, i32
  }
  func.func @transform_2(%arg0: i32) -> (i32, i32) {
    %c0_i32 = arith.constant 0 : i32
    %c0_i32_0 = arith.constant 0 : i32
    %c0_i32_1 = arith.constant 0 : i32
    return %c0_i32, %c0_i32_0 : i32, i32
  }
  func.func @transform_3(%arg0: i32) -> (i32, i32) {
    %c0_i32 = arith.constant 0 : i32
    %c0_i32_0 = arith.constant 0 : i32
    return %arg0, %c0_i32 : i32, i32
  }
  func.func @transform_4(%arg0: i32) -> (i32, i32) {
    %c0_i32 = arith.constant 0 : i32
    %c0_i32_0 = arith.constant 0 : i32
    %c0_i32_1 = arith.constant 0 : i32
    return %c0_i32, %c0_i32_0 : i32, i32
  }
  func.func @transform_5(%arg0: i32) -> (i32, i32) {
    %c0_i32 = arith.constant 0 : i32
    %c0_i32_0 = arith.constant 0 : i32
    %c0_i32_1 = arith.constant 0 : i32
    return %c0_i32, %c0_i32_0 : i32, i32
  }
  func.func @transform_6(%arg0: i32) -> (i32, i32) {
    %c0_i32 = arith.constant 0 : i32
    %c0_i32_0 = arith.constant 0 : i32
    return %arg0, %c0_i32 : i32, i32
  }
}

</mosaic_0001>

<bundles_post_ra>
// kernel: bottleneck_forward.6
= control target key start
LH: loop header
LB: loop body
LE: loop exit
PB: predicated region body
PF: predicated region fallthrough
CT: control target
= control target key end

     0   :  { %s1502_s0 = inlined_call_operand.vmem [shape: bf16[512,128], index: 0, kind: input, shape index: {}]   ;;  %s1503_s1 = inlined_call_operand.vmem [shape: f32[1,128], index: 1, kind: input, shape index: {}]   ;;  %s1504_s2 = inlined_call_operand.vmem [shape: f32[1,128], index: 2, kind: input, shape index: {}]   ;;  %s1505_s3 = inlined_call_operand.vmem [shape: bf16[512,128], index: 3, kind: output, shape index: {}]  }
   0x1   :  { %v803_v0 = vld [vmem:[%s1502_s0] sm:$0xff]   ;;  %v1090_v4 = vld [vmem:[%s1502_s0 + $0x8] sm:$0xff]   ;;  %v1091_v5 = vld [vmem:[%s1502_s0 + $0x10] sm:$0xff]  }
   0x2   :  { %v1178_v1 = vld [vmem:[%s1503_s1] ss:$0 sm:$0xff]  ;;  %v804_v2 = vunpack.c.l.bf16 %v803_v0  ;;  %v805_v3 = vunpack.c.h.bf16 %v803_v0  ;;  %v1092_v6 = vld [vmem:[%s1502_s0 + $0x18] sm:$0xff]   ;;  %v808_v8 = vunpack.c.l.bf16 %v1090_v4  ;;  %v809_v9 = vunpack.c.h.bf16 %v1090_v4  ;;  %v1094_v33 = vld [vmem:[%s1502_s0 + $0x28] sm:$0xff]  }
   0x3   :  { %v1192_v7 = vld [vmem:[%s1504_s2] ss:$0 sm:$0xff]  ;;  %v812_v10 = vunpack.c.l.bf16 %v1091_v5  ;;  %v813_v11 = vunpack.c.h.bf16 %v1091_v5  ;;  %v816_v14 = vunpack.c.l.bf16 %v1092_v6  ;;  %v817_v15 = vunpack.c.h.bf16 %v1092_v6  ;;  %v1095_v38 = vld [vmem:[%s1502_s0 + $0x30] sm:$0xff]   ;;  %v1096_v43 = vld [vmem:[%s1502_s0 + $0x38] sm:$0xff]  }
   0x4   :  { %v149_v12 = vmul.f32 %v804_v2, %v1178_v1  ;;  %v150_v13 = vmul.f32 %v805_v3, %v1178_v1  ;;  %v151_v16 = vmul.f32 %v808_v8, %v1178_v1  ;;  %v152_v17 = vmul.f32 %v809_v9, %v1178_v1  ;;  %v1093_v28 = vld [vmem:[%s1502_s0 + $0x20] sm:$0xff]  }
   0x5   :  { %v153_v18 = vmul.f32 %v812_v10, %v1178_v1  ;;  %v154_v19 = vmul.f32 %v813_v11, %v1178_v1  ;;  %v155_v22 = vmul.f32 %v816_v14, %v1178_v1  ;;  %v156_v23 = vmul.f32 %v817_v15, %v1178_v1  ;;  %v1097_v0 = vld [vmem:[%s1502_s0 + $0x40] sm:$0xff]   ;;  %v1098_v11 = vld [vmem:[%s1502_s0 + $0x48] sm:$0xff]  }
   0x6   :  { %v220_v20 = vadd.f32 %v1192_v7, %v149_v12  ;;  %v221_v21 = vadd.f32 %v1192_v7, %v150_v13  ;;  %v222_v24 = vadd.f32 %v1192_v7, %v151_v16  ;;  %v223_v25 = vadd.f32 %v1192_v7, %v152_v17  ;;  %v1099_v16 = vld [vmem:[%s1502_s0 + $0x50] sm:$0xff]  }
   0x7   :  { %v224_v26 = vadd.f32 %v1192_v7, %v153_v18  ;;  %v225_v27 = vadd.f32 %v1192_v7, %v154_v19  ;;  %v226_v31 = vadd.f32 %v1192_v7, %v155_v22  ;;  %v227_v32 = vadd.f32 %v1192_v7, %v156_v23 }
   0x8   :  { %v284_v29 = vmax.f32 %v220_v20, 0.0  ;;  %v285_v30 = vmax.f32 %v221_v21, 0.0  ;;  %v286_v34 = vmax.f32 %v222_v24, 0.0  ;;  %v287_v35 = vmax.f32 %v223_v25, 0.0  ;;  %v1100_v25 = vld [vmem:[%s1502_s0 + $0x58] sm:$0xff]  }
   0x9   :  { %v288_v36 = vmax.f32 %v224_v26, 0.0  ;;  %v289_v37 = vmax.f32 %v225_v27, 0.0  ;;  %v290_v40 = vmax.f32 %v226_v31, 0.0  ;;  %v291_v41 = vmax.f32 %v227_v32, 0.0 }
   0xa   :  { %v933_v39 = vpack.c.bf16 %v285_v30, %v284_v29  ;;  %v820_v42 = vunpack.c.l.bf16 %v1093_v28  ;;  %v938_v44 = vpack.c.bf16 %v287_v35, %v286_v34  ;;  %v821_v46 = vunpack.c.h.bf16 %v1093_v28 }
   0xb   :  { %v943_v45 = vpack.c.bf16 %v289_v37, %v288_v36  ;;  %v824_v47 = vunpack.c.l.bf16 %v1094_v33  ;;  %v948_v48 = vpack.c.bf16 %v291_v41, %v290_v40  ;;  %v825_v50 = vunpack.c.h.bf16 %v1094_v33 }
   0xc   :  { %934 = vst [vmem:[%s1505_s3] sm:$0xff] %v933_v39   ;;  %v157_v49 = vmul.f32 %v820_v42, %v1178_v1  ;;  %v828_v51 = vunpack.c.l.bf16 %v1095_v38  ;;  %1121 = vst [vmem:[%s1505_s3 + $0x8] sm:$0xff] %v938_v44   ;;  %v158_v52 = vmul.f32 %v821_v46, %v1178_v1  ;;  %v829_v54 = vunpack.c.h.bf16 %v1095_v38  ;;  %v1101_v38 = vld [vmem:[%s1502_s0 + $0x60] sm:$0xff]  }
   0xd   :  { %1122 = vst [vmem:[%s1505_s3 + $0x10] sm:$0xff] %v943_v45   ;;  %v159_v53 = vmul.f32 %v824_v47, %v1178_v1  ;;  %v832_v55 = vunpack.c.l.bf16 %v1096_v43  ;;  %1123 = vst [vmem:[%s1505_s3 + $0x18] sm:$0xff] %v948_v48   ;;  %v160_v57 = vmul.f32 %v825_v50, %v1178_v1  ;;  %v833_v59 = vunpack.c.h.bf16 %v1096_v43 }
   0xe   :  { %v228_v56 = vadd.f32 %v1192_v7, %v157_v49  ;;  %v161_v58 = vmul.f32 %v828_v51, %v1178_v1  ;;  %v229_v60 = vadd.f32 %v1192_v7, %v158_v52  ;;  %v162_v62 = vmul.f32 %v829_v54, %v1178_v1  ;;  %v1102_v51 = vld [vmem:[%s1502_s0 + $0x68] sm:$0xff]  }
   0xf   :  { %v230_v61 = vadd.f32 %v1192_v7, %v159_v53  ;;  %v163_v63 = vmul.f32 %v832_v55, %v1178_v1  ;;  %v231_v3 = vadd.f32 %v1192_v7, %v160_v57  ;;  %v164_v5 = vmul.f32 %v833_v59, %v1178_v1 }
  0x10   :  { %v292_v2 = vmax.f32 %v228_v56, 0.0  ;;  %v232_v4 = vadd.f32 %v1192_v7, %v161_v58  ;;  %v293_v6 = vmax.f32 %v229_v60, 0.0  ;;  %v233_v9 = vadd.f32 %v1192_v7, %v162_v62  ;;  %v1103_v60 = vld [vmem:[%s1502_s0 + $0x70] sm:$0xff]  }
  0x11   :  { %v294_v8 = vmax.f32 %v230_v61, 0.0  ;;  %v234_v10 = vadd.f32 %v1192_v7, %v163_v63  ;;  %v295_v12 = vmax.f32 %v231_v3, 0.0  ;;  %v235_v14 = vadd.f32 %v1192_v7, %v164_v5 }
  0x12   :  { %v296_v13 = vmax.f32 %v232_v4, 0.0  ;;  %v836_v15 = vunpack.c.l.bf16 %v1097_v0  ;;  %v953_v17 = vpack.c.bf16 %v293_v6, %v292_v2  ;;  %v297_v18 = vmax.f32 %v233_v9, 0.0  ;;  %v1104_v2 = vld [vmem:[%s1502_s0 + $0x78] sm:$0xff]  }
  0x13   :  { %v298_v19 = vmax.f32 %v234_v10, 0.0  ;;  %v837_v20 = vunpack.c.h.bf16 %v1097_v0  ;;  %v958_v21 = vpack.c.bf16 %v295_v12, %v294_v8  ;;  %v299_v22 = vmax.f32 %v235_v14, 0.0  ;;  %v1105_v12 = vld [vmem:[%s1502_s0 + $0x80] sm:$0xff]  }
  0x14   :  { %v165_v23 = vmul.f32 %v836_v15, %v1178_v1  ;;  %v840_v24 = vunpack.c.l.bf16 %v1098_v11  ;;  %1124 = vst [vmem:[%s1505_s3 + $0x20] sm:$0xff] %v953_v17   ;;  %v963_v26 = vpack.c.bf16 %v297_v18, %v296_v13  ;;  %v841_v28 = vunpack.c.h.bf16 %v1098_v11 }
  0x15   :  { %v166_v27 = vmul.f32 %v837_v20, %v1178_v1  ;;  %v844_v29 = vunpack.c.l.bf16 %v1099_v16  ;;  %1125 = vst [vmem:[%s1505_s3 + $0x28] sm:$0xff] %v958_v21   ;;  %v968_v30 = vpack.c.bf16 %v299_v22, %v298_v19  ;;  %v845_v33 = vunpack.c.h.bf16 %v1099_v16 }
  0x16   :  { %v236_v31 = vadd.f32 %v1192_v7, %v165_v23  ;;  %v167_v32 = vmul.f32 %v840_v24, %v1178_v1  ;;  %1126 = vst [vmem:[%s1505_s3 + $0x30] sm:$0xff] %v963_v26   ;;  %v168_v35 = vmul.f32 %v841_v28, %v1178_v1  ;;  %v848_v37 = vunpack.c.l.bf16 %v1100_v25 }
  0x17   :  { %v237_v34 = vadd.f32 %v1192_v7, %v166_v27  ;;  %v169_v36 = vmul.f32 %v844_v29, %v1178_v1  ;;  %1127 = vst [vmem:[%s1505_s3 + $0x38] sm:$0xff] %v968_v30   ;;  %v170_v41 = vmul.f32 %v845_v33, %v1178_v1  ;;  %v849_v42 = vunpack.c.h.bf16 %v1100_v25  ;;  %v1106_v29 = vld [vmem:[%s1502_s0 + $0x88] sm:$0xff]  }
  0x18   :  { %v300_v39 = vmax.f32 %v236_v31, 0.0  ;;  %v238_v40 = vadd.f32 %v1192_v7, %v167_v32  ;;  %v239_v44 = vadd.f32 %v1192_v7, %v168_v35  ;;  %v171_v46 = vmul.f32 %v848_v37, %v1178_v1 }
  0x19   :  { %v301_v43 = vmax.f32 %v237_v34, 0.0  ;;  %v240_v45 = vadd.f32 %v1192_v7, %v169_v36  ;;  %v241_v48 = vadd.f32 %v1192_v7, %v170_v41  ;;  %v172_v49 = vmul.f32 %v849_v42, %v1178_v1  ;;  %v1107_v34 = vld [vmem:[%s1502_s0 + $0x90] sm:$0xff]  }
  0x1a   :  { %v302_v47 = vmax.f32 %v238_v40, 0.0  ;;  %v852_v50 = vunpack.c.l.bf16 %v1101_v38  ;;  %v303_v53 = vmax.f32 %v239_v44, 0.0  ;;  %v242_v55 = vadd.f32 %v1192_v7, %v171_v46 }
  0x1b   :  { %v973_v52 = vpack.c.bf16 %v301_v43, %v300_v39  ;;  %v304_v54 = vmax.f32 %v240_v45, 0.0  ;;  %v305_v56 = vmax.f32 %v241_v48, 0.0  ;;  %v243_v57 = vadd.f32 %v1192_v7, %v172_v49  ;;  %v1108_v43 = vld [vmem:[%s1502_s0 + $0x98] sm:$0xff]  }
  0x1c   :  { %v853_v58 = vunpack.c.h.bf16 %v1101_v38  ;;  %v173_v59 = vmul.f32 %v852_v50, %v1178_v1  ;;  %v978_v61 = vpack.c.bf16 %v303_v53, %v302_v47  ;;  %v306_v62 = vmax.f32 %v242_v55, 0.0 }
  0x1d   :  { %1128 = vst [vmem:[%s1505_s3 + $0x40] sm:$0xff] %v973_v52   ;;  %v856_v63 = vunpack.c.l.bf16 %v1102_v51  ;;  %v857_v0 = vunpack.c.h.bf16 %v1102_v51  ;;  %v983_v3 = vpack.c.bf16 %v305_v56, %v304_v54  ;;  %v307_v4 = vmax.f32 %v243_v57, 0.0  ;;  %v1109_v56 = vld [vmem:[%s1502_s0 + $0xa0] sm:$0xff]  }
  0x1e   :  { %v174_v5 = vmul.f32 %v853_v58, %v1178_v1  ;;  %v244_v6 = vadd.f32 %v1192_v7, %v173_v59  ;;  %1129 = vst [vmem:[%s1505_s3 + $0x48] sm:$0xff] %v978_v61   ;;  %v860_v10 = vunpack.c.l.bf16 %v1103_v60  ;;  %v861_v11 = vunpack.c.h.bf16 %v1103_v60 }
  0x1f   :  { %v175_v8 = vmul.f32 %v856_v63, %v1178_v1  ;;  %v176_v9 = vmul.f32 %v857_v0, %v1178_v1  ;;  %1130 = vst [vmem:[%s1505_s3 + $0x50] sm:$0xff] %v983_v3   ;;  %v988_v13 = vpack.c.bf16 %v307_v4, %v306_v62  ;;  %v864_v16 = vunpack.c.l.bf16 %v1104_v2 }
  0x20   :  { %v245_v14 = vadd.f32 %v1192_v7, %v174_v5  ;;  %v308_v15 = vmax.f32 %v244_v6, 0.0  ;;  %v177_v19 = vmul.f32 %v860_v10, %v1178_v1  ;;  %v178_v20 = vmul.f32 %v861_v11, %v1178_v1 }
  0x21   :  { %v246_v17 = vadd.f32 %v1192_v7, %v175_v8  ;;  %v247_v18 = vadd.f32 %v1192_v7, %v176_v9  ;;  %1131 = vst [vmem:[%s1505_s3 + $0x58] sm:$0xff] %v988_v13   ;;  %v865_v22 = vunpack.c.h.bf16 %v1104_v2  ;;  %v179_v23 = vmul.f32 %v864_v16, %v1178_v1  ;;  %v1110_v2 = vld [vmem:[%s1502_s0 + $0xa8] sm:$0xff]   ;;  %v1111_v16 = vld [vmem:[%s1502_s0 + $0xb0] sm:$0xff]  }
  0x22   :  { %v309_v21 = vmax.f32 %v245_v14, 0.0  ;;  %v868_v24 = vunpack.c.l.bf16 %v1105_v12  ;;  %v248_v27 = vadd.f32 %v1192_v7, %v177_v19  ;;  %v249_v28 = vadd.f32 %v1192_v7, %v178_v20 }
  0x23   :  { %v310_v25 = vmax.f32 %v246_v17, 0.0  ;;  %v311_v26 = vmax.f32 %v247_v18, 0.0  ;;  %v180_v31 = vmul.f32 %v865_v22, %v1178_v1  ;;  %v250_v32 = vadd.f32 %v1192_v7, %v179_v23 }
  0x24   :  { %v993_v30 = vpack.c.bf16 %v309_v21, %v308_v15  ;;  %v869_v33 = vunpack.c.h.bf16 %v1105_v12  ;;  %v312_v36 = vmax.f32 %v248_v27, 0.0  ;;  %v313_v37 = vmax.f32 %v249_v28, 0.0  ;;  %v1112_v21 = vld [vmem:[%s1502_s0 + $0xb8] sm:$0xff]  }
  0x25   :  { %v998_v35 = vpack.c.bf16 %v311_v26, %v310_v25  ;;  %v181_v38 = vmul.f32 %v868_v24, %v1178_v1  ;;  %v251_v39 = vadd.f32 %v1192_v7, %v180_v31  ;;  %v314_v40 = vmax.f32 %v250_v32, 0.0 }
  0x26   :  { %1132 = vst [vmem:[%s1505_s3 + $0x60] sm:$0xff] %v993_v30   ;;  %v182_v41 = vmul.f32 %v869_v33, %v1178_v1  ;;  %v872_v42 = vunpack.c.l.bf16 %v1106_v29  ;;  %v1003_v44 = vpack.c.bf16 %v313_v37, %v312_v36  ;;  %v873_v46 = vunpack.c.h.bf16 %v1106_v29 }
  0x27   :  { %1133 = vst [vmem:[%s1505_s3 + $0x68] sm:$0xff] %v998_v35   ;;  %v252_v45 = vadd.f32 %v1192_v7, %v181_v38  ;;  %v876_v47 = vunpack.c.l.bf16 %v1107_v34  ;;  %v315_v48 = vmax.f32 %v251_v39, 0.0  ;;  %v877_v51 = vunpack.c.h.bf16 %v1107_v34  ;;  %v1113_v34 = vld [vmem:[%s1502_s0 + $0xc0] sm:$0xff]  }
  0x28   :  { %v253_v49 = vadd.f32 %v1192_v7, %v182_v41  ;;  %v183_v50 = vmul.f32 %v872_v42, %v1178_v1  ;;  %1134 = vst [vmem:[%s1505_s3 + $0x70] sm:$0xff] %v1003_v44   ;;  %v184_v53 = vmul.f32 %v873_v46, %v1178_v1  ;;  %v880_v55 = vunpack.c.l.bf16 %v1108_v43 }
  0x29   :  { %v316_v52 = vmax.f32 %v252_v45, 0.0  ;;  %v185_v54 = vmul.f32 %v876_v47, %v1178_v1  ;;  %v1008_v57 = vpack.c.bf16 %v315_v48, %v314_v40  ;;  %v186_v60 = vmul.f32 %v877_v51, %v1178_v1  ;;  %v1114_v47 = vld [vmem:[%s1502_s0 + $0xc8] sm:$0xff]  }
  0x2a   :  { %v317_v58 = vmax.f32 %v253_v49, 0.0  ;;  %v254_v59 = vadd.f32 %v1192_v7, %v183_v50  ;;  %v255_v61 = vadd.f32 %v1192_v7, %v184_v53  ;;  %v881_v63 = vunpack.c.h.bf16 %v1108_v43 }
  0x2b   :  { %v256_v62 = vadd.f32 %v1192_v7, %v185_v54  ;;  %v187_v0 = vmul.f32 %v880_v55, %v1178_v1  ;;  %1135 = vst [vmem:[%s1505_s3 + $0x78] sm:$0xff] %v1008_v57   ;;  %v257_v5 = vadd.f32 %v1192_v7, %v186_v60  ;;  %v884_v6 = vunpack.c.l.bf16 %v1109_v56 }
  0x2c   :  { %v1013_v3 = vpack.c.bf16 %v317_v58, %v316_v52  ;;  %v318_v4 = vmax.f32 %v254_v59, 0.0  ;;  %v319_v8 = vmax.f32 %v255_v61, 0.0  ;;  %v188_v10 = vmul.f32 %v881_v63, %v1178_v1  ;;  %v1115_v52 = vld [vmem:[%s1502_s0 + $0xd0] sm:$0xff]   ;;  %v1116_v61 = vld [vmem:[%s1502_s0 + $0xd8] sm:$0xff]  }
  0x2d   :  { %v320_v9 = vmax.f32 %v256_v62, 0.0  ;;  %v258_v11 = vadd.f32 %v1192_v7, %v187_v0  ;;  %v321_v12 = vmax.f32 %v257_v5, 0.0  ;;  %v885_v13 = vunpack.c.h.bf16 %v1109_v56 }
  0x2e   :  { %1136 = vst [vmem:[%s1505_s3 + $0x80] sm:$0xff] %v1013_v3   ;;  %v189_v14 = vmul.f32 %v884_v6, %v1178_v1  ;;  %v888_v15 = vunpack.c.l.bf16 %v1110_v2  ;;  %v1018_v17 = vpack.c.bf16 %v319_v8, %v318_v4  ;;  %v259_v18 = vadd.f32 %v1192_v7, %v188_v10 }
  0x2f   :  { %v322_v19 = vmax.f32 %v258_v11, 0.0  ;;  %v889_v20 = vunpack.c.h.bf16 %v1110_v2  ;;  %v1023_v22 = vpack.c.bf16 %v321_v12, %v320_v9  ;;  %v190_v23 = vmul.f32 %v885_v13, %v1178_v1  ;;  %v1117_v12 = vld [vmem:[%s1502_s0 + $0xe0] sm:$0xff]  }
  0x30   :  { %v260_v24 = vadd.f32 %v1192_v7, %v189_v14  ;;  %v191_v25 = vmul.f32 %v888_v15, %v1178_v1  ;;  %1137 = vst [vmem:[%s1505_s3 + $0x88] sm:$0xff] %v1018_v17   ;;  %v323_v26 = vmax.f32 %v259_v18, 0.0  ;;  %v892_v28 = vunpack.c.l.bf16 %v1111_v16 }
  0x31   :  { %v192_v27 = vmul.f32 %v889_v20, %v1178_v1  ;;  %v893_v29 = vunpack.c.h.bf16 %v1111_v16  ;;  %1138 = vst [vmem:[%s1505_s3 + $0x90] sm:$0xff] %v1023_v22   ;;  %v261_v30 = vadd.f32 %v1192_v7, %v190_v23  ;;  %v896_v33 = vunpack.c.l.bf16 %v1112_v21 }
  0x32   :  { %v324_v31 = vmax.f32 %v260_v24, 0.0  ;;  %v262_v32 = vadd.f32 %v1192_v7, %v191_v25  ;;  %v1028_v35 = vpack.c.bf16 %v323_v26, %v322_v19  ;;  %v193_v37 = vmul.f32 %v892_v28, %v1178_v1 }
  0x33   :  { %v263_v36 = vadd.f32 %v1192_v7, %v192_v27  ;;  %v194_v38 = vmul.f32 %v893_v29, %v1178_v1  ;;  %v325_v39 = vmax.f32 %v261_v30, 0.0  ;;  %v897_v41 = vunpack.c.h.bf16 %v1112_v21  ;;  %v1118_v21 = vld [vmem:[%s1502_s0 + $0xe8] sm:$0xff]  }
  0x34   :  { %v326_v40 = vmax.f32 %v262_v32, 0.0  ;;  %v195_v42 = vmul.f32 %v896_v33, %v1178_v1  ;;  %1139 = vst [vmem:[%s1505_s3 + $0x98] sm:$0xff] %v1028_v35   ;;  %v264_v44 = vadd.f32 %v1192_v7, %v193_v37  ;;  %v900_v46 = vunpack.c.l.bf16 %v1113_v34 }
  0x35   :  { %v327_v43 = vmax.f32 %v263_v36, 0.0  ;;  %v265_v45 = vadd.f32 %v1192_v7, %v194_v38  ;;  %v1033_v48 = vpack.c.bf16 %v325_v39, %v324_v31  ;;  %v196_v49 = vmul.f32 %v897_v41, %v1178_v1  ;;  %v1120_v39 = vld [vmem:[%s1502_s0 + $0xf8] sm:$0xff]  }
  0x36   :  { %v266_v50 = vadd.f32 %v1192_v7, %v195_v42  ;;  %v901_v51 = vunpack.c.h.bf16 %v1113_v34  ;;  %v328_v54 = vmax.f32 %v264_v44, 0.0  ;;  %v197_v56 = vmul.f32 %v900_v46, %v1178_v1  ;;  %v1119_v34 = vld [vmem:[%s1502_s0 + $0xf0] sm:$0xff]  }
  0x37   :  { %v1038_v53 = vpack.c.bf16 %v327_v43, %v326_v40  ;;  %v329_v55 = vmax.f32 %v265_v45, 0.0  ;;  %1140 = vst [vmem:[%s1505_s3 + $0xa0] sm:$0xff] %v1033_v48   ;;  %v267_v57 = vadd.f32 %v1192_v7, %v196_v49  ;;  %v904_v60 = vunpack.c.l.bf16 %v1114_v47 }
  0x38   :  { %v330_v58 = vmax.f32 %v266_v50, 0.0  ;;  %v198_v59 = vmul.f32 %v901_v51, %v1178_v1  ;;  %v268_v63 = vadd.f32 %v1192_v7, %v197_v56  ;;  %v905_v0 = vunpack.c.h.bf16 %v1114_v47 }
  0x39   :  { %1141 = vst [vmem:[%s1505_s3 + $0xa8] sm:$0xff] %v1038_v53   ;;  %v1043_v62 = vpack.c.bf16 %v329_v55, %v328_v54  ;;  %v908_v2 = vunpack.c.l.bf16 %v1115_v52  ;;  %v331_v3 = vmax.f32 %v267_v57, 0.0  ;;  %v199_v5 = vmul.f32 %v904_v60, %v1178_v1 }
  0x3a   :  { %v269_v4 = vadd.f32 %v1192_v7, %v198_v59  ;;  %v909_v6 = vunpack.c.h.bf16 %v1115_v52  ;;  %v332_v8 = vmax.f32 %v268_v63, 0.0  ;;  %v200_v9 = vmul.f32 %v905_v0, %v1178_v1 }
  0x3b   :  { %1142 = vst [vmem:[%s1505_s3 + $0xb0] sm:$0xff] %v1043_v62   ;;  %v201_v10 = vmul.f32 %v908_v2, %v1178_v1  ;;  %v912_v11 = vunpack.c.l.bf16 %v1116_v61  ;;  %v1048_v13 = vpack.c.bf16 %v331_v3, %v330_v58  ;;  %v270_v15 = vadd.f32 %v1192_v7, %v199_v5 }
  0x3c   :  { %v333_v14 = vmax.f32 %v269_v4, 0.0  ;;  %v202_v16 = vmul.f32 %v909_v6, %v1178_v1  ;;  %v271_v17 = vadd.f32 %v1192_v7, %v200_v9  ;;  %v913_v19 = vunpack.c.h.bf16 %v1116_v61 }
  0x3d   :  { %v272_v18 = vadd.f32 %v1192_v7, %v201_v10  ;;  %v203_v20 = vmul.f32 %v912_v11, %v1178_v1  ;;  %1143 = vst [vmem:[%s1505_s3 + $0xb8] sm:$0xff] %v1048_v13   ;;  %v334_v23 = vmax.f32 %v270_v15, 0.0  ;;  %v916_v25 = vunpack.c.l.bf16 %v1117_v12 }
  0x3e   :  { %v1053_v22 = vpack.c.bf16 %v333_v14, %v332_v8  ;;  %v273_v24 = vadd.f32 %v1192_v7, %v202_v16  ;;  %v335_v26 = vmax.f32 %v271_v17, 0.0  ;;  %v204_v28 = vmul.f32 %v913_v19, %v1178_v1 }
  0x3f   :  { %v336_v27 = vmax.f32 %v272_v18, 0.0  ;;  %v274_v29 = vadd.f32 %v1192_v7, %v203_v20  ;;  %v917_v31 = vunpack.c.h.bf16 %v1117_v12  ;;  %v205_v32 = vmul.f32 %v916_v25, %v1178_v1 }
  0x40   :  { %1144 = vst [vmem:[%s1505_s3 + $0xc0] sm:$0xff] %v1053_v22   ;;  %v337_v30 = vmax.f32 %v273_v24, 0.0  ;;  %v920_v33 = vunpack.c.l.bf16 %v1118_v21  ;;  %v1058_v35 = vpack.c.bf16 %v335_v26, %v334_v23  ;;  %v275_v36 = vadd.f32 %v1192_v7, %v204_v28 }
  0x41   :  { %v338_v37 = vmax.f32 %v274_v29, 0.0  ;;  %v921_v38 = vunpack.c.h.bf16 %v1118_v21  ;;  %v206_v41 = vmul.f32 %v917_v31, %v1178_v1  ;;  %v276_v42 = vadd.f32 %v1192_v7, %v205_v32 }
  0x42   :  { %v1063_v40 = vpack.c.bf16 %v337_v30, %v336_v27  ;;  %v207_v43 = vmul.f32 %v920_v33, %v1178_v1  ;;  %1145 = vst [vmem:[%s1505_s3 + $0xc8] sm:$0xff] %v1058_v35   ;;  %v339_v44 = vmax.f32 %v275_v36, 0.0  ;;  %v924_v46 = vunpack.c.l.bf16 %v1119_v34 }
  0x43   :  { %v208_v45 = vmul.f32 %v921_v38, %v1178_v1  ;;  %v925_v47 = vunpack.c.h.bf16 %v1119_v34  ;;  %v277_v48 = vadd.f32 %v1192_v7, %v206_v41  ;;  %v340_v49 = vmax.f32 %v276_v42, 0.0 }
  0x44   :  { %1146 = vst [vmem:[%s1505_s3 + $0xd0] sm:$0xff] %v1063_v40   ;;  %v278_v50 = vadd.f32 %v1192_v7, %v207_v43  ;;  %v928_v51 = vunpack.c.l.bf16 %v1120_v39  ;;  %v1068_v52 = vpack.c.bf16 %v339_v44, %v338_v37  ;;  %v209_v54 = vmul.f32 %v924_v46, %v1178_v1 }
  0x45   :  { %v279_v53 = vadd.f32 %v1192_v7, %v208_v45  ;;  %v210_v55 = vmul.f32 %v925_v47, %v1178_v1  ;;  %v341_v56 = vmax.f32 %v277_v48, 0.0  ;;  %v929_v58 = vunpack.c.h.bf16 %v1120_v39 }
  0x46   :  { %v342_v57 = vmax.f32 %v278_v50, 0.0  ;;  %v211_v59 = vmul.f32 %v928_v51, %v1178_v1  ;;  %1147 = vst [vmem:[%s1505_s3 + $0xd8] sm:$0xff] %v1068_v52   ;;  %v280_v61 = vadd.f32 %v1192_v7, %v209_v54 }
  0x47   :  { %v343_v60 = vmax.f32 %v279_v53, 0.0  ;;  %v281_v62 = vadd.f32 %v1192_v7, %v210_v55  ;;  %v1073_v63 = vpack.c.bf16 %v341_v56, %v340_v49  ;;  %v212_v0 = vmul.f32 %v929_v58, %v1178_v1 }
  0x48   :  { %v282_v2 = vadd.f32 %v1192_v7, %v211_v59  ;;  %v344_v4 = vmax.f32 %v280_v61, 0.0 }
  0x49   :  { %v1078_v3 = vpack.c.bf16 %v343_v60, %v342_v57  ;;  %v345_v5 = vmax.f32 %v281_v62, 0.0  ;;  %1148 = vst [vmem:[%s1505_s3 + $0xe0] sm:$0xff] %v1073_v63   ;;  %v283_v6 = vadd.f32 %v1192_v7, %v212_v0 }
  0x4a   :  { %v346_v8 = vmax.f32 %v282_v2, 0.0 }
  0x4b   :  { %1149 = vst [vmem:[%s1505_s3 + $0xe8] sm:$0xff] %v1078_v3   ;;  %v1083_v9 = vpack.c.bf16 %v345_v5, %v344_v4  ;;  %v347_v10 = vmax.f32 %v283_v6, 0.0 }
  0x4d   :  { %1150 = vst [vmem:[%s1505_s3 + $0xf0] sm:$0xff] %v1083_v9   ;;  %v1088_v1 = vpack.c.bf16 %v347_v10, %v346_v8 }
  0x4f   :  { %1151 = vst [vmem:[%s1505_s3 + $0xf8] sm:$0xff] %v1088_v1  }

// kernel: bottleneck_forward.5
= control target key start
LH: loop header
LB: loop body
LE: loop exit
PB: predicated region body
PF: predicated region fallthrough
CT: control target
= control target key end

     0   :  { %vm1145_vm0 = vcmask 1040384   ;;  %s2122_s1 = inlined_call_operand.vmem [shape: bf16[128,128], index: 1, kind: input, shape index: {}]   ;;  %s2123_s0 = inlined_call_operand.vmem [shape: bf16[512,128], index: 0, kind: input, shape index: {}]   ;;  %s2124_s2 = inlined_call_operand.vmem [shape: bf16[512,128], index: 2, kind: output, shape index: {0}]   ;;  %s2125_s3 = inlined_call_operand.vmem [shape: f32[1,2,128], index: 3, kind: output, shape index: {1}]  }
   0x1   :  { %v1651_v0 = vld [vmem:[%s2122_s1 + $0x38] sm:$0xff]   ;;  %v1652_v1 = vld [vmem:[%s2122_s1 + $0x30] sm:$0xff]   ;;  %v1653_v2 = vld [vmem:[%s2122_s1 + $0x28] sm:$0xff]  }
   0x2   :  { %1555 = vmatprep.subr.bf16.mxu0 %v1651_v0  ;;  %1635 = vmatprep.subr.bf16.mxu1 %v1651_v0  ;;  %v1654_v3 = vld [vmem:[%s2122_s1 + $0x20] sm:$0xff]   ;;  %v1655_v5 = vld [vmem:[%s2122_s1 + $0x18] sm:$0xff]   ;;  %v1656_v6 = vld [vmem:[%s2122_s1 + $0x10] sm:$0xff]  }
   0x3   :  { %1556 = vmatpush3.bf16.msra.mxu0 %v1651_v0  ;;  %1643 = vmatpush3.bf16.msra.mxu1 %v1651_v0  ;;  %v1659_v4 = vld [vmem:[%s2123_s0] sm:$0xff]   ;;  %v1657_v7 = vld [vmem:[%s2122_s1 + $0x8] sm:$0xff]   ;;  %v1661_v11 = vld [vmem:[%s2123_s0 + $0x10] sm:$0xff]  }
   0x4   :  { %1557 = vmatprep.subr.bf16.mxu0 %v1652_v1  ;;  %1636 = vmatprep.subr.bf16.mxu1 %v1652_v1  ;;  %v1658_v8 = vld [vmem:[%s2122_s1] sm:$0xff]   ;;  %v1660_v10 = vld [vmem:[%s2123_s0 + $0x8] sm:$0xff]   ;;  %v1677_v13 = vld [vmem:[%s2123_s0 + $0x90] sm:$0xff]  }
   0x5   :  { %1571 = vmatprep.mubr.bf16.mxu0 %v1659_v4  ;;  %v1675_v9 = vld [vmem:[%s2123_s0 + $0x80] sm:$0xff]   ;;  %v1676_v12 = vld [vmem:[%s2123_s0 + $0x88] sm:$0xff]   ;;  %v1662_v14 = vld [vmem:[%s2123_s0 + $0x18] sm:$0xff]  }
   0x6   :  { %1603 = vmatprep.mubr.bf16.mxu1 %v1675_v9  ;;  %v1663_v15 = vld [vmem:[%s2123_s0 + $0x20] sm:$0xff]   ;;  %v1678_v16 = vld [vmem:[%s2123_s0 + $0x98] sm:$0xff]   ;;  %v1664_v18 = vld [vmem:[%s2123_s0 + $0x28] sm:$0xff]  }
   0x7   :  { %1558 = vmatpush3.bf16.msra.mxu0 %v1652_v1  ;;  %1644 = vmatpush3.bf16.msra.mxu1 %v1652_v1  ;;  %v1679_v17 = vld [vmem:[%s2123_s0 + $0xa0] sm:$0xff]   ;;  %v1680_v19 = vld [vmem:[%s2123_s0 + $0xa8] sm:$0xff]   ;;  %v1665_v20 = vld [vmem:[%s2123_s0 + $0x30] sm:$0xff]  }
   0x8   :  { %1559 = vmatprep.subr.bf16.mxu0 %v1653_v2  ;;  %1637 = vmatprep.subr.bf16.mxu1 %v1653_v2  ;;  %v1681_v21 = vld [vmem:[%s2123_s0 + $0xb0] sm:$0xff]   ;;  %v1666_v22 = vld [vmem:[%s2123_s0 + $0x38] sm:$0xff]   ;;  %v1667_v24 = vld [vmem:[%s2123_s0 + $0x40] sm:$0xff]  }
   0x9   :  { %v1682_v23 = vld [vmem:[%s2123_s0 + $0xb8] sm:$0xff]   ;;  %v1683_v25 = vld [vmem:[%s2123_s0 + $0xc0] sm:$0xff]   ;;  %v1668_v26 = vld [vmem:[%s2123_s0 + $0x48] sm:$0xff]  }
   0xa   :  { %v1684_v27 = vld [vmem:[%s2123_s0 + $0xc8] sm:$0xff]   ;;  %v1669_v28 = vld [vmem:[%s2123_s0 + $0x50] sm:$0xff]   ;;  %v1670_v30 = vld [vmem:[%s2123_s0 + $0x58] sm:$0xff]  }
   0xb   :  { %1560 = vmatpush3.bf16.msra.mxu0 %v1653_v2  ;;  %1645 = vmatpush3.bf16.msra.mxu1 %v1653_v2  ;;  %v1685_v29 = vld [vmem:[%s2123_s0 + $0xd0] sm:$0xff]   ;;  %v1686_v31 = vld [vmem:[%s2123_s0 + $0xd8] sm:$0xff]   ;;  %v1671_v32 = vld [vmem:[%s2123_s0 + $0x60] sm:$0xff]  }
   0xc   :  { %1561 = vmatprep.subr.bf16.mxu0 %v1654_v3  ;;  %1638 = vmatprep.subr.bf16.mxu1 %v1654_v3  ;;  %v1687_v33 = vld [vmem:[%s2123_s0 + $0xe0] sm:$0xff]   ;;  %v1672_v34 = vld [vmem:[%s2123_s0 + $0x68] sm:$0xff]   ;;  %v1673_v36 = vld [vmem:[%s2123_s0 + $0x70] sm:$0xff]  }
   0xd   :  { %v1688_v35 = vld [vmem:[%s2123_s0 + $0xe8] sm:$0xff]   ;;  %v1689_v37 = vld [vmem:[%s2123_s0 + $0xf0] sm:$0xff]   ;;  %v1674_v38 = vld [vmem:[%s2123_s0 + $0x78] sm:$0xff]  }
   0xe   :  { %v1690_v39 = vld [vmem:[%s2123_s0 + $0xf8] sm:$0xff]  }
   0xf   :  { %1562 = vmatpush3.bf16.msra.mxu0 %v1654_v3  ;;  %1646 = vmatpush3.bf16.msra.mxu1 %v1654_v3 }
  0x10   :  { %1563 = vmatprep.subr.bf16.mxu0 %v1655_v5  ;;  %1639 = vmatprep.subr.bf16.mxu1 %v1655_v5 }
  0x13   :  { %1564 = vmatpush3.bf16.msra.mxu0 %v1655_v5  ;;  %1647 = vmatpush3.bf16.msra.mxu1 %v1655_v5 }
  0x14   :  { %1565 = vmatprep.subr.bf16.mxu0 %v1656_v6  ;;  %1640 = vmatprep.subr.bf16.mxu1 %v1656_v6 }
  0x17   :  { %1566 = vmatpush3.bf16.msra.mxu0 %v1656_v6  ;;  %1648 = vmatpush3.bf16.msra.mxu1 %v1656_v6 }
  0x18   :  { %1567 = vmatprep.subr.bf16.mxu0 %v1657_v7  ;;  %1641 = vmatprep.subr.bf16.mxu1 %v1657_v7 }
  0x1b   :  { %1568 = vmatpush3.bf16.msra.mxu0 %v1657_v7  ;;  %1649 = vmatpush3.bf16.msra.mxu1 %v1657_v7 }
  0x1c   :  { %1569 = vmatprep.subr.bf16.mxu0 %v1658_v8  ;;  %1642 = vmatprep.subr.bf16.mxu1 %v1658_v8 }
  0x1f   :  { %1570 = vmatpush3.bf16.msra.mxu0 %v1658_v8  ;;  %1650 = vmatpush3.bf16.msra.mxu1 %v1658_v8 }
  0x22   :  { %1572 = vmatmul.mubr.bf16.vlgmr.msra.gmra.mxu0 %v1660_v10  ;;  %1604 = vmatmul.mubr.bf16.vlgmr.msra.gmra.mxu1 %v1676_v12 }
  0x23   :  { %1575 = vmatprep.mubr.bf16.mxu0 %v1661_v11  ;;  %1607 = vmatprep.mubr.bf16.mxu1 %v1677_v13 }
  0x2a   :  { %1576 = vmatmul.mubr.bf16.gmra.mxu0 %v1662_v14  ;;  %1608 = vmatmul.mubr.bf16.gmra.mxu1 %v1678_v16 }
  0x2b   :  { %1579 = vmatprep.mubr.bf16.mxu0 %v1663_v15  ;;  %1611 = vmatprep.mubr.bf16.mxu1 %v1679_v17 }
  0x32   :  { %1580 = vmatmul.mubr.bf16.gmra.mxu0 %v1664_v18  ;;  %1612 = vmatmul.mubr.bf16.gmra.mxu1 %v1680_v19 }
  0x33   :  { %1583 = vmatprep.mubr.bf16.mxu0 %v1665_v20  ;;  %1615 = vmatprep.mubr.bf16.mxu1 %v1681_v21 }
  0x3a   :  { %1584 = vmatmul.mubr.bf16.gmra.mxu0 %v1666_v22  ;;  %1616 = vmatmul.mubr.bf16.gmra.mxu1 %v1682_v23 }
  0x3b   :  { %1587 = vmatprep.mubr.bf16.mxu0 %v1667_v24  ;;  %1619 = vmatprep.mubr.bf16.mxu1 %v1683_v25 }
  0x42   :  { %1588 = vmatmul.mubr.bf16.gmra.mxu0 %v1668_v26  ;;  %1620 = vmatmul.mubr.bf16.gmra.mxu1 %v1684_v27 }
  0x43   :  { %1591 = vmatprep.mubr.bf16.mxu0 %v1669_v28  ;;  %1623 = vmatprep.mubr.bf16.mxu1 %v1685_v29 }
  0x4a   :  { %1592 = vmatmul.mubr.bf16.gmra.mxu0 %v1670_v30  ;;  %1624 = vmatmul.mubr.bf16.gmra.mxu1 %v1686_v31 }
  0x4b   :  { %1595 = vmatprep.mubr.bf16.mxu0 %v1671_v32  ;;  %1627 = vmatprep.mubr.bf16.mxu1 %v1687_v33 }
  0x52   :  { %1596 = vmatmul.mubr.bf16.gmra.mxu0 %v1672_v34  ;;  %1628 = vmatmul.mubr.bf16.gmra.mxu1 %v1688_v35 }
  0x53   :  { %1599 = vmatprep.mubr.bf16.mxu0 %v1673_v36  ;;  %1631 = vmatprep.mubr.bf16.mxu1 %v1689_v37 }
  0x5a   :  { %1600 = vmatmul.mubr.bf16.gmra.mxu0 %v1674_v38  ;;  %1632 = vmatmul.mubr.bf16.gmra.mxu1 %v1690_v39 }
  0xe2   :  { %v1573_v40 = vpop.f32.mrf.mxu0  ;;  %v1831_v41 = vpop.f32.mrf.mxu1 }
  0xe3   :  { %v1014_v57 = vmul.f32 %v1573_v40, %v1573_v40 }
  0xe4   :  { %v368_v42 = vpop.f32.mrf.mxu0  ;;  %v1833_v43 = vpop.f32.mrf.mxu1 }
  0xe5   :  { %v1012_v48 = vmul.f32 %v368_v42, %v368_v42 }
  0xe6   :  { %v1574_v44 = vpop.f32.mrf.mxu0  ;;  %v1835_v45 = vpop.f32.mrf.mxu1 }
  0xe7   :  { %v1332_v46 = vpack.c.bf16 %v1574_v44, %v1573_v40  ;;  %v1412_v47 = vpack.c.bf16 %v1835_v45, %v1831_v41  ;;  %v1015_v62 = vmul.f32 %v1574_v44, %v1574_v44 }
  0xe8   :  { %v371_v49 = vpop.f32.mrf.mxu0  ;;  %v1839_v50 = vpop.f32.mrf.mxu1 }
  0xe9   :  { %1484 = vst [vmem:[%s2124_s2 + $0x8] sm:$0xff] %v1332_v46   ;;  %v1327_v51 = vpack.c.bf16 %v371_v49, %v368_v42  ;;  %v943_v52 = vadd.f32 %v371_v49, %v368_v42  ;;  %v1013_v53 = vmul.f32 %v371_v49, %v371_v49  ;;  %1500 = vst [vmem:[%s2124_s2 + $0x88] sm:$0xff] %v1412_v47  }
  0xea   :  { %v1407_v54 = vpack.c.bf16 %v1839_v50, %v1833_v43  ;;  %v1577_v55 = vpop.f32.mrf.mxu0  ;;  %v1849_v56 = vpop.f32.mrf.mxu1 }
  0xeb   :  { %1328 = vst [vmem:[%s2124_s2] sm:$0xff] %v1327_v51   ;;  %v944_v58 = vadd.f32 %v1573_v40, %v943_v52  ;;  %v1076_v59 = vadd.f32 %v1013_v53, %v1012_v48  ;;  %v1018_v17 = vmul.f32 %v1577_v55, %v1577_v55 }
  0xec   :  { %1499 = vst [vmem:[%s2124_s2 + $0x80] sm:$0xff] %v1407_v54   ;;  %v384_v60 = vpop.f32.mrf.mxu0  ;;  %v1857_v61 = vpop.f32.mrf.mxu1 }
  0xed   :  { %v1077_v63 = vadd.f32 %v1076_v59, %v1014_v57  ;;  %v945_v0 = vadd.f32 %v1574_v44, %v944_v58  ;;  %v1016_v4 = vmul.f32 %v384_v60, %v384_v60 }
  0xee   :  { %v1578_v1 = vpop.f32.mrf.mxu0  ;;  %v1859_v2 = vpop.f32.mrf.mxu1 }
  0xef   :  { %v946_v3 = vadd.f32 %v945_v0, %v384_v60  ;;  %v1078_v5 = vadd.f32 %v1077_v63, %v1015_v62  ;;  %v1342_v6 = vpack.c.bf16 %v1578_v1, %v1577_v55  ;;  %v1422_v8 = vpack.c.bf16 %v1859_v2, %v1849_v56 }
  0xf0   :  { %v387_v7 = vpop.f32.mrf.mxu0  ;;  %v1863_v9 = vpop.f32.mrf.mxu1  ;;  %v1019_v22 = vmul.f32 %v1578_v1, %v1578_v1 }
  0xf1   :  { %v1079_v10 = vadd.f32 %v1078_v5, %v1016_v4  ;;  %1486 = vst [vmem:[%s2124_s2 + $0x18] sm:$0xff] %v1342_v6   ;;  %v1337_v11 = vpack.c.bf16 %v387_v7, %v384_v60  ;;  %v947_v12 = vadd.f32 %v946_v3, %v387_v7  ;;  %v1017_v13 = vmul.f32 %v387_v7, %v387_v7 }
  0xf2   :  { %v1581_v14 = vpop.f32.mrf.mxu0  ;;  %1502 = vst [vmem:[%s2124_s2 + $0x98] sm:$0xff] %v1422_v8   ;;  %v1417_v15 = vpack.c.bf16 %v1863_v9, %v1857_v61  ;;  %v1873_v16 = vpop.f32.mrf.mxu1 }
  0xf3   :  { %1485 = vst [vmem:[%s2124_s2 + $0x10] sm:$0xff] %v1337_v11   ;;  %v948_v18 = vadd.f32 %v1577_v55, %v947_v12  ;;  %v1080_v19 = vadd.f32 %v1079_v10, %v1017_v13  ;;  %v1022_v42 = vmul.f32 %v1581_v14, %v1581_v14 }
  0xf4   :  { %v400_v20 = vpop.f32.mrf.mxu0  ;;  %1501 = vst [vmem:[%s2124_s2 + $0x90] sm:$0xff] %v1417_v15   ;;  %v1881_v21 = vpop.f32.mrf.mxu1 }
  0xf5   :  { %v1081_v23 = vadd.f32 %v1080_v19, %v1018_v17  ;;  %v949_v24 = vadd.f32 %v1578_v1, %v948_v18  ;;  %v1020_v28 = vmul.f32 %v400_v20, %v400_v20 }
  0xf6   :  { %v1582_v25 = vpop.f32.mrf.mxu0  ;;  %v1883_v26 = vpop.f32.mrf.mxu1 }
  0xf7   :  { %v950_v27 = vadd.f32 %v949_v24, %v400_v20  ;;  %v1082_v29 = vadd.f32 %v1081_v23, %v1019_v22  ;;  %v1352_v30 = vpack.c.bf16 %v1582_v25, %v1581_v14  ;;  %v1432_v32 = vpack.c.bf16 %v1883_v26, %v1873_v16 }
  0xf8   :  { %v403_v31 = vpop.f32.mrf.mxu0  ;;  %v1887_v33 = vpop.f32.mrf.mxu1  ;;  %v1023_v49 = vmul.f32 %v1582_v25, %v1582_v25 }
  0xf9   :  { %v1083_v34 = vadd.f32 %v1082_v29, %v1020_v28  ;;  %1488 = vst [vmem:[%s2124_s2 + $0x28] sm:$0xff] %v1352_v30   ;;  %v1347_v35 = vpack.c.bf16 %v403_v31, %v400_v20  ;;  %v951_v36 = vadd.f32 %v950_v27, %v403_v31  ;;  %v1021_v37 = vmul.f32 %v403_v31, %v403_v31 }
  0xfa   :  { %v1585_v38 = vpop.f32.mrf.mxu0  ;;  %1504 = vst [vmem:[%s2124_s2 + $0xa8] sm:$0xff] %v1432_v32   ;;  %v1427_v39 = vpack.c.bf16 %v1887_v33, %v1881_v21  ;;  %v1897_v40 = vpop.f32.mrf.mxu1 }
  0xfb   :  { %1487 = vst [vmem:[%s2124_s2 + $0x20] sm:$0xff] %v1347_v35   ;;  %v952_v44 = vadd.f32 %v1581_v14, %v951_v36  ;;  %v1084_v46 = vadd.f32 %v1083_v34, %v1021_v37  ;;  %v1026_v8 = vmul.f32 %v1585_v38, %v1585_v38 }
  0xfc   :  { %v416_v47 = vpop.f32.mrf.mxu0  ;;  %1503 = vst [vmem:[%s2124_s2 + $0xa0] sm:$0xff] %v1427_v39   ;;  %v1905_v48 = vpop.f32.mrf.mxu1 }
  0xfd   :  { %v1085_v51 = vadd.f32 %v1084_v46, %v1022_v42  ;;  %v953_v52 = vadd.f32 %v1582_v25, %v952_v44  ;;  %v1024_v57 = vmul.f32 %v416_v47, %v416_v47 }
  0xfe   :  { %v1586_v53 = vpop.f32.mrf.mxu0  ;;  %v1907_v54 = vpop.f32.mrf.mxu1 }
  0xff   :  { %v954_v55 = vadd.f32 %v953_v52, %v416_v47  ;;  %v1086_v58 = vadd.f32 %v1085_v51, %v1023_v49  ;;  %v1362_v59 = vpack.c.bf16 %v1586_v53, %v1585_v38  ;;  %v1442_v62 = vpack.c.bf16 %v1907_v54, %v1897_v40 }
 0x100   :  { %v419_v60 = vpop.f32.mrf.mxu0  ;;  %v1911_v63 = vpop.f32.mrf.mxu1  ;;  %v1027_v14 = vmul.f32 %v1586_v53, %v1586_v53 }
 0x101   :  { %v1087_v0 = vadd.f32 %v1086_v58, %v1024_v57  ;;  %1490 = vst [vmem:[%s2124_s2 + $0x38] sm:$0xff] %v1362_v59   ;;  %v1357_v1 = vpack.c.bf16 %v419_v60, %v416_v47  ;;  %v955_v3 = vadd.f32 %v954_v55, %v419_v60  ;;  %v1025_v4 = vmul.f32 %v419_v60, %v419_v60 }
 0x102   :  { %v1589_v5 = vpop.f32.mrf.mxu0  ;;  %1506 = vst [vmem:[%s2124_s2 + $0xb8] sm:$0xff] %v1442_v62   ;;  %v1437_v6 = vpack.c.bf16 %v1911_v63, %v1905_v48  ;;  %v1921_v7 = vpop.f32.mrf.mxu1 }
 0x103   :  { %1489 = vst [vmem:[%s2124_s2 + $0x30] sm:$0xff] %v1357_v1   ;;  %v956_v10 = vadd.f32 %v1585_v38, %v955_v3  ;;  %v1088_v11 = vadd.f32 %v1087_v0, %v1025_v4  ;;  %v1030_v37 = vmul.f32 %v1589_v5, %v1589_v5 }
 0x104   :  { %v432_v12 = vpop.f32.mrf.mxu0  ;;  %1505 = vst [vmem:[%s2124_s2 + $0xb0] sm:$0xff] %v1437_v6   ;;  %v1929_v13 = vpop.f32.mrf.mxu1 }
 0x105   :  { %v1089_v15 = vadd.f32 %v1088_v11, %v1026_v8  ;;  %v957_v17 = vadd.f32 %v1586_v53, %v956_v10  ;;  %v1028_v22 = vmul.f32 %v432_v12, %v432_v12 }
 0x106   :  { %v1590_v18 = vpop.f32.mrf.mxu0  ;;  %v1931_v19 = vpop.f32.mrf.mxu1 }
 0x107   :  { %v958_v20 = vadd.f32 %v957_v17, %v432_v12  ;;  %v1090_v23 = vadd.f32 %v1089_v15, %v1027_v14  ;;  %v1372_v24 = vpack.c.bf16 %v1590_v18, %v1589_v5  ;;  %v1452_v27 = vpack.c.bf16 %v1931_v19, %v1921_v7 }
 0x108   :  { %v435_v25 = vpop.f32.mrf.mxu0  ;;  %v1935_v28 = vpop.f32.mrf.mxu1  ;;  %v1031_v46 = vmul.f32 %v1590_v18, %v1590_v18 }
 0x109   :  { %v1091_v29 = vadd.f32 %v1090_v23, %v1028_v22  ;;  %1492 = vst [vmem:[%s2124_s2 + $0x48] sm:$0xff] %v1372_v24   ;;  %v1367_v30 = vpack.c.bf16 %v435_v25, %v432_v12  ;;  %v959_v31 = vadd.f32 %v958_v20, %v435_v25  ;;  %v1029_v32 = vmul.f32 %v435_v25, %v435_v25 }
 0x10a   :  { %v1593_v34 = vpop.f32.mrf.mxu0  ;;  %1508 = vst [vmem:[%s2124_s2 + $0xc8] sm:$0xff] %v1452_v27   ;;  %v1447_v35 = vpack.c.bf16 %v1935_v28, %v1929_v13  ;;  %v1945_v36 = vpop.f32.mrf.mxu1 }
 0x10b   :  { %1491 = vst [vmem:[%s2124_s2 + $0x40] sm:$0xff] %v1367_v30   ;;  %v960_v38 = vadd.f32 %v1589_v5, %v959_v31  ;;  %v1092_v39 = vadd.f32 %v1091_v29, %v1029_v32  ;;  %v1034_v10 = vmul.f32 %v1593_v34, %v1593_v34 }
 0x10c   :  { %v448_v42 = vpop.f32.mrf.mxu0  ;;  %1507 = vst [vmem:[%s2124_s2 + $0xc0] sm:$0xff] %v1447_v35   ;;  %v1953_v44 = vpop.f32.mrf.mxu1 }
 0x10d   :  { %v1093_v47 = vadd.f32 %v1092_v39, %v1030_v37  ;;  %v961_v49 = vadd.f32 %v1590_v18, %v960_v38  ;;  %v1032_v55 = vmul.f32 %v448_v42, %v448_v42 }
 0x10e   :  { %v1594_v51 = vpop.f32.mrf.mxu0  ;;  %v1955_v52 = vpop.f32.mrf.mxu1 }
 0x10f   :  { %v962_v53 = vadd.f32 %v961_v49, %v448_v42  ;;  %v1094_v57 = vadd.f32 %v1093_v47, %v1031_v46  ;;  %v1382_v58 = vpack.c.bf16 %v1594_v51, %v1593_v34  ;;  %v1462_v60 = vpack.c.bf16 %v1955_v52, %v1945_v36 }
 0x110   :  { %v451_v59 = vpop.f32.mrf.mxu0  ;;  %v1959_v62 = vpop.f32.mrf.mxu1  ;;  %v1035_v17 = vmul.f32 %v1594_v51, %v1594_v51 }
 0x111   :  { %v1095_v0 = vadd.f32 %v1094_v57, %v1032_v55  ;;  %1494 = vst [vmem:[%s2124_s2 + $0x58] sm:$0xff] %v1382_v58   ;;  %v1377_v1 = vpack.c.bf16 %v451_v59, %v448_v42  ;;  %v963_v3 = vadd.f32 %v962_v53, %v451_v59  ;;  %v1033_v4 = vmul.f32 %v451_v59, %v451_v59 }
 0x112   :  { %v1597_v5 = vpop.f32.mrf.mxu0  ;;  %1510 = vst [vmem:[%s2124_s2 + $0xd8] sm:$0xff] %v1462_v60   ;;  %v1457_v6 = vpack.c.bf16 %v1959_v62, %v1953_v44  ;;  %v1969_v8 = vpop.f32.mrf.mxu1 }
 0x113   :  { %1493 = vst [vmem:[%s2124_s2 + $0x50] sm:$0xff] %v1377_v1   ;;  %v964_v11 = vadd.f32 %v1593_v34, %v963_v3  ;;  %v1096_v12 = vadd.f32 %v1095_v0, %v1033_v4  ;;  %v1038_v47 = vmul.f32 %v1597_v5, %v1597_v5 }
 0x114   :  { %v464_v14 = vpop.f32.mrf.mxu0  ;;  %1509 = vst [vmem:[%s2124_s2 + $0xd0] sm:$0xff] %v1457_v6   ;;  %v1977_v15 = vpop.f32.mrf.mxu1 }
 0x115   :  { %v1097_v18 = vadd.f32 %v1096_v12, %v1034_v10  ;;  %v965_v20 = vadd.f32 %v1594_v51, %v964_v11  ;;  %v1036_v25 = vmul.f32 %v464_v14, %v464_v14 }
 0x116   :  { %v1598_v22 = vpop.f32.mrf.mxu0  ;;  %v1979_v23 = vpop.f32.mrf.mxu1 }
 0x117   :  { %v966_v24 = vadd.f32 %v965_v20, %v464_v14  ;;  %v1098_v27 = vadd.f32 %v1097_v18, %v1035_v17  ;;  %v1392_v29 = vpack.c.bf16 %v1598_v22, %v1597_v5  ;;  %v1472_v31 = vpack.c.bf16 %v1979_v23, %v1969_v8 }
 0x118   :  { %v467_v30 = vpop.f32.mrf.mxu0  ;;  %v1983_v32 = vpop.f32.mrf.mxu1  ;;  %v1039_v57 = vmul.f32 %v1598_v22, %v1598_v22 }
 0x119   :  { %v1099_v34 = vadd.f32 %v1098_v27, %v1036_v25  ;;  %1496 = vst [vmem:[%s2124_s2 + $0x68] sm:$0xff] %v1392_v29   ;;  %v1387_v35 = vpack.c.bf16 %v467_v30, %v464_v14  ;;  %v967_v37 = vadd.f32 %v966_v24, %v467_v30  ;;  %v1037_v38 = vmul.f32 %v467_v30, %v467_v30 }
 0x11a   :  { %v1601_v39 = vpop.f32.mrf.mxu0  ;;  %1512 = vst [vmem:[%s2124_s2 + $0xe8] sm:$0xff] %v1472_v31   ;;  %v1467_v42 = vpack.c.bf16 %v1983_v32, %v1977_v15  ;;  %v1993_v46 = vpop.f32.mrf.mxu1  ;;  %v1044_v31 = vmul.f32 %v1833_v43, %v1833_v43 }
 0x11b   :  { %1495 = vst [vmem:[%s2124_s2 + $0x60] sm:$0xff] %v1387_v35   ;;  %v968_v49 = vadd.f32 %v1597_v5, %v967_v37  ;;  %v1100_v51 = vadd.f32 %v1099_v34, %v1037_v38  ;;  %v1045_v38 = vmul.f32 %v1839_v50, %v1839_v50 }
 0x11c   :  { %v480_v53 = vpop.f32.mrf.mxu0  ;;  %1511 = vst [vmem:[%s2124_s2 + $0xe0] sm:$0xff] %v1467_v42   ;;  %v2001_v55 = vpop.f32.mrf.mxu1  ;;  %v1046_v42 = vmul.f32 %v1831_v41, %v1831_v41 }
 0x11d   :  { %v1101_v58 = vadd.f32 %v1100_v51, %v1038_v47  ;;  %v969_v59 = vadd.f32 %v1598_v22, %v968_v49  ;;  %v1040_v3 = vmul.f32 %v480_v53, %v480_v53  ;;  %v1042_v22 = vmul.f32 %v1601_v39, %v1601_v39 }
 0x11e   :  { %v1602_v60 = vpop.f32.mrf.mxu0  ;;  %v2003_v0 = vpop.f32.mrf.mxu1  ;;  %v1047_v51 = vmul.f32 %v1835_v45, %v1835_v45 }
 0x11f   :  { %v970_v1 = vadd.f32 %v969_v59, %v480_v53  ;;  %v1102_v4 = vadd.f32 %v1101_v58, %v1039_v57  ;;  %v1402_v6 = vpack.c.bf16 %v1602_v60, %v1601_v39  ;;  %v1482_v5 = vpack.c.bf16 %v2003_v0, %v1993_v46 }
 0x120   :  { %v483_v10 = vpop.f32.mrf.mxu0  ;;  %v2007_v11 = vpop.f32.mrf.mxu1  ;;  %v1043_v27 = vmul.f32 %v1602_v60, %v1602_v60  ;;  %v1048_v58 = vmul.f32 %v1857_v61, %v1857_v61 }
 0x121   :  { %v1103_v12 = vadd.f32 %v1102_v4, %v1040_v3  ;;  %1498 = vst [vmem:[%s2124_s2 + $0x78] sm:$0xff] %v1402_v6   ;;  %v1397_v14 = vpack.c.bf16 %v483_v10, %v480_v53  ;;  %v971_v17 = vadd.f32 %v970_v1, %v483_v10  ;;  %v1041_v18 = vmul.f32 %v483_v10, %v483_v10 }
 0x122   :  { %1514 = vst [vmem:[%s2124_s2 + $0xf8] sm:$0xff] %v1482_v5   ;;  %v1477_v20 = vpack.c.bf16 %v2007_v11, %v2001_v55  ;;  %v1049_v1 = vmul.f32 %v1863_v9, %v1863_v9  ;;  %v1052_v5 = vmul.f32 %v1881_v21, %v1881_v21 }
 0x123   :  { %1497 = vst [vmem:[%s2124_s2 + $0x70] sm:$0xff] %v1397_v14   ;;  %v972_v24 = vadd.f32 %v1601_v39, %v971_v17  ;;  %v1104_v25 = vadd.f32 %v1103_v12, %v1041_v18  ;;  %v1053_v17 = vmul.f32 %v1887_v33, %v1887_v33 }
 0x124   :  { %1513 = vst [vmem:[%s2124_s2 + $0xf0] sm:$0xff] %v1477_v20  }
 0x125   :  { %v973_v29 = vadd.f32 %v1602_v60, %v972_v24  ;;  %v1105_v30 = vadd.f32 %v1104_v25, %v1042_v22  ;;  %v1056_v25 = vmul.f32 %v1905_v48, %v1905_v48 }
 0x127   :  { %v1106_v34 = vadd.f32 %v1105_v30, %v1043_v27  ;;  %v974_v35 = vadd.f32 %v973_v29, %v1833_v43  ;;  %v1057_v30 = vmul.f32 %v1911_v63, %v1911_v63 }
 0x129   :  { %v975_v37 = vadd.f32 %v974_v35, %v1839_v50  ;;  %v1107_v39 = vadd.f32 %v1106_v34, %v1044_v31 }
 0x12b   :  { %v976_v47 = vadd.f32 %v1831_v41, %v975_v37  ;;  %v1108_v49 = vadd.f32 %v1107_v39, %v1045_v38  ;;  %v1050_v41 = vmul.f32 %v1849_v56, %v1849_v56  ;;  %v1060_v38 = vmul.f32 %v1929_v13, %v1929_v13 }
 0x12d   :  { %v1109_v53 = vadd.f32 %v1108_v49, %v1046_v42  ;;  %v977_v57 = vadd.f32 %v1835_v45, %v976_v47  ;;  %v1051_v45 = vmul.f32 %v1859_v2, %v1859_v2  ;;  %v1061_v47 = vmul.f32 %v1935_v28, %v1935_v28 }
 0x12f   :  { %v978_v43 = vadd.f32 %v977_v57, %v1857_v61  ;;  %v1110_v59 = vadd.f32 %v1109_v53, %v1047_v51 }
 0x131   :  { %v1111_v50 = vadd.f32 %v1110_v59, %v1048_v58  ;;  %v979_v60 = vadd.f32 %v978_v43, %v1863_v9  ;;  %v1064_v43 = vmul.f32 %v1953_v44, %v1953_v44 }
 0x133   :  { %v980_v3 = vadd.f32 %v1849_v56, %v979_v60  ;;  %v1112_v4 = vadd.f32 %v1111_v50, %v1049_v1  ;;  %v1054_v56 = vmul.f32 %v1873_v16, %v1873_v16  ;;  %v1065_v50 = vmul.f32 %v1959_v62, %v1959_v62 }
 0x135   :  { %v1113_v6 = vadd.f32 %v1112_v4, %v1050_v41  ;;  %v981_v10 = vadd.f32 %v1859_v2, %v980_v3  ;;  %v1055_v2 = vmul.f32 %v1883_v26, %v1883_v26  ;;  %v1068_v4 = vmul.f32 %v1977_v15, %v1977_v15 }
 0x137   :  { %v982_v61 = vadd.f32 %v981_v10, %v1881_v21  ;;  %v1114_v12 = vadd.f32 %v1113_v6, %v1051_v45  ;;  %v1069_v10 = vmul.f32 %v1983_v32, %v1983_v32 }
 0x139   :  { %v1115_v14 = vadd.f32 %v1114_v12, %v1052_v5  ;;  %v983_v9 = vadd.f32 %v982_v61, %v1887_v33 }
 0x13b   :  { %v984_v18 = vadd.f32 %v1873_v16, %v983_v9  ;;  %v1116_v20 = vadd.f32 %v1115_v14, %v1053_v17  ;;  %v1058_v16 = vmul.f32 %v1897_v40, %v1897_v40  ;;  %v1072_v9 = vmul.f32 %v2001_v55, %v2001_v55 }
 0x13d   :  { %v1117_v22 = vadd.f32 %v1116_v20, %v1054_v56  ;;  %v985_v24 = vadd.f32 %v1883_v26, %v984_v18  ;;  %v1059_v26 = vmul.f32 %v1907_v54, %v1907_v54  ;;  %v1073_v18 = vmul.f32 %v2007_v11, %v2007_v11 }
 0x13f   :  { %v986_v21 = vadd.f32 %v985_v24, %v1905_v48  ;;  %v1118_v27 = vadd.f32 %v1117_v22, %v1055_v2 }
 0x141   :  { %v1119_v29 = vadd.f32 %v1118_v27, %v1056_v25  ;;  %v987_v33 = vadd.f32 %v986_v21, %v1911_v63 }
 0x143   :  { %v988_v31 = vadd.f32 %v1897_v40, %v987_v33  ;;  %v1120_v34 = vadd.f32 %v1119_v29, %v1057_v30  ;;  %v1062_v40 = vmul.f32 %v1921_v7, %v1921_v7 }
 0x145   :  { %v1121_v35 = vadd.f32 %v1120_v34, %v1058_v16  ;;  %v989_v37 = vadd.f32 %v1907_v54, %v988_v31  ;;  %v1063_v54 = vmul.f32 %v1931_v19, %v1931_v19 }
 0x147   :  { %v990_v48 = vadd.f32 %v989_v37, %v1929_v13  ;;  %v1122_v39 = vadd.f32 %v1121_v35, %v1059_v26 }
 0x149   :  { %v1123_v42 = vadd.f32 %v1122_v39, %v1060_v38  ;;  %v991_v63 = vadd.f32 %v990_v48, %v1935_v28 }
 0x14b   :  { %v992_v49 = vadd.f32 %v1921_v7, %v991_v63  ;;  %v1124_v51 = vadd.f32 %v1123_v42, %v1061_v47  ;;  %v1066_v7 = vmul.f32 %v1945_v36, %v1945_v36 }
 0x14d   :  { %v1125_v53 = vadd.f32 %v1124_v51, %v1062_v40  ;;  %v993_v57 = vadd.f32 %v1931_v19, %v992_v49  ;;  %v1067_v19 = vmul.f32 %v1955_v52, %v1955_v52 }
 0x14f   :  { %v994_v13 = vadd.f32 %v993_v57, %v1953_v44  ;;  %v1126_v58 = vadd.f32 %v1125_v53, %v1063_v54 }
 0x151   :  { %v1127_v59 = vadd.f32 %v1126_v58, %v1064_v43  ;;  %v995_v28 = vadd.f32 %v994_v13, %v1959_v62 }
 0x153   :  { %v996_v60 = vadd.f32 %v1945_v36, %v995_v28  ;;  %v1128_v1 = vadd.f32 %v1127_v59, %v1065_v50  ;;  %v1070_v36 = vmul.f32 %v1969_v8, %v1969_v8 }
 0x155   :  { %v1129_v41 = vadd.f32 %v1128_v1, %v1066_v7  ;;  %v997_v3 = vadd.f32 %v1955_v52, %v996_v60  ;;  %v1071_v52 = vmul.f32 %v1979_v23, %v1979_v23 }
 0x157   :  { %v998_v44 = vadd.f32 %v997_v3, %v1977_v15  ;;  %v1130_v45 = vadd.f32 %v1129_v41, %v1067_v19 }
 0x159   :  { %v1131_v6 = vadd.f32 %v1130_v45, %v1068_v4  ;;  %v999_v62 = vadd.f32 %v998_v44, %v1983_v32 }
 0x15b   :  { %v1000_v61 = vadd.f32 %v1969_v8, %v999_v62  ;;  %v1132_v5 = vadd.f32 %v1131_v6, %v1069_v10  ;;  %v1074_v8 = vmul.f32 %v1993_v46, %v1993_v46 }
 0x15d   :  { %v1133_v12 = vadd.f32 %v1132_v5, %v1070_v36  ;;  %v1001_v14 = vadd.f32 %v1979_v23, %v1000_v61  ;;  %v1075_v23 = vmul.f32 %v2003_v0, %v2003_v0 }
 0x15f   :  { %v1002_v15 = vadd.f32 %v1001_v14, %v2001_v55  ;;  %v1134_v17 = vadd.f32 %v1133_v12, %v1071_v52 }
 0x161   :  { %v1135_v56 = vadd.f32 %v1134_v17, %v1072_v9  ;;  %v1003_v32 = vadd.f32 %v1002_v15, %v2007_v11 }
 0x163   :  { %v1004_v20 = vadd.f32 %v1993_v46, %v1003_v32  ;;  %v1136_v2 = vadd.f32 %v1135_v56, %v1073_v18 }
 0x165   :  { %v1005_v22 = vadd.f32 %v2003_v0, %v1004_v20  ;;  %v1137_v24 = vadd.f32 %v1136_v2, %v1074_v8 }
 0x167   :  { %v1006_v55 = vrot.slane %v1005_v22, 4  ;;  %v1138_v21 = vadd.f32 %v1137_v24, %v1075_v23 }
 0x169   :  { %v1007_v25 = vadd.f32 %v1006_v55, %v1005_v22  ;;  %v1139_v27 = vrot.slane %v1138_v21, 4 }
 0x16b   :  { %v1008_v29 = vrot.slane %v1007_v25, 2  ;;  %v1140_v33 = vadd.f32 %v1139_v27, %v1138_v21 }
 0x16d   :  { %v1009_v30 = vadd.f32 %v1008_v29, %v1007_v25  ;;  %v1141_v11 = vrot.slane %v1140_v33, 2 }
 0x16f   :  { %v1010_v16 = vrot.slane %v1009_v30, 1  ;;  %v1142_v31 = vadd.f32 %v1141_v11, %v1140_v33 }
 0x171   :  { %v1143_v34 = vrot.slane %v1142_v31, 1  ;;  %v1011_v46 = vadd.f32 %v1010_v16, %v1009_v30 }
 0x173   :  { %v1144_v26 = vadd.f32 %v1143_v34, %v1142_v31 }
 0x175   :  { %v1146_v35 = vsel %vm1145_vm0, %v1011_v46, %v1144_v26 }
 0x176   :  { %1147 = vst [vmem:[%s2125_s3] sm:$0x3] %v1146_v35 }

// kernel: bottleneck_forward.7
= control target key start
LH: loop header
LB: loop body
LE: loop exit
PB: predicated region body
PF: predicated region fallthrough
CT: control target
= control target key end

     0   :  { %s4879_s12 = smov 0   ;;  %s4881_s13 = smov 0   ;;  %s5844_s0 = inlined_call_operand.vmem [shape: bf16[4,2,90,128], index: 0, kind: input, shape index: {}]   ;;  %s5845_s1 = inlined_call_operand.vmem [shape: bf16[9,128,128], index: 1, kind: input, shape index: {}]   ;;  %s5846_s2 = inlined_call_operand.vmem [shape: bf16[2,64,128], index: 2, kind: output, shape index: {0}]   ;;  %s5847_s3 = inlined_call_operand.vmem [shape: f32[2,2,128], index: 3, kind: output, shape index: {1}]  }
   0x1   :  { %s4883_s14 = smov 0   ;;  %s4885_s15 = smov 0  }
   0x2   :  { %s4887_s16 = smov 0  }
   0x3 LB: > { %s26_s17 = sadd.s32 1, %s4850_s15  ;;  %p40_p1 = scmp.ne.s32.totalorder %s4842_s13, %s4838_s12  ;;  %s4854_s16 = sphi %s4887_s16, %s14_s16   ;;  %s4850_s15 = sphi %s4885_s15, %s5851_s15   ;;  %s4846_s14 = sphi %s4883_s14, %s5850_s14   ;;  %s4842_s13 = sphi %s4881_s13, %s5849_s13   ;;  %s4838_s12 = sphi %s4879_s12, %s5848_s12  }
   0x4   : > { %p28_p0 = scmp.ge.s32.totalorder %s26_s17, 2  ;;  %p41_p2 = scmp.eq.s32.totalorder %s4854_s16, 0 }
   0x5   : > { %s33_s19 = sadd.s32 1, %s4842_s13  ;;  %p3856_p5 = scmp.ge.s32.totalorder %s4854_s16, 2 }
   0x6   : > { %s5853_s17 = smov (%p28_p0, %s26_s17), 0  ;;  %p42_p3 = por %p41_p2, %p40_p1 }
   0x7   : > { %s30_s18 = ssub.s32 %s4850_s15, %s5853_s17  ;;  %146 = sbr.rel (%p3856_p5) target bundleno = 29 (0x1d), region = 20 }
   0x8   : > { %p31_p4 = scmp.eq.s32.totalorder %s30_s18, 0 }
   0xa   : > { %s4914_s20 = scalar_select %p31_p4, %s4842_s13, %s33_s19  }
   0xc   : > { %149 = sbr.rel (!%p42_p3) target bundleno = 29 (0x1d), region = 24  ;;  %s151_s21 = sand.u32 (%p42_p3), 1, %s4842_s13  }
   0xd   : > { %s4658_s22 = smul.u32 (%p42_p3), 48, %s4850_s15 }
   0xe   : > { %s4657_s23 = smul.u32 (%p42_p3), 192, %s151_s21 }
   0xf   : > { %s4922_s26 = scalar_lea.vmem (%p42_p3), %s5844_s0, %s4658_s22 }
  0x10   : > { %v173_v0 = vld [vmem:[%s4922_s26] sm:$0xff] (%p42_p3)   ;;  %v177_v1 = vld [vmem:[%s4922_s26 + $0x8] sm:$0xff] (%p42_p3)   ;;  %v181_v2 = vld [vmem:[%s4922_s26 + $0x10] sm:$0xff] (%p42_p3)   ;;  %s4927_s27 = scalar_lea.vmem (%p42_p3), [#allocation2], %s4657_s23 }
  0x11   : > { %174 = vst [vmem:[%s4927_s27] sm:$0xff] %v173_v0   ;;  %178 = vst [vmem:[%s4927_s27 + $0x8] sm:$0xff] %v177_v1   ;;  %v185_v3 = vld [vmem:[%s4922_s26 + $0x18] sm:$0xff]   ;;  %v189_v4 = vld [vmem:[%s4922_s26 + $0x20] sm:$0xff]  }
  0x12   : > { %182 = vst [vmem:[%s4927_s27 + $0x10] sm:$0xff] %v181_v2   ;;  %v193_v5 = vld [vmem:[%s4922_s26 + $0x28] sm:$0xff]   ;;  %186 = vst [vmem:[%s4927_s27 + $0x18] sm:$0xff] %v185_v3   ;;  %v197_v6 = vld [vmem:[%s4922_s26 + $0x60] sm:$0xff]  }
  0x13   : > { %190 = vst [vmem:[%s4927_s27 + $0x20] sm:$0xff] %v189_v4   ;;  %194 = vst [vmem:[%s4927_s27 + $0x28] sm:$0xff] %v193_v5   ;;  %v201_v7 = vld [vmem:[%s4922_s26 + $0x68] sm:$0xff]   ;;  %v205_v8 = vld [vmem:[%s4922_s26 + $0x70] sm:$0xff]  }
  0x14   : > { %198 = vst [vmem:[%s4927_s27 + $0x30] sm:$0xff] %v197_v6   ;;  %202 = vst [vmem:[%s4927_s27 + $0x38] sm:$0xff] %v201_v7   ;;  %v209_v9 = vld [vmem:[%s4922_s26 + $0x78] sm:$0xff]   ;;  %v213_v10 = vld [vmem:[%s4922_s26 + $0x80] sm:$0xff]  }
  0x15   : > { %206 = vst [vmem:[%s4927_s27 + $0x40] sm:$0xff] %v205_v8   ;;  %v217_v11 = vld [vmem:[%s4922_s26 + $0x88] sm:$0xff]   ;;  %210 = vst [vmem:[%s4927_s27 + $0x48] sm:$0xff] %v209_v9   ;;  %v221_v12 = vld [vmem:[%s4922_s26 + $0xc0] sm:$0xff]  }
  0x16   : > { %214 = vst [vmem:[%s4927_s27 + $0x50] sm:$0xff] %v213_v10   ;;  %218 = vst [vmem:[%s4927_s27 + $0x58] sm:$0xff] %v217_v11   ;;  %v225_v13 = vld [vmem:[%s4922_s26 + $0xc8] sm:$0xff]   ;;  %v229_v14 = vld [vmem:[%s4922_s26 + $0xd0] sm:$0xff]  }
  0x17   : > { %222 = vst [vmem:[%s4927_s27 + $0x60] sm:$0xff] %v221_v12   ;;  %226 = vst [vmem:[%s4927_s27 + $0x68] sm:$0xff] %v225_v13   ;;  %v233_v15 = vld [vmem:[%s4922_s26 + $0xd8] sm:$0xff]   ;;  %v237_v16 = vld [vmem:[%s4922_s26 + $0xe0] sm:$0xff]  }
  0x18   : > { %230 = vst [vmem:[%s4927_s27 + $0x70] sm:$0xff] %v229_v14   ;;  %v241_v17 = vld [vmem:[%s4922_s26 + $0xe8] sm:$0xff]   ;;  %234 = vst [vmem:[%s4927_s27 + $0x78] sm:$0xff] %v233_v15   ;;  %v245_v18 = vld [vmem:[%s4922_s26 + $0x120] sm:$0xff]  }
  0x19   : > { %238 = vst [vmem:[%s4927_s27 + $0x80] sm:$0xff] %v237_v16   ;;  %242 = vst [vmem:[%s4927_s27 + $0x88] sm:$0xff] %v241_v17   ;;  %v249_v19 = vld [vmem:[%s4922_s26 + $0x128] sm:$0xff]   ;;  %v253_v20 = vld [vmem:[%s4922_s26 + $0x130] sm:$0xff]  }
  0x1a   : > { %246 = vst [vmem:[%s4927_s27 + $0x90] sm:$0xff] %v245_v18   ;;  %250 = vst [vmem:[%s4927_s27 + $0x98] sm:$0xff] %v249_v19   ;;  %v257_v21 = vld [vmem:[%s4922_s26 + $0x138] sm:$0xff]   ;;  %v261_v22 = vld [vmem:[%s4922_s26 + $0x140] sm:$0xff]  }
  0x1b   : > { %254 = vst [vmem:[%s4927_s27 + $0xa0] sm:$0xff] %v253_v20   ;;  %v265_v23 = vld [vmem:[%s4922_s26 + $0x148] sm:$0xff]   ;;  %258 = vst [vmem:[%s4927_s27 + $0xa8] sm:$0xff] %v257_v21  }
  0x1c   : > { %262 = vst [vmem:[%s4927_s27 + $0xb0] sm:$0xff] %v261_v22   ;;  %266 = vst [vmem:[%s4927_s27 + $0xb8] sm:$0xff] %v265_v23  }
  0x1d PF: > { %p3858_p6 = scmp.ge.s32.totalorder %s4854_s16, 1  ;;  %p387_p7 = scmp.lt.s32.totalorder %s4854_s16, 3 }
  0x1f   : > { %p388_p8 = pnand %p3858_p6, %p387_p7 }
  0x20   : > { %s394_s19 = sand.u32 (!%p388_p8), 1, %s4838_s12   ;;  %p427_p9 = scmp.lt.s32.totalorder (!%p388_p8), %s4846_s14, 1 }
  0x21   : > { %391 = sbr.rel (%p388_p8) target bundleno = 554 (0x22a), region = 65 }
  0x22   : > { %s4659_s25 = smul.u32 (!%p388_p8), 192, %s394_s19 }
  0x24   : > { %s5021_s29 = scalar_lea.vmem (!%p388_p8), [#allocation2], %s4659_s25 }
  0x26   : > { %v4703_v24 = vld [vmem:[%s5845_s1 + $0x78] sm:$0xff]   ;;  %v4856_v25 = vmov 0.0   ;;  %v4705_v27 = vld [vmem:[%s5845_s1 + $0x70] sm:$0xff]   ;;  %vm4857_vm0 = vmmov 0   ;;  %v4707_v29 = vld [vmem:[%s5845_s1 + $0x68] sm:$0xff]   ;;  %vm2081_vm2 = vcmask 1046528  }
  0x27   : > { %4317 = vmatprep.subr.bf16.mxu0 %v4856_v25  ;;  %4353 = vmatprep.subr.bf16.mxu1 %v4856_v25  ;;  %v4704_v26 = vld [vmem:[%s5845_s1 + $0x38] sm:$0xff]   ;;  %v4706_v28 = vld [vmem:[%s5845_s1 + $0x30] sm:$0xff]   ;;  %v4708_v30 = vld [vmem:[%s5845_s1 + $0x28] sm:$0xff]   ;;  %vm843_vm1 = vsmask.f32 7424  ;;  %s5855_s14 = smov (!%p427_p9, %s4846_s14), 1 }
  0x28   : > { %4318 = vmatpush3.bf16.msra.mxu0 %v4703_v24  ;;  %4333 = vmatprep.mubr.msk.bf16.mxu0 %vm4857_vm0, %v4856_v25  ;;  %v4709_v31 = vld [vmem:[%s5845_s1 + $0x60] sm:$0xff]   ;;  %v4711_v33 = vld [vmem:[%s5845_s1 + $0x58] sm:$0xff]   ;;  %v4713_v35 = vld [vmem:[%s5845_s1 + $0x50] sm:$0xff]   ;;  %s3861_s10 = sshll.u32 %s5855_s14, 1  ;;  %vm3729_vm3 = vcmask 1040384  }
  0x29   : > { %4354 = vmatpush3.bf16.msra.mxu1 %v4704_v26  ;;  %4319 = vmatprep.subr.bf16.mxu0 %v4856_v25  ;;  %v4710_v32 = vld [vmem:[%s5845_s1 + $0x20] sm:$0xff]   ;;  %v4712_v34 = vld [vmem:[%s5845_s1 + $0x18] sm:$0xff]   ;;  %v4714_v36 = vld [vmem:[%s5845_s1 + $0x10] sm:$0xff]   ;;  %s440_s19 = scalar_lea.vmem %s5847_s3, %s3861_s10 }
  0x2a   : > { %4355 = vmatprep.subr.bf16.mxu1 %v4856_v25  ;;  %4369 = vmatprep.mubr.msk.bf16.mxu1 %vm4857_vm0, %v4856_v25  ;;  %v4715_v37 = vld [vmem:[%s5845_s1 + $0x48] sm:$0xff]   ;;  %v4717_v39 = vld [vmem:[%s5845_s1 + $0x40] sm:$0xff]   ;;  %v4719_v41 = vld [vmem:[%s5021_s29 + $0x30] sm:$0xff]  }
  0x2b   : > { %v4716_v38 = vld [vmem:[%s5845_s1 + $0x8] sm:$0xff]   ;;  %v4718_v40 = vld [vmem:[%s5845_s1] sm:$0xff]   ;;  %v4721_v43 = vld [vmem:[%s5845_s1 + $0xb8] sm:$0xff]  }
  0x2c   : > { %4320 = vmatpush3.bf16.msra.mxu0 %v4705_v27  ;;  %v4720_v42 = vld [vmem:[%s5021_s29] sm:$0xff]   ;;  %v4725_v44 = vld [vmem:[%s5845_s1 + $0xf8] sm:$0xff]   ;;  %v4722_v45 = vld [vmem:[%s5845_s1 + $0xb0] sm:$0xff]  }
  0x2d   : > { %4356 = vmatpush3.bf16.msra.mxu1 %v4706_v28  ;;  %4321 = vmatprep.subr.bf16.mxu0 %v4856_v25  ;;  %v4723_v46 = vld [vmem:[%s5021_s29 + $0x38] sm:$0xff]   ;;  %v4727_v47 = vld [vmem:[%s5845_s1 + $0xf0] sm:$0xff]   ;;  %v4724_v48 = vld [vmem:[%s5021_s29 + $0x8] sm:$0xff]  }
  0x2e   : > { %4357 = vmatprep.subr.bf16.mxu1 %v4856_v25  ;;  %v4726_v49 = vld [vmem:[%s5845_s1 + $0xa8] sm:$0xff]   ;;  %v4730_v51 = vld [vmem:[%s5845_s1 + $0xa0] sm:$0xff]   ;;  %v4729_v54 = vld [vmem:[%s5021_s29 + $0x10] sm:$0xff]  }
  0x2f   : > { %v4731_v50 = vld [vmem:[%s5845_s1 + $0xe8] sm:$0xff]   ;;  %v4728_v52 = vld [vmem:[%s5021_s29 + $0x40] sm:$0xff]   ;;  %v4732_v55 = vld [vmem:[%s5845_s1 + $0x98] sm:$0xff]  }
  0x30   : > { %4322 = vmatpush3.bf16.msra.mxu0 %v4707_v29  ;;  %v4733_v53 = vld [vmem:[%s5845_s1 + $0xe0] sm:$0xff]   ;;  %v4736_v56 = vld [vmem:[%s5845_s1 + $0xd8] sm:$0xff]   ;;  %v4737_v57 = vld [vmem:[%s5845_s1 + $0x90] sm:$0xff]  }
  0x31   : > { %4358 = vmatpush3.bf16.msra.mxu1 %v4708_v30  ;;  %4323 = vmatprep.subr.bf16.mxu0 %v4856_v25  ;;  %v4734_v58 = vld [vmem:[%s5021_s29 + $0x48] sm:$0xff]   ;;  %v4738_v59 = vld [vmem:[%s5845_s1 + $0xd0] sm:$0xff]   ;;  %v4735_v60 = vld [vmem:[%s5021_s29 + $0x18] sm:$0xff]  }
  0x32   : > { %4359 = vmatprep.subr.bf16.mxu1 %v4856_v25  ;;  %v4745_v61 = vld [vmem:[%s5021_s29] sm:$0xff]   ;;  %v4739_v62 = vld [vmem:[%s5845_s1 + $0x88] sm:$0xff]   ;;  %v4740_v2 = vld [vmem:[%s5021_s29 + $0x50] ss:$0 sps:$4 sm:$0xff]  }
  0x33   : > { %v4742_v63 = vld [vmem:[%s5845_s1 + $0xc8] sm:$0xff]   ;;  %v847_v1 = vshll.u32 %v4745_v61, 16  ;;  %v4743_v3 = vld [vmem:[%s5845_s1 + $0x80] sm:$0xff]   ;;  %v845_v6 = vshrl.u32 %v4745_v61, 16  ;;  %v4750_v11 = vld [vmem:[%s5021_s29 + $0x10] sm:$0xff]  }
  0x34   : > { %4324 = vmatpush3.bf16.msra.mxu0 %v4709_v31  ;;  %v4746_v0 = vld [vmem:[%s5021_s29 + $0x8] sm:$0xff]   ;;  %v4741_v4 = vld [vmem:[%s5021_s29 + $0x20] ss:$0 sps:$4 sm:$0xff]   ;;  %v4748_v13 = vld [vmem:[%s5845_s1 + $0x138] sm:$0xff]   ;;  %v860_v16 = vshll.u32 %v4750_v11, 16  ;;  %v864_v28 = vshrl.u32 %v4750_v11, 16 }
  0x35   : > { %4360 = vmatpush3.bf16.msra.mxu1 %v4710_v32  ;;  %4325 = vmatprep.subr.bf16.mxu0 %v4856_v25  ;;  %v4744_v5 = vld [vmem:[%s5845_s1 + $0xc0] sm:$0xff]   ;;  %v849_v7 = vrot.slane %v847_v1, 1  ;;  %v852_v8 = vshll.u32 %v4746_v0, 16  ;;  %v856_v15 = vshrl.u32 %v4746_v0, 16  ;;  %v4752_v17 = vld [vmem:[%s5845_s1 + $0x178] sm:$0xff]   ;;  %v4749_v19 = vld [vmem:[%s5845_s1 + $0x130] sm:$0xff]  }
  0x36   : > { %4361 = vmatprep.subr.bf16.mxu1 %v4856_v25  ;;  %v4747_v12 = vld [vmem:[%s5021_s29 + $0x60] sm:$0xff]   ;;  %v4755_v18 = vld [vmem:[%s5021_s29 + $0x18] sm:$0xff]   ;;  %v862_v21 = vrot.slane %v860_v16, 1  ;;  %v4754_v22 = vld [vmem:[%s5845_s1 + $0x170] sm:$0xff]  }
  0x37   : > { %v850_v9 = vor.u32 %v849_v7, %v845_v6  ;;  %v854_v10 = vrot.slane %v852_v8, 1  ;;  %v4751_v23 = vld [vmem:[%s5021_s29 + $0x68] sm:$0xff]   ;;  %v868_v24 = vshll.u32 %v4755_v18, 16  ;;  %v4757_v31 = vld [vmem:[%s5845_s1 + $0x120] sm:$0xff]   ;;  %v4774_v0 = vld [vmem:[%s5845_s1 + $0x1b8] sm:$0xff]  }
  0x38   : > { %4326 = vmatpush3.bf16.msra.mxu0 %v4711_v33  ;;  %v4753_v27 = vld [vmem:[%s5845_s1 + $0x128] sm:$0xff]   ;;  %v866_v32 = vor.u32 %v864_v28, %v862_v21  ;;  %v4761_v33 = vld [vmem:[%s5021_s29 + $0x20] sm:$0x1f]   ;;  %v4782_v8 = vld [vmem:[%s5021_s29 + $0x78] sm:$0xff]  }
  0x39   : > { %4362 = vmatpush3.bf16.msra.mxu1 %v4712_v34  ;;  %4327 = vmatprep.subr.bf16.mxu0 %v4856_v25  ;;  %v855_v14 = vsel %vm843_vm1, %v850_v9, %v854_v10  ;;  %v858_v20 = vor.u32 %v856_v15, %v854_v10  ;;  %v4758_v29 = vld [vmem:[%s5845_s1 + $0x168] sm:$0xff]   ;;  %v870_v30 = vrot.slane %v868_v24, 1  ;;  %v4760_v34 = vld [vmem:[%s5845_s1 + $0x160] sm:$0xff]   ;;  %v4780_v9 = vld [vmem:[%s5845_s1 + $0x1f0] sm:$0xff]   ;;  %v1465_v24 = vshrl.u32 %v4782_v8, 16 }
  0x3a   : > { %4363 = vmatprep.subr.bf16.mxu1 %v4856_v25  ;;  %v4776_v10 = vld [vmem:[%s5021_s29 + $0x98] sm:$0xff]   ;;  %v4779_v11 = vld [vmem:[%s5845_s1 + $0x1a8] sm:$0xff]   ;;  %v4783_v16 = vld [vmem:[%s5845_s1 + $0x1a0] sm:$0xff]  }
  0x3b   : > { %v863_v26 = vsel %vm843_vm1, %v858_v20, %v862_v21  ;;  %v4784_v15 = vld [vmem:[%s5845_s1 + $0x1e8] sm:$0xff]   ;;  %v4786_v20 = vld [vmem:[%s5845_s1 + $0x1e0] sm:$0xff]   ;;  %v4790_v28 = vld [vmem:[%s5845_s1 + $0x190] sm:$0xff]  }
  0x3c   : > { %4328 = vmatpush3.bf16.msra.mxu0 %v4713_v35  ;;  %v4756_v35 = vld [vmem:[%s5021_s29 + $0x70] sm:$0xff]   ;;  %v4781_v21 = vld [vmem:[%s5021_s29 + $0xa0] sm:$0xff]  }
  0x3d   : > { %4364 = vmatpush3.bf16.msra.mxu1 %v4714_v36  ;;  %4329 = vmatprep.subr.bf16.mxu0 %v4856_v25  ;;  %v872_v36 = vshrl.u32 %v4755_v18, 16 }
  0x3e   : > { %4365 = vmatprep.subr.bf16.mxu1 %v4856_v25 }
  0x40   : > { %4330 = vmatpush3.bf16.msra.mxu0 %v4715_v37  ;;  %v871_v37 = vsel %vm843_vm1, %v866_v32, %v870_v30  ;;  %v5307_v32 = vld [vmem:[%s5021_s29 + $0x8] sm:$0xf] }
  0x41   : > { %4366 = vmatpush3.bf16.msra.mxu1 %v4716_v38  ;;  %4331 = vmatprep.subr.bf16.mxu0 %v4856_v25  ;;  %v4759_v38 = vld [vmem:[%s5845_s1 + $0x118] sm:$0xff]  }
  0x42   : > { %4367 = vmatprep.subr.bf16.mxu1 %v4856_v25 }
  0x44   : > { %4332 = vmatpush3.bf16.msra.mxu0 %v4717_v39  ;;  %v876_v39 = vshll.u32 %v4761_v33, 16 }
  0x45   : > { %4368 = vmatpush3.bf16.msra.mxu1 %v4718_v40  ;;  %4389 = vmatprep.subr.bf16.mxu0 %v4856_v25  ;;  %v4763_v40 = vld [vmem:[%s5845_s1 + $0x158] sm:$0xff]  }
  0x46   : > { %4425 = vmatprep.subr.bf16.mxu1 %v4856_v25 }
  0x47   : > { %4334 = vmatmul.mubr.bf16.vlgmr.msra.gmra.mxu0 %v4719_v41  ;;  %v874_v41 = vor.u32 %v872_v36, %v870_v30 }
  0x48   : > { %4370 = vmatmul.mubr.bf16.vlgmr.msra.gmra.mxu1 %v4720_v42  ;;  %4390 = vmatpush3.bf16.msra.mxu0 %v4721_v43  ;;  %v878_v42 = vrot.slane %v876_v39, 1  ;;  %v4764_v43 = vld [vmem:[%s5845_s1 + $0x110] sm:$0xff]   ;;  %v4794_v39 = vld [vmem:[%s5845_s1 + $0x1c8] sm:$0xff]  }
  0x49   : > { %4391 = vmatprep.subr.bf16.mxu0 %v4856_v25  ;;  %4337 = vmatprep.mubr.msk.bf16.mxu0 %vm4857_vm0, %v4856_v25 }
  0x4a   : > { %4373 = vmatprep.mubr.msk.bf16.mxu1 %vm4857_vm0, %v4856_v25  ;;  %4426 = vmatpush3.bf16.msra.mxu1 %v4725_v44  ;;  %v4765_v44 = vld [vmem:[%s5845_s1 + $0x150] sm:$0xff]  }
  0x4b   : > { %4427 = vmatprep.subr.bf16.mxu1 %v4856_v25 }
  0x4c   : > { %4392 = vmatpush3.bf16.msra.mxu0 %v4722_v45  ;;  %v4762_v45 = vld [vmem:[%s5021_s29 + $0x78] sm:$0xff]  }
  0x4d   : > { %4393 = vmatprep.subr.bf16.mxu0 %v4856_v25 }
  0x4e   : > { %4428 = vmatpush3.bf16.msra.mxu1 %v4727_v47  ;;  %v879_v47 = vsel %vm843_vm1, %v874_v41, %v878_v42  ;;  %v5329_v41 = vld [vmem:[%s5021_s29 + $0xc] sm:$0xff]  }
  0x4f   : > { %4338 = vmatmul.mubr.bf16.gmra.mxu0 %v4723_v46  ;;  %4429 = vmatprep.subr.bf16.mxu1 %v4856_v25  ;;  %v4766_v46 = vld [vmem:[%s5845_s1 + $0x108] sm:$0xff]  }
  0x50   : > { %4374 = vmatmul.mubr.bf16.gmra.mxu1 %v4724_v48  ;;  %4394 = vmatpush3.bf16.msra.mxu0 %v4726_v49  ;;  %v4772_v48 = vld [vmem:[%s5021_s29 + $0x60] sm:$0xff]   ;;  %v4768_v49 = vld [vmem:[%s5845_s1 + $0x148] sm:$0xff]  }
  0x51   : > { %4341 = vmatprep.mubr.msk.bf16.mxu0 %vm4857_vm0, %v4856_v25  ;;  %4377 = vmatprep.mubr.msk.bf16.mxu1 %vm4857_vm0, %v4856_v25 }
  0x52   : > { %4395 = vmatprep.subr.bf16.mxu0 %v4856_v25  ;;  %4430 = vmatpush3.bf16.msra.mxu1 %v4731_v50  ;;  %v880_v50 = vshrl.u32 %v4761_v33, 16  ;;  %v4791_v33 = vld [vmem:[%s5845_s1 + $0x1d0] sm:$0xff]  }
  0x53   : > { %4431 = vmatprep.subr.bf16.mxu1 %v4856_v25 }
  0x54   : > { %4396 = vmatpush3.bf16.msra.mxu0 %v4730_v51  ;;  %v4769_v51 = vld [vmem:[%s5845_s1 + $0x100] sm:$0xff]  }
  0x55   : > { %4397 = vmatprep.subr.bf16.mxu0 %v4856_v25 }
  0x56   : > { %4432 = vmatpush3.bf16.msra.mxu1 %v4733_v53  ;;  %v1440_v53 = vshll.u32 %v4772_v48, 16 }
  0x57   : > { %4342 = vmatmul.mubr.bf16.gmra.mxu0 %v4728_v52  ;;  %4433 = vmatprep.subr.bf16.mxu1 %v4856_v25  ;;  %v4773_v52 = vld [vmem:[%s5021_s29 + $0x68] sm:$0xff]  }
  0x58   : > { %4378 = vmatmul.mubr.bf16.gmra.mxu1 %v4729_v54  ;;  %4398 = vmatpush3.bf16.msra.mxu0 %v4732_v55  ;;  %v4770_v54 = vld [vmem:[%s5845_s1 + $0x140] sm:$0xff]   ;;  %v882_v55 = vor.u32 %v880_v50, %v878_v42 }
  0x59   : > { %4345 = vmatprep.mubr.msk.bf16.mxu0 %vm4857_vm0, %v4856_v25  ;;  %4381 = vmatprep.mubr.msk.bf16.mxu1 %vm4857_vm0, %v4856_v25 }
  0x5a   : > { %4399 = vmatprep.subr.bf16.mxu0 %v4856_v25  ;;  %4434 = vmatpush3.bf16.msra.mxu1 %v4736_v56  ;;  %v4767_v56 = vld [vmem:[%s5021_s29 + $0x80] ss:$0 sps:$4 sm:$0xff]  }
  0x5b   : > { %4435 = vmatprep.subr.bf16.mxu1 %v4856_v25 }
  0x5c   : > { %4400 = vmatpush3.bf16.msra.mxu0 %v4737_v57  ;;  %v1438_v57 = vshrl.u32 %v4772_v48, 16 }
  0x5d   : > { %4401 = vmatprep.subr.bf16.mxu0 %v4856_v25 }
  0x5e   : > { %4436 = vmatpush3.bf16.msra.mxu1 %v4738_v59  ;;  %v1445_v59 = vshll.u32 %v4773_v52, 16 }
  0x5f   : > { %4346 = vmatmul.mubr.bf16.gmra.mxu0 %v4734_v58  ;;  %4437 = vmatprep.subr.bf16.mxu1 %v4856_v25  ;;  %v1442_v58 = vrot.slane %v1440_v53, 1 }
  0x60   : > { %4382 = vmatmul.mubr.bf16.gmra.mxu1 %v4735_v60  ;;  %4349 = vmatprep.mubr.msk.bf16.mxu0 %vm4857_vm0, %v4856_v25  ;;  %v1447_v61 = vrot.slane %v1445_v59, 1 }
  0x61   : > { %4385 = vmatprep.mubr.msk.bf16.mxu1 %vm4857_vm0, %v4856_v25  ;;  %4402 = vmatpush3.bf16.msra.mxu0 %v4739_v62  ;;  %v1443_v60 = vor.u32 %v1442_v58, %v1438_v57  ;;  %v4777_v62 = vld [vmem:[%s5021_s29 + $0x70] sm:$0xff]  }
  0x62   : > { %4438 = vmatpush3.bf16.msra.mxu1 %v4742_v63  ;;  %4403 = vmatprep.subr.bf16.mxu0 %v4856_v25  ;;  %v4771_v63 = vld [vmem:[%s5021_s29 + $0x90] sm:$0xff]  }
  0x63   : > { %4439 = vmatprep.subr.bf16.mxu1 %v4856_v25  ;;  %v1448_v1 = vsel %vm843_vm1, %v1443_v60, %v1447_v61  ;;  %v5349_v57 = vld [vmem:[%s5021_s29 + $0x14] sm:$0xff]   ;;  %v4804_v60 = vld [vmem:[%s5021_s29 + $0x44] sm:$0xff]  }
  0x65   : > { %4404 = vmatpush3.bf16.msra.mxu0 %v4743_v3  ;;  %v1453_v3 = vshll.u32 %v4777_v62, 16 }
  0x66   : > { %4440 = vmatpush3.bf16.msra.mxu1 %v4744_v5  ;;  %4461 = vmatprep.subr.bf16.mxu0 %v4856_v25  ;;  %v4775_v5 = vld [vmem:[%s5845_s1 + $0x1b0] sm:$0xff]  }
  0x67   : > { %4350 = vmatmul.mubr.bf16.gmra.mxu0 %v4740_v2  ;;  %4497 = vmatprep.subr.bf16.mxu1 %v4856_v25  ;;  %v1449_v2 = vshrl.u32 %v4773_v52, 16  ;;  %v1455_v7 = vrot.slane %v1453_v3, 1  ;;  %v1903_v3 = vshll.u32 %v4804_v60, 16 }
  0x68   : > { %4386 = vmatmul.mubr.bf16.gmra.mxu1 %v4741_v4  ;;  %4405 = vmatprep.mubr.msk.bf16.mxu0 %vm4857_vm0, %v4856_v25  ;;  %v4778_v4 = vld [vmem:[%s5845_s1 + $0x1f8] sm:$0xff]  }
  0x69   : > { %4441 = vmatprep.mubr.msk.bf16.mxu1 %vm4857_vm0, %v4856_v25  ;;  %v1451_v6 = vor.u32 %v1449_v2, %v1447_v61 }
  0x6f   : > { %4406 = vmatmul.mubr.bf16.vlgmr.msra.gmra.mxu0 %v855_v14  ;;  %v1461_v14 = vshll.u32 %v4782_v8, 16 }
  0x70   : > { %4442 = vmatmul.mubr.bf16.vlgmr.msra.gmra.mxu1 %v4747_v12  ;;  %4462 = vmatpush3.bf16.msra.mxu0 %v4748_v13  ;;  %v1456_v12 = vsel %vm843_vm1, %v1451_v6, %v1455_v7  ;;  %v1457_v13 = vshrl.u32 %v4777_v62, 16  ;;  %v4801_v62 = vld [vmem:[%s5845_s1 + $0x238] sm:$0xff]  }
  0x71   : > { %4463 = vmatprep.subr.bf16.mxu0 %v4856_v25  ;;  %4409 = vmatprep.mubr.msk.bf16.mxu0 %vm4857_vm0, %v4856_v25  ;;  %v1463_v18 = vrot.slane %v1461_v14, 1 }
  0x72   : > { %4445 = vmatprep.mubr.msk.bf16.mxu1 %vm4857_vm0, %v4856_v25  ;;  %4498 = vmatpush3.bf16.msra.mxu1 %v4752_v17  ;;  %v1459_v17 = vor.u32 %v1457_v13, %v1455_v7  ;;  %v5365_v7 = vld [vmem:[%s5021_s29 + $0x1c] sm:$0xff]   ;;  %v1682_v13 = vshrl.u32 %v5349_v57, 16 }
  0x73   : > { %4499 = vmatprep.subr.bf16.mxu1 %v4856_v25  ;;  %v1686_v14 = vshll.u32 %v5365_v7, 16 }
  0x74   : > { %4464 = vmatpush3.bf16.msra.mxu0 %v4749_v19  ;;  %v4788_v19 = vld [vmem:[%s5021_s29 + $0x80] sm:$0x1f]  }
  0x75   : > { %4465 = vmatprep.subr.bf16.mxu0 %v4856_v25 }
  0x76   : > { %4500 = vmatpush3.bf16.msra.mxu1 %v4754_v22  ;;  %v4785_v22 = vld [vmem:[%s5845_s1 + $0x198] sm:$0xff]  }
  0x77   : > { %4410 = vmatmul.mubr.bf16.gmra.mxu0 %v863_v26  ;;  %4501 = vmatprep.subr.bf16.mxu1 %v4856_v25  ;;  %v1469_v26 = vshll.u32 %v4788_v19, 16 }
  0x78   : > { %4446 = vmatmul.mubr.bf16.gmra.mxu1 %v4751_v23  ;;  %4466 = vmatpush3.bf16.msra.mxu0 %v4753_v27  ;;  %v1464_v23 = vsel %vm843_vm1, %v1459_v17, %v1463_v18  ;;  %v4789_v27 = vld [vmem:[%s5845_s1 + $0x1d8] sm:$0xff]  }
  0x79   : > { %4413 = vmatprep.mubr.msk.bf16.mxu0 %vm4857_vm0, %v4856_v25  ;;  %4449 = vmatprep.mubr.msk.bf16.mxu1 %vm4857_vm0, %v4856_v25  ;;  %v1471_v30 = vrot.slane %v1469_v26, 1 }
  0x7a   : > { %4467 = vmatprep.subr.bf16.mxu0 %v4856_v25  ;;  %4502 = vmatpush3.bf16.msra.mxu1 %v4758_v29  ;;  %v1467_v29 = vor.u32 %v1465_v24, %v1463_v18  ;;  %v4811_v24 = vld [vmem:[%s5021_s29 + $0x54] sm:$0x1f]  }
  0x7b   : > { %4503 = vmatprep.subr.bf16.mxu1 %v4856_v25 }
  0x7c   : > { %4468 = vmatpush3.bf16.msra.mxu0 %v4757_v31  ;;  %v1610_v31 = vld [vmem:[%s5021_s29 + $0x4] sm:$0xf]  ;;  %v1472_v36 = vsel %vm843_vm1, %v1467_v29, %v1471_v30 }
  0x7d   : > { %4469 = vmatprep.subr.bf16.mxu0 %v4856_v25 }
  0x7e   : > { %4504 = vmatpush3.bf16.msra.mxu1 %v4760_v34  ;;  %v4787_v34 = vld [vmem:[%s5021_s29 + $0xa8] sm:$0xff]  }
  0x7f   : > { %4414 = vmatmul.mubr.bf16.gmra.mxu0 %v871_v37  ;;  %4505 = vmatprep.subr.bf16.mxu1 %v4856_v25  ;;  %v4792_v37 = vld [vmem:[%s5845_s1 + $0x188] sm:$0xff]  }
  0x80   : > { %4450 = vmatmul.mubr.bf16.gmra.mxu1 %v4756_v35  ;;  %4470 = vmatpush3.bf16.msra.mxu0 %v4759_v38  ;;  %v4073_v35 = vcombine.low %v1610_v31, %v5307_v32  ;;  %v4799_v38 = vld [vmem:[%s5021_s29 + $0x34] sm:$0xff]  }
  0x81   : > { %4417 = vmatprep.mubr.msk.bf16.mxu0 %vm4857_vm0, %v4856_v25  ;;  %4453 = vmatprep.mubr.msk.bf16.mxu1 %vm4857_vm0, %v4856_v25  ;;  %v1888_v52 = vshrl.u32 %v4799_v38, 16 }
  0x82   : > { %4471 = vmatprep.subr.bf16.mxu0 %v4856_v25  ;;  %4506 = vmatpush3.bf16.msra.mxu1 %v4763_v40  ;;  %v1473_v40 = vshrl.u32 %v4788_v19, 16  ;;  %v1665_v42 = vshll.u32 %v4073_v35, 16  ;;  %v1688_v19 = vrot.slane %v1686_v14, 1 }
  0x83   : > { %4507 = vmatprep.subr.bf16.mxu1 %v4856_v25 }
  0x84   : > { %4472 = vmatpush3.bf16.msra.mxu0 %v4764_v43  ;;  %v4795_v43 = vld [vmem:[%s5845_s1 + $0x180] sm:$0xff]   ;;  %v1475_v48 = vor.u32 %v1473_v40, %v1471_v30  ;;  %v1667_v50 = vrot.slane %v1665_v42, 1  ;;  %v4813_v42 = vld [vmem:[%s5845_s1 + $0x208] sm:$0xff]  }
  0x85   : > { %4473 = vmatprep.subr.bf16.mxu0 %v4856_v25 }
  0x86   : > { %4508 = vmatpush3.bf16.msra.mxu1 %v4765_v44  ;;  %v4800_v44 = vld [vmem:[%s5021_s29 + $0x3c] sm:$0xff]  }
  0x87   : > { %4418 = vmatmul.mubr.bf16.gmra.mxu0 %v879_v47  ;;  %4509 = vmatprep.subr.bf16.mxu1 %v4856_v25  ;;  %v4793_v47 = vld [vmem:[%s5021_s29 + $0xb0] ss:$0 sps:$4 sm:$0xff]   ;;  %v1899_v2 = vshrl.u32 %v4800_v44, 16 }
  0x88   : > { %4454 = vmatmul.mubr.bf16.gmra.mxu1 %v4762_v45  ;;  %4421 = vmatprep.mubr.msk.bf16.mxu0 %vm4857_vm0, %v4856_v25  ;;  %v1890_v45 = vshll.u32 %v4799_v38, 16 }
  0x89   : > { %4457 = vmatprep.mubr.msk.bf16.mxu1 %vm4857_vm0, %v4856_v25  ;;  %4474 = vmatpush3.bf16.msra.mxu0 %v4766_v46  ;;  %v4796_v46 = vld [vmem:[%s5845_s1 + $0x1c0] sm:$0xff]  }
  0x8a   : > { %4510 = vmatpush3.bf16.msra.mxu1 %v4768_v49  ;;  %4475 = vmatprep.subr.bf16.mxu0 %v4856_v25  ;;  %v1663_v49 = vshrl.u32 %v4073_v35, 16  ;;  %v1892_v53 = vrot.slane %v1890_v45, 1  ;;  %v4814_v45 = vld [vmem:[%s5845_s1 + $0x200] sm:$0xff]  }
  0x8b   : > { %4511 = vmatprep.subr.bf16.mxu1 %v4856_v25 }
  0x8c   : > { %v1893_v58 = vor.u32 %v1892_v53, %v1888_v52  ;;  %v2087_v52 = vrot.slane %v5365_v7, 1 }
  0x8d   : > { %4476 = vmatpush3.bf16.msra.mxu0 %v4769_v51  ;;  %v1670_v51 = vshll.u32 %v5329_v41, 16 }
  0x8e   : > { %4512 = vmatpush3.bf16.msra.mxu1 %v4770_v54  ;;  %4533 = vmatprep.subr.bf16.mxu0 %v4856_v25  ;;  %v1895_v54 = vshll.u32 %v4800_v44, 16  ;;  %v1923_v44 = vshrl.u32 %v4811_v24, 16 }
  0x8f   : > { %4422 = vmatmul.mubr.bf16.gmra.mxu0 %v882_v55  ;;  %4569 = vmatprep.subr.bf16.mxu1 %v4856_v25  ;;  %v1668_v55 = vor.u32 %v1667_v50, %v1663_v49 }
  0x90   : > { %4458 = vmatmul.mubr.bf16.gmra.mxu1 %v4767_v56  ;;  %4477 = vmatprep.mubr.msk.bf16.mxu0 %vm4857_vm0, %v4856_v25  ;;  %v1672_v56 = vrot.slane %v1670_v51, 1  ;;  %v1897_v59 = vrot.slane %v1895_v54, 1  ;;  %v2083_v51 = vrot.slane %v5329_v41, 1 }
  0x91   : > { %4513 = vmatprep.mubr.msk.bf16.mxu1 %vm4857_vm0, %v4856_v25 }
  0x92   : > { %v1673_v61 = vsel %vm843_vm1, %v1668_v55, %v1672_v56  ;;  %v1901_v8 = vor.u32 %v1899_v2, %v1897_v59  ;;  %v2085_v55 = vrot.slane %v5349_v57, 1 }
  0x97   : > { %4478 = vmatmul.mubr.bf16.vlgmr.msra.gmra.mxu0 %v4771_v63  ;;  %v1674_v63 = vshrl.u32 %v5329_v41, 16  ;;  %v2086_v41 = vsel %vm2081_vm2, %v2083_v51, %v2085_v55 }
  0x98   : > { %4514 = vmatmul.mubr.bf16.vlgmr.msra.gmra.mxu1 %v1448_v1  ;;  %4534 = vmatpush3.bf16.msra.mxu0 %v4774_v0  ;;  %v1678_v0 = vshll.u32 %v5349_v57, 16  ;;  %v1898_v1 = vsel %vm843_vm1, %v1893_v58, %v1897_v59 }
  0x99   : > { %4535 = vmatprep.subr.bf16.mxu0 %v4856_v25  ;;  %4481 = vmatprep.mubr.msk.bf16.mxu0 %vm4857_vm0, %v4856_v25 }
  0x9a   : > { %4517 = vmatprep.mubr.msk.bf16.mxu1 %vm4857_vm0, %v4856_v25  ;;  %4570 = vmatpush3.bf16.msra.mxu1 %v4778_v4  ;;  %v4802_v4 = vld [vmem:[%s5845_s1 + $0x230] sm:$0xff]   ;;  %v1680_v6 = vrot.slane %v1678_v0, 1 }
  0x9b   : > { %4571 = vmatprep.subr.bf16.mxu1 %v4856_v25 }
  0x9c   : > { %4536 = vmatpush3.bf16.msra.mxu0 %v4775_v5  ;;  %v1676_v5 = vor.u32 %v1674_v63, %v1672_v56  ;;  %v1684_v18 = vor.u32 %v1682_v13, %v1680_v6  ;;  %v2088_v56 = vsel %vm2081_vm2, %v2085_v55, %v2087_v52 }
  0x9d   : > { %4537 = vmatprep.subr.bf16.mxu0 %v4856_v25 }
  0x9e   : > { %4572 = vmatpush3.bf16.msra.mxu1 %v4780_v9  ;;  %v1905_v9 = vrot.slane %v1903_v3, 1  ;;  %v1689_v26 = vsel %vm843_vm1, %v1684_v18, %v1688_v19 }
  0x9f   : > { %4482 = vmatmul.mubr.bf16.gmra.mxu0 %v4776_v10  ;;  %4573 = vmatprep.subr.bf16.mxu1 %v4856_v25  ;;  %v4807_v10 = vld [vmem:[%s5021_s29 + $0x4c] sm:$0xff]  }
  0xa0   : > { %4518 = vmatmul.mubr.bf16.gmra.mxu1 %v1456_v12  ;;  %4538 = vmatpush3.bf16.msra.mxu0 %v4779_v11  ;;  %v1681_v11 = vsel %vm843_vm1, %v1676_v5, %v1680_v6  ;;  %v4805_v12 = vld [vmem:[%s5845_s1 + $0x228] sm:$0xff]   ;;  %v1911_v17 = vshll.u32 %v4807_v10, 16  ;;  %v1915_v31 = vshrl.u32 %v4807_v10, 16 }
  0xa1   : > { %4485 = vmatprep.mubr.msk.bf16.mxu0 %vm4857_vm0, %v4856_v25  ;;  %4521 = vmatprep.mubr.msk.bf16.mxu1 %vm4857_vm0, %v4856_v25 }
  0xa2   : > { %4539 = vmatprep.subr.bf16.mxu0 %v4856_v25  ;;  %4574 = vmatpush3.bf16.msra.mxu1 %v4784_v15  ;;  %v1906_v15 = vsel %vm843_vm1, %v1901_v8, %v1905_v9 }
  0xa3   : > { %4575 = vmatprep.subr.bf16.mxu1 %v4856_v25 }
  0xa4   : > { %4540 = vmatpush3.bf16.msra.mxu0 %v4783_v16  ;;  %v1907_v16 = vshrl.u32 %v4804_v60, 16 }
  0xa5   : > { %4541 = vmatprep.subr.bf16.mxu0 %v4856_v25 }
  0xa6   : > { %4576 = vmatpush3.bf16.msra.mxu1 %v4786_v20  ;;  %v4808_v20 = vld [vmem:[%s5845_s1 + $0x220] sm:$0xff]  }
  0xa7   : > { %4486 = vmatmul.mubr.bf16.gmra.mxu0 %v4781_v21  ;;  %4577 = vmatprep.subr.bf16.mxu1 %v4856_v25  ;;  %v5387_v21 = vld [vmem:[%s5021_s29 + $0x24] sm:$0x1f]  }
  0xa8   : > { %4522 = vmatmul.mubr.bf16.gmra.mxu1 %v1464_v23  ;;  %4542 = vmatpush3.bf16.msra.mxu0 %v4785_v22  ;;  %v1909_v22 = vor.u32 %v1907_v16, %v1905_v9  ;;  %v1913_v23 = vrot.slane %v1911_v17, 1  ;;  %v1694_v29 = vshll.u32 %v5387_v21, 16  ;;  %v2089_v53 = vrot.slane %v5387_v21, 1 }
  0xa9   : > { %4489 = vmatprep.mubr.msk.bf16.mxu0 %vm4857_vm0, %v4856_v25  ;;  %4525 = vmatprep.mubr.msk.bf16.mxu1 %vm4857_vm0, %v4856_v25 }
  0xaa   : > { %4543 = vmatprep.subr.bf16.mxu0 %v4856_v25  ;;  %4578 = vmatpush3.bf16.msra.mxu1 %v4789_v27  ;;  %v4809_v27 = vld [vmem:[%s5845_s1 + $0x218] sm:$0xff]   ;;  %v1914_v30 = vsel %vm843_vm1, %v1909_v22, %v1913_v23  ;;  %v1696_v35 = vrot.slane %v1694_v29, 1 }
  0xab   : > { %4579 = vmatprep.subr.bf16.mxu1 %v4856_v25 }
  0xac   : > { %4544 = vmatpush3.bf16.msra.mxu0 %v4790_v28  ;;  %v1690_v28 = vshrl.u32 %v5365_v7, 16 }
  0xad   : > { %4545 = vmatprep.subr.bf16.mxu0 %v4856_v25 }
  0xae   : > { %4580 = vmatpush3.bf16.msra.mxu1 %v4791_v33  ;;  %v1919_v33 = vshll.u32 %v4811_v24, 16 }
  0xaf   : > { %4490 = vmatmul.mubr.bf16.gmra.mxu0 %v4787_v34  ;;  %4581 = vmatprep.subr.bf16.mxu1 %v4856_v25  ;;  %v1692_v34 = vor.u32 %v1690_v28, %v1688_v19 }
  0xb0   : > { %4526 = vmatmul.mubr.bf16.gmra.mxu1 %v1472_v36  ;;  %4493 = vmatprep.mubr.msk.bf16.mxu0 %vm4857_vm0, %v4856_v25  ;;  %v4812_v36 = vld [vmem:[%s5845_s1 + $0x210] sm:$0xff]   ;;  %v1921_v38 = vrot.slane %v1919_v33, 1 }
  0xb1   : > { %4529 = vmatprep.mubr.msk.bf16.mxu1 %vm4857_vm0, %v4856_v25  ;;  %4546 = vmatpush3.bf16.msra.mxu0 %v4792_v37  ;;  %v1917_v37 = vor.u32 %v1915_v31, %v1913_v23 }
  0xb2   : > { %4582 = vmatpush3.bf16.msra.mxu1 %v4794_v39  ;;  %4547 = vmatprep.subr.bf16.mxu0 %v4856_v25  ;;  %v1697_v39 = vsel %vm843_vm1, %v1692_v34, %v1696_v35 }
  0xb3   : > { %4583 = vmatprep.subr.bf16.mxu1 %v4856_v25  ;;  %v1922_v40 = vsel %vm843_vm1, %v1917_v37, %v1921_v38 }
  0xb5   : > { %4548 = vmatpush3.bf16.msra.mxu0 %v4795_v43  ;;  %v1698_v43 = vshrl.u32 %v5387_v21, 16 }
  0xb6   : > { %4584 = vmatpush3.bf16.msra.mxu1 %v4796_v46  ;;  %4605 = vmatprep.subr.bf16.mxu0 %v4856_v25  ;;  %v2060_v46 = vld [vmem:[%s5021_s29 + $0x4] sm:$0xe]  ;;  %s4168_s29 = sshll.u32 %s5855_s14, 5 }
  0xb7   : > { %4494 = vmatmul.mubr.bf16.gmra.mxu0 %v4793_v47  ;;  %4641 = vmatprep.subr.bf16.mxu1 %v4856_v25  ;;  %v1700_v47 = vor.u32 %v1698_v43, %v1696_v35  ;;  %v4141_v49 = vcombine.low %v2060_v46, %v5307_v32  ;;  %v2090_v32 = vsel %vm2081_vm2, %v2087_v52, %v2089_v53  ;;  %s5707_s9 = scalar_lea.vmem %s5846_s2, %s4168_s29 }
  0xb8   : > { %4530 = vmatmul.mubr.bf16.gmra.mxu1 %v1475_v48  ;;  %4549 = vmatprep.mubr.msk.bf16.mxu0 %vm4857_vm0, %v4856_v25  ;;  %v1925_v48 = vor.u32 %v1923_v44, %v1921_v38 }
  0xb9   : > { %4585 = vmatprep.mubr.msk.bf16.mxu1 %vm4857_vm0, %v4856_v25  ;;  %v2082_v50 = vrot.slane %v4141_v49, 1 }
  0xbb   : > { %v2084_v54 = vsel %vm2081_vm2, %v2082_v50, %v2083_v51 }
  0xbf   : > { %4550 = vmatmul.mubr.bf16.vlgmr.msra.gmra.mxu0 %v1673_v61 }
  0xc0   : > { %4586 = vmatmul.mubr.bf16.vlgmr.msra.gmra.mxu1 %v1898_v1  ;;  %4606 = vmatpush3.bf16.msra.mxu0 %v4801_v62 }
  0xc1   : > { %4607 = vmatprep.subr.bf16.mxu0 %v4856_v25  ;;  %4553 = vmatprep.mubr.msk.bf16.mxu0 %vm4857_vm0, %v4856_v25 }
  0xc2   : > { %4589 = vmatprep.mubr.msk.bf16.mxu1 %vm4857_vm0, %v4856_v25  ;;  %4649 = vmatpush3.bf16.msra.mxu1 %v4801_v62 }
  0xc3   : > { %4642 = vmatprep.subr.bf16.mxu1 %v4856_v25 }
  0xc4   : > { %4608 = vmatpush3.bf16.msra.mxu0 %v4802_v4 }
  0xc5   : > { %4609 = vmatprep.subr.bf16.mxu0 %v4856_v25 }
  0xc6   : > { %4650 = vmatpush3.bf16.msra.mxu1 %v4802_v4 }
  0xc7   : > { %4554 = vmatmul.mubr.bf16.gmra.mxu0 %v1681_v11  ;;  %4643 = vmatprep.subr.bf16.mxu1 %v4856_v25 }
  0xc8   : > { %4590 = vmatmul.mubr.bf16.gmra.mxu1 %v1906_v15  ;;  %4610 = vmatpush3.bf16.msra.mxu0 %v4805_v12 }
  0xc9   : > { %4557 = vmatprep.mubr.msk.bf16.mxu0 %vm4857_vm0, %v4856_v25  ;;  %4593 = vmatprep.mubr.msk.bf16.mxu1 %vm4857_vm0, %v4856_v25 }
  0xca   : > { %4611 = vmatprep.subr.bf16.mxu0 %v4856_v25  ;;  %4651 = vmatpush3.bf16.msra.mxu1 %v4805_v12 }
  0xcb   : > { %4644 = vmatprep.subr.bf16.mxu1 %v4856_v25 }
  0xcc   : > { %4612 = vmatpush3.bf16.msra.mxu0 %v4808_v20 }
  0xcd   : > { %4613 = vmatprep.subr.bf16.mxu0 %v4856_v25 }
  0xce   : > { %4652 = vmatpush3.bf16.msra.mxu1 %v4808_v20 }
  0xcf   : > { %4558 = vmatmul.mubr.bf16.gmra.mxu0 %v1689_v26  ;;  %4645 = vmatprep.subr.bf16.mxu1 %v4856_v25 }
  0xd0   : > { %4594 = vmatmul.mubr.bf16.gmra.mxu1 %v1914_v30  ;;  %4614 = vmatpush3.bf16.msra.mxu0 %v4809_v27 }
  0xd1   : > { %4561 = vmatprep.mubr.msk.bf16.mxu0 %vm4857_vm0, %v4856_v25  ;;  %4597 = vmatprep.mubr.msk.bf16.mxu1 %vm4857_vm0, %v4856_v25 }
  0xd2   : > { %4653 = vmatpush3.bf16.msra.mxu1 %v4809_v27  ;;  %4615 = vmatprep.subr.bf16.mxu0 %v4856_v25 }
  0xd3   : > { %4646 = vmatprep.subr.bf16.mxu1 %v4856_v25 }
  0xd4   : > { %4616 = vmatpush3.bf16.msra.mxu0 %v4812_v36 }
  0xd5   : > { %4617 = vmatprep.subr.bf16.mxu0 %v4856_v25 }
  0xd6   : > { %4654 = vmatpush3.bf16.msra.mxu1 %v4812_v36 }
  0xd7   : > { %4562 = vmatmul.mubr.bf16.gmra.mxu0 %v1697_v39  ;;  %4647 = vmatprep.subr.bf16.mxu1 %v4856_v25 }
  0xd8   : > { %4598 = vmatmul.mubr.bf16.gmra.mxu1 %v1922_v40  ;;  %4565 = vmatprep.mubr.msk.bf16.mxu0 %vm4857_vm0, %v4856_v25 }
  0xd9   : > { %4601 = vmatprep.mubr.msk.bf16.mxu1 %vm4857_vm0, %v4856_v25  ;;  %4618 = vmatpush3.bf16.msra.mxu0 %v4813_v42 }
  0xda   : > { %4655 = vmatpush3.bf16.msra.mxu1 %v4813_v42  ;;  %4619 = vmatprep.subr.bf16.mxu0 %v4856_v25 }
  0xdb   : > { %4648 = vmatprep.subr.bf16.mxu1 %v4856_v25 }
  0xdd   : > { %4620 = vmatpush3.bf16.msra.mxu0 %v4814_v45 }
  0xde   : > { %4656 = vmatpush3.bf16.msra.mxu1 %v4814_v45 }
  0xdf   : > { %4566 = vmatmul.mubr.bf16.gmra.mxu0 %v1700_v47 }
  0xe0   : > { %4602 = vmatmul.mubr.bf16.gmra.mxu1 %v1925_v48  ;;  %4621 = vmatprep.mubr.msk.bf16.mxu0 %vm4857_vm0, %v4856_v25 }
  0xe1   : > { %4633 = vmatprep.mubr.msk.bf16.mxu1 %vm4857_vm0, %v4856_v25 }
  0xe7   : > { %4622 = vmatmul.mubr.bf16.vlgmr.msra.gmra.mxu0 %v2084_v54 }
  0xe8   : > { %4634 = vmatmul.mubr.bf16.vlgmr.msra.gmra.mxu1 %v2090_v32  ;;  %4625 = vmatprep.mubr.msk.bf16.mxu0 %vm4857_vm0, %v4856_v25 }
  0xe9   : > { %4637 = vmatprep.mubr.msk.bf16.mxu1 %vm4857_vm0, %v4856_v25 }
  0xef   : > { %4626 = vmatmul.mubr.bf16.gmra.mxu0 %v2086_v41 }
  0xf0   : > { %4638 = vmatmul.mubr.bf16.gmra.mxu1 %v2089_v53  ;;  %4629 = vmatprep.mubr.msk.bf16.mxu0 %vm4857_vm0, %v4856_v25 }
  0xf7   : > { %4630 = vmatmul.mubr.bf16.gmra.mxu0 %v2088_v56 }
 0x107   : > { %v605_v58 = vpop.f32.mrf.mxu0 }
 0x108   : > { %v753_v59 = vpop.f32.mrf.mxu1 }
 0x109   : > { %v754_v60 = vadd.f32 %v753_v59, %v605_v58  ;;  %v4335_v61 = vpop.f32.mrf.mxu0 }
 0x10a   : > { %v4371_v62 = vpop.f32.mrf.mxu1 }
 0x10b   : > { %v608_v63 = vpop.f32.mrf.mxu0 }
 0x10c   : > { %v756_v0 = vpop.f32.mrf.mxu1 }
 0x10d   : > { %v757_v1 = vadd.f32 %v756_v0, %v608_v63  ;;  %v4336_v57 = vpop.f32.mrf.mxu0 }
 0x10e   : > { %v4372_v2 = vpop.f32.mrf.mxu1 }
 0x10f   : > { %v613_v3 = vpop.f32.mrf.mxu0 }
 0x110   : > { %v761_v4 = vpop.f32.mrf.mxu1 }
 0x111   : > { %v762_v5 = vadd.f32 %v761_v4, %v613_v3  ;;  %v4339_v6 = vpop.f32.mrf.mxu0 }
 0x112   : > { %v4375_v7 = vpop.f32.mrf.mxu1 }
 0x113   : > { %v616_v8 = vpop.f32.mrf.mxu0 }
 0x114   : > { %v764_v9 = vpop.f32.mrf.mxu1 }
 0x115   : > { %v765_v25 = vadd.f32 %v764_v9, %v616_v8  ;;  %v4340_v10 = vpop.f32.mrf.mxu0 }
 0x116   : > { %v4376_v11 = vpop.f32.mrf.mxu1 }
 0x117   : > { %v621_v12 = vpop.f32.mrf.mxu0 }
 0x118   : > { %v769_v13 = vpop.f32.mrf.mxu1 }
 0x119   : > { %v770_v14 = vadd.f32 %v769_v13, %v621_v12  ;;  %v4343_v15 = vpop.f32.mrf.mxu0 }
 0x11a   : > { %v4379_v16 = vpop.f32.mrf.mxu1 }
 0x11b   : > { %v624_v17 = vpop.f32.mrf.mxu0 }
 0x11c   : > { %v772_v18 = vpop.f32.mrf.mxu1 }
 0x11d   : > { %v773_v19 = vadd.f32 %v772_v18, %v624_v17  ;;  %v4344_v20 = vpop.f32.mrf.mxu0 }
 0x11e   : > { %v4380_v21 = vpop.f32.mrf.mxu1 }
 0x11f   : > { %v629_v22 = vpop.f32.mrf.mxu0 }
 0x120   : > { %v777_v23 = vpop.f32.mrf.mxu1 }
 0x121   : > { %v778_v24 = vadd.f32 %v777_v23, %v629_v22  ;;  %v4347_v26 = vpop.f32.mrf.mxu0 }
 0x122   : > { %v4383_v27 = vpop.f32.mrf.mxu1 }
 0x123   : > { %v632_v28 = vpop.f32.mrf.mxu0 }
 0x124   : > { %v780_v29 = vpop.f32.mrf.mxu1 }
 0x125   : > { %v781_v30 = vadd.f32 %v780_v29, %v632_v28  ;;  %v4348_v31 = vpop.f32.mrf.mxu0 }
 0x126   : > { %v4384_v33 = vpop.f32.mrf.mxu1 }
 0x127   : > { %v637_v34 = vpop.f32.mrf.mxu0 }
 0x128   : > { %v785_v35 = vpop.f32.mrf.mxu1 }
 0x129   : > { %v786_v36 = vadd.f32 %v785_v35, %v637_v34  ;;  %v4351_v37 = vpop.f32.mrf.mxu0 }
 0x12a   : > { %v4387_v38 = vpop.f32.mrf.mxu1 }
 0x12b   : > { %v640_v39 = vpop.f32.mrf.mxu0 }
 0x12c   : > { %v788_v40 = vpop.f32.mrf.mxu1 }
 0x12d   : > { %v4352_v42 = vpop.f32.mrf.mxu0 }
 0x12e   : > { %v4388_v43 = vpop.f32.mrf.mxu1 }
 0x12f   : > { %v970_v44 = vpop.f32.mrf.mxu0 }
 0x130   : > { %v1008_v45 = vadd.f32 %v970_v44, %v754_v60  ;;  %v1154_v46 = vpop.f32.mrf.mxu1 }
 0x131   : > { %v4407_v47 = vpop.f32.mrf.mxu0 }
 0x132   : > { %v1192_v48 = vadd.f32 %v1154_v46, %v1008_v45  ;;  %v4443_v49 = vpop.f32.mrf.mxu1 }
 0x133   : > { %v973_v50 = vpop.f32.mrf.mxu0 }
 0x134   : > { %v1009_v51 = vadd.f32 %v973_v50, %v757_v1  ;;  %v1157_v52 = vpop.f32.mrf.mxu1 }
 0x135   : > { %v4408_v53 = vpop.f32.mrf.mxu0 }
 0x136   : > { %v1193_v54 = vadd.f32 %v1157_v52, %v1009_v51  ;;  %v4444_v32 = vpop.f32.mrf.mxu1 }
 0x137   : > { %v978_v55 = vpop.f32.mrf.mxu0 }
 0x138   : > { %v1010_v41 = vadd.f32 %v978_v55, %v762_v5  ;;  %v1162_v56 = vpop.f32.mrf.mxu1 }
 0x139   : > { %v4411_v58 = vpop.f32.mrf.mxu0 }
 0x13a   : > { %v1194_v59 = vadd.f32 %v1162_v56, %v1010_v41  ;;  %v4447_v61 = vpop.f32.mrf.mxu1 }
 0x13b   : > { %v981_v62 = vpop.f32.mrf.mxu0 }
 0x13c   : > { %v1011_v63 = vadd.f32 %v981_v62, %v765_v25  ;;  %v1165_v0 = vpop.f32.mrf.mxu1 }
 0x13d   : > { %v4412_v60 = vpop.f32.mrf.mxu0 }
 0x13e   : > { %v1195_v57 = vadd.f32 %v1165_v0, %v1011_v63  ;;  %v4448_v2 = vpop.f32.mrf.mxu1 }
 0x13f   : > { %v986_v3 = vpop.f32.mrf.mxu0 }
 0x140   : > { %v1012_v4 = vadd.f32 %v986_v3, %v770_v14  ;;  %v1170_v6 = vpop.f32.mrf.mxu1 }
 0x141   : > { %v4415_v1 = vpop.f32.mrf.mxu0 }
 0x142   : > { %v1196_v7 = vadd.f32 %v1170_v6, %v1012_v4  ;;  %v4451_v8 = vpop.f32.mrf.mxu1 }
 0x143   : > { %v989_v9 = vpop.f32.mrf.mxu0 }
 0x144   : > { %v1013_v10 = vadd.f32 %v989_v9, %v773_v19  ;;  %v1173_v11 = vpop.f32.mrf.mxu1 }
 0x145   : > { %v4416_v5 = vpop.f32.mrf.mxu0 }
 0x146   : > { %v1197_v12 = vadd.f32 %v1173_v11, %v1013_v10  ;;  %v4452_v13 = vpop.f32.mrf.mxu1 }
 0x147   : > { %v994_v15 = vpop.f32.mrf.mxu0 }
 0x148   : > { %v1014_v16 = vadd.f32 %v994_v15, %v778_v24  ;;  %v1178_v17 = vpop.f32.mrf.mxu1 }
 0x149   : > { %v4419_v25 = vpop.f32.mrf.mxu0 }
 0x14a   : > { %v1198_v18 = vadd.f32 %v1178_v17, %v1014_v16  ;;  %v4455_v20 = vpop.f32.mrf.mxu1 }
 0x14b   : > { %v997_v21 = vpop.f32.mrf.mxu0 }
 0x14c   : > { %v1015_v22 = vadd.f32 %v997_v21, %v781_v30  ;;  %v1181_v23 = vpop.f32.mrf.mxu1 }
 0x14d   : > { %v4420_v14 = vpop.f32.mrf.mxu0 }
 0x14e   : > { %v1199_v26 = vadd.f32 %v1181_v23, %v1015_v22  ;;  %v4456_v27 = vpop.f32.mrf.mxu1 }
 0x14f   : > { %v1002_v28 = vpop.f32.mrf.mxu0 }
 0x150   : > { %v1016_v29 = vadd.f32 %v1002_v28, %v786_v36  ;;  %v1186_v31 = vpop.f32.mrf.mxu1 }
 0x151   : > { %v4423_v19 = vpop.f32.mrf.mxu0 }
 0x152   : > { %v1200_v33 = vadd.f32 %v1186_v31, %v1016_v29  ;;  %v4459_v34 = vpop.f32.mrf.mxu1 }
 0x153   : > { %v1005_v35 = vpop.f32.mrf.mxu0 }
 0x154   : > { %v1189_v37 = vpop.f32.mrf.mxu1 }
 0x155   : > { %v4424_v38 = vpop.f32.mrf.mxu0 }
 0x156   : > { %v4460_v24 = vpop.f32.mrf.mxu1 }
 0x157   : > { %v1338_v39 = vpop.f32.mrf.mxu0 }
 0x158   : > { %v1376_v40 = vadd.f32 %v1338_v39, %v1192_v48  ;;  %v1563_v42 = vpop.f32.mrf.mxu1 }
 0x159   : > { %v4479_v43 = vpop.f32.mrf.mxu0 }
 0x15a   : > { %v1601_v44 = vadd.f32 %v1563_v42, %v1376_v40  ;;  %v4515_v30 = vpop.f32.mrf.mxu1 }
 0x15b   : > { %v1341_v45 = vpop.f32.mrf.mxu0 }
 0x15c   : > { %v1377_v46 = vadd.f32 %v1341_v45, %v1193_v54  ;;  %v1566_v47 = vpop.f32.mrf.mxu1 }
 0x15d   : > { %v4480_v49 = vpop.f32.mrf.mxu0 }
 0x15e   : > { %v1602_v50 = vadd.f32 %v1566_v47, %v1377_v46  ;;  %v4516_v36 = vpop.f32.mrf.mxu1 }
 0x15f   : > { %v1346_v51 = vpop.f32.mrf.mxu0 }
 0x160   : > { %v1378_v52 = vadd.f32 %v1346_v51, %v1194_v59  ;;  %v1571_v53 = vpop.f32.mrf.mxu1 }
 0x161   : > { %v4483_v32 = vpop.f32.mrf.mxu0 }
 0x162   : > { %v1603_v55 = vadd.f32 %v1571_v53, %v1378_v52  ;;  %v4519_v41 = vpop.f32.mrf.mxu1 }
 0x163   : > { %v1349_v56 = vpop.f32.mrf.mxu0 }
 0x164   : > { %v1379_v58 = vadd.f32 %v1349_v56, %v1195_v57  ;;  %v1574_v61 = vpop.f32.mrf.mxu1 }
 0x165   : > { %v4484_v48 = vpop.f32.mrf.mxu0 }
 0x166   : > { %v1604_v62 = vadd.f32 %v1574_v61, %v1379_v58  ;;  %v4520_v63 = vpop.f32.mrf.mxu1 }
 0x167   : > { %v1354_v0 = vpop.f32.mrf.mxu0 }
 0x168   : > { %v1380_v60 = vadd.f32 %v1354_v0, %v1196_v7  ;;  %v1579_v2 = vpop.f32.mrf.mxu1 }
 0x169   : > { %v4487_v54 = vpop.f32.mrf.mxu0 }
 0x16a   : > { %v1605_v3 = vadd.f32 %v1579_v2, %v1380_v60  ;;  %v4523_v4 = vpop.f32.mrf.mxu1 }
 0x16b   : > { %v1357_v6 = vpop.f32.mrf.mxu0 }
 0x16c   : > { %v1381_v1 = vadd.f32 %v1357_v6, %v1197_v12  ;;  %v1582_v8 = vpop.f32.mrf.mxu1 }
 0x16d   : > { %v4488_v59 = vpop.f32.mrf.mxu0 }
 0x16e   : > { %v1606_v9 = vadd.f32 %v1582_v8, %v1381_v1  ;;  %v4524_v10 = vpop.f32.mrf.mxu1 }
 0x16f   : > { %v1362_v11 = vpop.f32.mrf.mxu0 }
 0x170   : > { %v1382_v5 = vadd.f32 %v1362_v11, %v1198_v18  ;;  %v1587_v13 = vpop.f32.mrf.mxu1 }
 0x171   : > { %v4491_v57 = vpop.f32.mrf.mxu0 }
 0x172   : > { %v5447_v15 = vadd.f32 %v1587_v13, %v1382_v5  ;;  %v4527_v16 = vpop.f32.mrf.mxu1  ;;  %v4858_v57 = vmov 1966171168  }
 0x173   : > { %v1365_v17 = vpop.f32.mrf.mxu0  ;;  %v2236_v16 = vunpack.c.l.s4 %v4858_v57 }
 0x174   : > { %v1383_v25 = vadd.f32 %v1365_v17, %v1199_v26  ;;  %v1590_v7 = vpop.f32.mrf.mxu1  ;;  %v2238_v17 = vlaneseq }
 0x175   : > { %v4492_v20 = vpop.f32.mrf.mxu0 }
 0x176   : > { %v5449_v21 = vadd.f32 %v1590_v7, %v1383_v25  ;;  %v4528_v22 = vpop.f32.mrf.mxu1 }
 0x177   : > { %v1370_v23 = vpop.f32.mrf.mxu0  ;;  %v2237_v22 = vunpack.c.0.s8 %v2236_v16 }
 0x178   : > { %v1384_v12 = vadd.f32 %v1370_v23, %v1200_v33  ;;  %v1595_v14 = vpop.f32.mrf.mxu1  ;;  %v2239_v23 = vshrl.u32 %v2238_v17, 7 }
 0x179   : > { %v4495_v27 = vpop.f32.mrf.mxu0 }
 0x17a   : > { %v5451_v28 = vadd.f32 %v1595_v14, %v1384_v12  ;;  %v4531_v29 = vpop.f32.mrf.mxu1 }
 0x17b   : > { %v1373_v18 = vpop.f32.mrf.mxu0 }
 0x17c   : > { %v1598_v31 = vpop.f32.mrf.mxu1 }
 0x17d   : > { %v4496_v19 = vpop.f32.mrf.mxu0  ;;  %v5470_v31 = vsub.s32 %v2237_v22, %v2239_v23 }
 0x17e   : > { %v4532_v34 = vpop.f32.mrf.mxu1 }
 0x17f   : > { %v1788_v35 = vpop.f32.mrf.mxu0 }
 0x180   : > { %v1826_v37 = vadd.f32 %v1788_v35, %v1601_v44  ;;  %v2013_v38 = vpop.f32.mrf.mxu1 }
 0x181   : > { %v4551_v26 = vpop.f32.mrf.mxu0 }
 0x182   : > { %v2051_v24 = vadd.f32 %v2013_v38, %v1826_v37  ;;  %v4587_v39 = vpop.f32.mrf.mxu1 }
 0x183   : > { %v1791_v40 = vpop.f32.mrf.mxu0 }
 0x184   : > { %v1827_v42 = vadd.f32 %v1791_v40, %v1602_v50  ;;  %v2016_v43 = vpop.f32.mrf.mxu1 }
 0x185   : > { %v4552_v30 = vpop.f32.mrf.mxu0 }
 0x186   : > { %v5453_v33 = vadd.f32 %v2016_v43, %v1827_v42  ;;  %v4588_v45 = vpop.f32.mrf.mxu1 }
 0x187   : > { %v1796_v46 = vpop.f32.mrf.mxu0 }
 0x188   : > { %v1828_v47 = vadd.f32 %v1796_v46, %v1603_v55  ;;  %v2021_v49 = vpop.f32.mrf.mxu1 }
 0x189   : > { %v4555_v36 = vpop.f32.mrf.mxu0 }
 0x18a   : > { %v5455_v51 = vadd.f32 %v2021_v49, %v1828_v47  ;;  %v4591_v52 = vpop.f32.mrf.mxu1 }
 0x18b   : > { %v1799_v53 = vpop.f32.mrf.mxu0 }
 0x18c   : > { %v1829_v44 = vadd.f32 %v1799_v53, %v1604_v62  ;;  %v2024_v32 = vpop.f32.mrf.mxu1 }
 0x18d   : > { %v4556_v41 = vpop.f32.mrf.mxu0 }
 0x18e   : > { %v5457_v56 = vadd.f32 %v2024_v32, %v1829_v44  ;;  %v4592_v58 = vpop.f32.mrf.mxu1 }
 0x18f   : > { %v1804_v50 = vpop.f32.mrf.mxu0 }
 0x190   : > { %v1830_v61 = vadd.f32 %v1804_v50, %v1605_v3  ;;  %v2029_v48 = vpop.f32.mrf.mxu1 }
 0x191   : > { %v4559_v63 = vpop.f32.mrf.mxu0 }
 0x192   : > { %v5459_v0 = vadd.f32 %v2029_v48, %v1830_v61  ;;  %v4595_v60 = vpop.f32.mrf.mxu1 }
 0x193   : > { %v1807_v55 = vpop.f32.mrf.mxu0 }
 0x194   : > { %v1831_v2 = vadd.f32 %v1807_v55, %v1606_v9  ;;  %v2032_v54 = vpop.f32.mrf.mxu1 }
 0x195   : > { %v4560_v4 = vpop.f32.mrf.mxu0 }
 0x196   : > { %v5461_v6 = vadd.f32 %v2032_v54, %v1831_v2  ;;  %v4596_v1 = vpop.f32.mrf.mxu1 }
 0x197   : > { %v1812_v62 = vpop.f32.mrf.mxu0 }
 0x198   : > { %v2037_v8 = vpop.f32.mrf.mxu1  ;;  %v1832_v12 = vadd.f32 %v1812_v62, %v5447_v15 }
 0x199   : > { %v4563_v59 = vpop.f32.mrf.mxu0 }
 0x19a   : > { %v4599_v10 = vpop.f32.mrf.mxu1  ;;  %v2057_v19 = vadd.f32 %v2037_v8, %v1832_v12 }
 0x19b   : > { %v1815_v11 = vpop.f32.mrf.mxu0 }
 0x19c   : > { %v5463_v5 = vpop.f32.mrf.mxu1 }
 0x19d   : > { %v4564_v3 = vpop.f32.mrf.mxu0 }
 0x19e   : > { %v4600_v13 = vpop.f32.mrf.mxu1 }
 0x19f   : > { %v5465_v25 = vpop.f32.mrf.mxu0 }
 0x1a0   : > { %v5467_v9 = vpop.f32.mrf.mxu1 }
 0x1a1   : > { %v4567_v7 = vpop.f32.mrf.mxu0 }
 0x1a2   : > { %v4603_v20 = vpop.f32.mrf.mxu1 }
 0x1a3   : > { %v1823_v14 = vpop.f32.mrf.mxu0 }
 0x1a4   : > { %v2048_v27 = vpop.f32.mrf.mxu1 }
 0x1a5   : > { %v4568_v29 = vpop.f32.mrf.mxu0 }
 0x1a6   : > { %v4604_v18 = vpop.f32.mrf.mxu1 }
 0x1a7   : > { %v2178_v34 = vpop.f32.mrf.mxu0 }
 0x1a8   : > { %v2216_v35 = vadd.f32 %v2178_v34, %v2051_v24  ;;  %v2202_v37 = vpop.f32.mrf.mxu1  ;;  %v1833_v24 = vadd.f32 %v1815_v11, %v5449_v21 }
 0x1a9   : > { %v2222_v38 = vadd.f32 %v2202_v37, %v2057_v19  ;;  %v4623_v26 = vpop.f32.mrf.mxu0 }
 0x1aa   : > { %v2234_v39 = vcombine.high %v2216_v35, %v2216_v35  ;;  %v2241_v40 = vrot.slane %v2216_v35, %v5470_v31  ;;  %v4635_v42 = vpop.f32.mrf.mxu1  ;;  %v1834_v26 = vadd.f32 %v5465_v25, %v5451_v28 }
 0x1ab   : > { %v2526_v43 = vcombine.high %v2222_v38, %v2222_v38  ;;  %v2533_v30 = vrot.slane %v2222_v38, %v5470_v31  ;;  %v2181_v15 = vpop.f32.mrf.mxu0 }
 0x1ac   : > { %v2248_v45 = vrot.slane %v2234_v39, %v5470_v31  ;;  %v2249_v46 = vcombine.high %v2241_v40, %v2241_v40  ;;  %v2257_v47 = vrot.slane %v2241_v40, %v5470_v31  ;;  %v5476_v49 = vpop.f32.mrf.mxu1  ;;  %v2217_v25 = vadd.f32 %v2181_v15, %v5453_v33 }
 0x1ad   : > { %v2540_v36 = vrot.slane %v2526_v43, %v5470_v31  ;;  %v2541_v52 = vcombine.high %v2533_v30, %v2533_v30  ;;  %v4624_v53 = vpop.f32.mrf.mxu0  ;;  %v5483_v63 = vrot.slane %v2533_v30, %v5470_v31 }
 0x1ae   : > { %v2250_v44 = vcombine.high %v2248_v45, %v2248_v45  ;;  %v2264_v32 = vrot.slane %v2248_v45, %v5470_v31  ;;  %v2271_v41 = vrot.slane %v2249_v46, %v5470_v31  ;;  %v2279_v58 = vcombine.high %v2257_v47, %v2257_v47  ;;  %v4636_v50 = vpop.f32.mrf.mxu1 }
 0x1af   : > { %v3188_v61 = vmul.f32 %v2257_v47, %v2257_v47  ;;  %v2542_v48 = vcombine.high %v2540_v36, %v2540_v36  ;;  %v5486_v60 = vrot.slane %v2541_v52, %v5470_v31  ;;  %v5488_v21 = vpop.f32.mrf.mxu0  ;;  %v2556_v40 = vrot.slane %v2540_v36, %v5470_v31 }
 0x1b0   : > { %v2278_v55 = vrot.slane %v2250_v44, %v5470_v31  ;;  %v2280_v2 = vcombine.high %v2264_v32, %v2264_v32  ;;  %v2281_v54 = vcombine.high %v2271_v41, %v2271_v41  ;;  %v2735_v4 = vcombine.low %v2257_v47, %v2271_v41  ;;  %v5491_v1 = vpop.f32.mrf.mxu1 }
 0x1b1   : > { %v4150_v62 = vcombine.high %v2257_v47, %v2271_v41  ;;  %v3189_v8 = vmul.f32 %v2271_v41, %v2271_v41  ;;  %v3190_v59 = vmul.f32 %v2279_v58, %v2279_v58  ;;  %v3192_v10 = vmul.f32 %v2264_v32, %v2264_v32  ;;  %v4627_v11 = vpop.f32.mrf.mxu0 }
 0x1b2   : > { %v2282_v3 = vcombine.high %v2278_v55, %v2278_v55  ;;  %v2737_v13 = vcombine.low %v2264_v32, %v2278_v55  ;;  %v4151_v57 = vcombine.high %v2264_v32, %v2278_v55  ;;  %v2745_v16 = vrot.slane %v2735_v4, %v5470_v31  ;;  %v4639_v17 = vpop.f32.mrf.mxu1 }
 0x1b3   : > { %v2752_v7 = vrot.slane %v4150_v62, %v5470_v31  ;;  %v3191_v20 = vmul.f32 %v2281_v54, %v2281_v54  ;;  %v3193_v22 = vmul.f32 %v2278_v55, %v2278_v55  ;;  %v3194_v23 = vmul.f32 %v2280_v2, %v2280_v2  ;;  %v5495_v12 = vpop.f32.mrf.mxu0 }
 0x1b4   : > { %v2759_v14 = vrot.slane %v2737_v13, %v5470_v31  ;;  %v2766_v27 = vrot.slane %v4151_v57, %v5470_v31  ;;  %v3195_v29 = vmul.f32 %v2282_v3, %v2282_v3  ;;  %v3316_v18 = vcombine.low %v3188_v61, %v3189_v8  ;;  %v2213_v19 = vpop.f32.mrf.mxu1 }
 0x1b5   : > { %v3317_v34 = vcombine.low %v3190_v59, %v3191_v20  ;;  %v3318_v35 = vcombine.low %v3192_v10, %v3193_v22  ;;  %v2570_v37 = vrot.slane %v2542_v48, %v5470_v31  ;;  %v4628_v38 = vpop.f32.mrf.mxu0  ;;  %v2571_v42 = vcombine.high %v5483_v63, %v5483_v63 }
 0x1b6   : > { %v3319_v39 = vcombine.low %v3194_v23, %v3195_v29  ;;  %v4640_v43 = vpop.f32.mrf.mxu1  ;;  %v2767_v30 = vcombine.low %v2745_v16, %v2752_v7  ;;  %v2768_v45 = vcombine.low %v2759_v14, %v2766_v27  ;;  %v3326_v46 = vrot.slane %v3316_v18, %v5470_v31 }
 0x1b7   : > { %v3333_v47 = vrot.slane %v3317_v34, %v5470_v31  ;;  %v5507_v52 = vpop.f32.mrf.mxu0  ;;  %v2058_v53 = vadd.f32 %v5463_v5, %v1833_v24  ;;  %v2573_v28 = vcombine.high %v5486_v60, %v5486_v60  ;;  %v3340_v36 = vrot.slane %v3318_v35, %v5470_v31 }
 0x1b8   : > { %v3347_v44 = vrot.slane %v3319_v39, %v5470_v31  ;;  %v2982_v41 = vcombine.low %v5486_v60, %v2571_v42  ;;  %v4156_v58 = vcombine.high %v2556_v40, %v2570_v37  ;;  %v5517_v61 = vadd.f32 %v5467_v9, %v1834_v26 }
 0x1b9   : > { %v3348_v32 = vcombine.low %v3326_v46, %v3333_v47  ;;  %v4631_v50 = vpop.f32.mrf.mxu0  ;;  %v2574_v48 = vcombine.high %v2570_v37, %v2570_v37  ;;  %v2983_v55 = vcombine.low %v2573_v28, %v2556_v40  ;;  %v2223_v5 = vadd.f32 %v5476_v49, %v2058_v53 }
 0x1ba   : > { %v5521_v24 = vrot.slane %v2767_v30, %v5470_v31  ;;  %v5524_v2 = vrot.slane %v2768_v45, %v5470_v31  ;;  %v3349_v33 = vcombine.low %v3340_v36, %v3347_v44  ;;  %v2572_v15 = vcombine.high %v2556_v40, %v2556_v40 }
 0x1bb   : > { %v5526_v54 = vpop.f32.mrf.mxu0  ;;  %v5529_v4 = vrot.slane %v3348_v32, %v5470_v31  ;;  %v5533_v9 = vmul.f32 %v5483_v63, %v5483_v63  ;;  %v5537_v49 = vmul.f32 %v5486_v60, %v5486_v60  ;;  %v5539_v62 = vmul.f32 %v2571_v42, %v2571_v42 }
 0x1bc   : > { %v5542_v8 = vrot.slane %v2982_v41, %v5470_v31  ;;  %v5545_v59 = vrot.slane %v4156_v58, %v5470_v31  ;;  %v2283_v10 = vcombine.high %v2217_v25, %v2217_v25  ;;  %v2290_v11 = vrot.slane %v2217_v25, %v5470_v31 }
 0x1bd   : > { %v4632_v3 = vpop.f32.mrf.mxu0  ;;  %v5549_v13 = vrot.slane %v2983_v55, %v5470_v31  ;;  %v3237_v57 = vmul.f32 %v2574_v48, %v2574_v48  ;;  %v2575_v16 = vcombine.high %v2223_v5, %v2223_v5  ;;  %v2582_v60 = vrot.slane %v2223_v5, %v5470_v31 }
 0x1be   : > { %v5553_v17 = vrot.slane %v3349_v33, %v5470_v31  ;;  %v5555_v7 = vmul.f32 %v2573_v28, %v2573_v28  ;;  %v2297_v20 = vrot.slane %v2283_v10, %v5470_v31  ;;  %v2298_v22 = vcombine.high %v2290_v11, %v2290_v11 }
 0x1bf   : > { %v5558_v23 = vmul.f32 %v2556_v40, %v2556_v40  ;;  %v3236_v14 = vmul.f32 %v2572_v15, %v2572_v15  ;;  %v2306_v27 = vrot.slane %v2290_v11, %v5470_v31  ;;  %v2589_v29 = vrot.slane %v2575_v16, %v5470_v31 }
 0x1c0   : > { %v3563_v18 = vcombine.low %v5537_v49, %v5539_v62  ;;  %v2299_v19 = vcombine.high %v2297_v20, %v2297_v20  ;;  %v2313_v34 = vrot.slane %v2297_v20, %v5470_v31  ;;  %v2320_v35 = vrot.slane %v2298_v22, %v5470_v31 }
 0x1c1   : > { %v3013_v37 = vcombine.low %v5542_v8, %v5549_v13  ;;  %v3610_v38 = vcombine.low %v3236_v14, %v3237_v57  ;;  %v2328_v26 = vcombine.high %v2306_v27, %v2306_v27  ;;  %v2590_v39 = vcombine.high %v2582_v60, %v2582_v60 }
 0x1c2   : > { %v2327_v40 = vrot.slane %v2299_v19, %v5470_v31  ;;  %v2329_v42 = vcombine.high %v2313_v34, %v2313_v34  ;;  %v2330_v43 = vcombine.high %v2320_v35, %v2320_v35  ;;  %v3196_v30 = vmul.f32 %v2320_v35, %v2320_v35 }
 0x1c3   : > { %v2784_v45 = vcombine.low %v2320_v35, %v2328_v26  ;;  %v3197_v46 = vmul.f32 %v2328_v26, %v2328_v26  ;;  %v3199_v47 = vmul.f32 %v2313_v34, %v2313_v34  ;;  %v2591_v53 = vcombine.high %v2589_v29, %v2589_v29 }
 0x1c4   : > { %v5569_v44 = vcombine.high %v2327_v40, %v2327_v40  ;;  %v2785_v28 = vcombine.low %v2330_v43, %v2313_v34  ;;  %v2786_v25 = vcombine.low %v2327_v40, %v2329_v42  ;;  %v3198_v36 = vmul.f32 %v2330_v43, %v2330_v43 }
 0x1c5   : > { %v3564_v32 = vcombine.low %v5555_v7, %v5558_v23  ;;  %v3200_v41 = vmul.f32 %v2327_v40, %v2327_v40  ;;  %v3201_v58 = vmul.f32 %v2329_v42, %v2329_v42  ;;  %v3365_v50 = vcombine.low %v3196_v30, %v3197_v46 }
 0x1c6   : > { %v3620_v48 = vrot.slane %v3610_v38, %v5470_v31  ;;  %v2794_v55 = vrot.slane %v2784_v45, %v5470_v31  ;;  %v2801_v5 = vrot.slane %v2785_v28, %v5470_v31  ;;  %v3366_v33 = vcombine.low %v3198_v36, %v3199_v47 }
 0x1c7   : > { %v5577_v15 = vrot.slane %v2786_v25, %v5470_v31  ;;  %v3367_v10 = vcombine.low %v3200_v41, %v3201_v58  ;;  %v2598_v11 = vrot.slane %v2582_v60, %v5470_v31  ;;  %v2605_v3 = vrot.slane %v2589_v29, %v5470_v31 }
 0x1c8   : > { %v5583_v57 = vmul.f32 %v5569_v44, %v5569_v44  ;;  %v3382_v16 = vrot.slane %v3366_v33, %v5470_v31  ;;  %v2612_v20 = vrot.slane %v2590_v39, %v5470_v31  ;;  %v5588_v22 = vrot.slane %v2591_v53, %v5470_v31 }
 0x1c9   : > { %v2816_v14 = vcombine.low %v2794_v55, %v2801_v5  ;;  %v3375_v27 = vrot.slane %v3365_v50, %v5470_v31  ;;  %v5592_v19 = vrot.slane %v3367_v10, %v5470_v31  ;;  %v2620_v60 = vcombine.high %v2598_v11, %v2598_v11 }
 0x1ca   : > { %v2621_v34 = vcombine.high %v2612_v20, %v2612_v20  ;;  %v3030_v29 = vcombine.low %v2598_v11, %v2612_v20  ;;  %v3238_v35 = vmul.f32 %v2598_v11, %v2598_v11  ;;  %v3242_v38 = vmul.f32 %v2605_v3, %v2605_v3 }
 0x1cb   : > { %v3397_v26 = vcombine.low %v3375_v27, %v3382_v16  ;;  %v4157_v40 = vcombine.high %v2598_v11, %v2612_v20  ;;  %v3032_v42 = vcombine.low %v2605_v3, %v5588_v22  ;;  %v3239_v43 = vmul.f32 %v2612_v20, %v2612_v20 }
 0x1cc   : > { %v3046_v39 = vrot.slane %v3030_v29, %v5470_v31  ;;  %v3240_v30 = vmul.f32 %v2620_v60, %v2620_v60  ;;  %v3241_v45 = vmul.f32 %v2621_v34, %v2621_v34  ;;  %v3243_v46 = vmul.f32 %v5588_v22, %v5588_v22 }
 0x1cd   : > { %v3053_v47 = vrot.slane %v4157_v40, %v5470_v31  ;;  %v3060_v53 = vrot.slane %v3032_v42, %v5470_v31  ;;  %v3611_v28 = vcombine.low %v3238_v35, %v3239_v43  ;;  %v2218_v25 = vadd.f32 %v5488_v21, %v5455_v51 }
 0x1ce   : > { %v3061_v36 = vcombine.low %v5545_v59, %v3046_v39  ;;  %v3612_v41 = vcombine.low %v3240_v30, %v3241_v45  ;;  %v3613_v58 = vcombine.low %v3242_v38, %v3243_v46  ;;  %v2224_v50 = vadd.f32 %v5491_v1, %v5517_v61 }
 0x1cf   : > { %v3062_v55 = vcombine.low %v3053_v47, %v3060_v53  ;;  %v3627_v5 = vrot.slane %v3611_v28, %v5470_v31  ;;  %v2332_v33 = vcombine.high %v2218_v25, %v2218_v25  ;;  %v2339_v10 = vrot.slane %v2218_v25, %v5470_v31 }
 0x1d0   : > { %v5608_v11 = vrot.slane %v2816_v14, %v5470_v31  ;;  %v3069_v3 = vrot.slane %v3061_v36, %v5470_v31  ;;  %v3634_v51 = vrot.slane %v3612_v41, %v5470_v31  ;;  %v3641_v21 = vrot.slane %v3613_v58, %v5470_v31 }
 0x1d1   : > { %v3076_v59 = vrot.slane %v3062_v55, %v5470_v31  ;;  %v3642_v16 = vcombine.low %v3620_v48, %v3627_v5  ;;  %v2346_v1 = vrot.slane %v2332_v33, %v5470_v31  ;;  %v2347_v61 = vcombine.high %v2339_v10, %v2339_v10 }
 0x1d2   : > { %v5616_v20 = vrot.slane %v3397_v26, %v5470_v31  ;;  %v3643_v27 = vcombine.low %v3634_v51, %v3641_v21  ;;  %v2355_v60 = vrot.slane %v2339_v10, %v5470_v31  ;;  %v2623_v14 = vcombine.high %v2224_v50, %v2224_v50 }
 0x1d3   : > { %v5619_v34 = vcombine.low %v3069_v3, %v3076_v59  ;;  %v5622_v29 = vrot.slane %v3642_v16, %v5470_v31  ;;  %v2348_v35 = vcombine.high %v2346_v1, %v2346_v1  ;;  %v5625_v38 = vrot.slane %v2346_v1, %v5470_v31 }
 0x1d4   : > { %v5628_v48 = vrot.slane %v3643_v27, %v5470_v31  ;;  %v2369_v40 = vrot.slane %v2347_v61, %v5470_v31  ;;  %v2377_v26 = vcombine.high %v2355_v60, %v2355_v60  ;;  %v2787_v42 = vcombine.low %v5569_v44, %v2355_v60 }
 0x1d5   : > { %v5633_v43 = vrot.slane %v2348_v35, %v5470_v31  ;;  %v2378_v39 = vcombine.high %v5625_v38, %v5625_v38  ;;  %v3203_v30 = vmul.f32 %v2355_v60, %v2355_v60  ;;  %v2630_v45 = vrot.slane %v2224_v50, %v5470_v31 }
 0x1d6   : > { %v3658_v46 = vcombine.low %v5622_v29, %v5628_v48  ;;  %v2379_v47 = vcombine.high %v2369_v40, %v2369_v40  ;;  %v2815_v53 = vrot.slane %v2787_v42, %v5470_v31  ;;  %v4152_v28 = vcombine.high %v2355_v60, %v2369_v40 }
 0x1d7   : > { %v2380_v25 = vcombine.high %v5633_v43, %v5633_v43  ;;  %v2834_v44 = vcombine.low %v5625_v38, %v5633_v43  ;;  %v3206_v36 = vmul.f32 %v5625_v38, %v5625_v38  ;;  %v3207_v41 = vmul.f32 %v5633_v43, %v5633_v43 }
 0x1d8   : > { %v2817_v58 = vcombine.low %v5577_v15, %v2815_v53  ;;  %v3204_v50 = vmul.f32 %v2377_v26, %v2377_v26  ;;  %v3205_v55 = vmul.f32 %v2379_v47, %v2379_v47  ;;  %v2622_v5 = vcombine.high %v5588_v22, %v5588_v22 }
 0x1d9   : > { %v2843_v33 = vrot.slane %v4152_v28, %v5470_v31  ;;  %v2850_v10 = vrot.slane %v2834_v44, %v5470_v31  ;;  %v3368_v3 = vcombine.low %v5583_v57, %v3203_v30  ;;  %v3415_v51 = vcombine.low %v3206_v36, %v3207_v41 }
 0x1da   : > { %v5655_v21 = vmul.f32 %v2378_v39, %v2378_v39  ;;  %v3414_v59 = vcombine.low %v3204_v50, %v3205_v55  ;;  %v2637_v16 = vrot.slane %v2623_v14, %v5470_v31  ;;  %v2638_v1 = vcombine.high %v2630_v45, %v2630_v45 }
 0x1db   : > { %v2865_v15 = vcombine.low %v2843_v33, %v2850_v10  ;;  %v5658_v61 = vmul.f32 %v2380_v25, %v2380_v25  ;;  %v3396_v27 = vrot.slane %v3368_v3, %v5470_v31  ;;  %v2646_v22 = vrot.slane %v2630_v45, %v5470_v31 }
 0x1dc   : > { %v2831_v60 = vrot.slane %v2817_v58, %v5470_v31  ;;  %v2639_v35 = vcombine.high %v2637_v16, %v2637_v16  ;;  %v2653_v57 = vrot.slane %v2637_v16, %v5470_v31  ;;  %v2660_v40 = vrot.slane %v2638_v1, %v5470_v31 }
 0x1dd   : > { %v3398_v26 = vcombine.low %v5592_v19, %v3396_v27  ;;  %v5667_v42 = vrot.slane %v3415_v51, %v5470_v31  ;;  %v2668_v14 = vcombine.high %v2646_v22, %v2646_v22  ;;  %v3078_v39 = vcombine.low %v2622_v5, %v2646_v22 }
 0x1de   : > { %v5671_v30 = vrot.slane %v3414_v59, %v5470_v31  ;;  %v2667_v45 = vrot.slane %v2639_v35, %v5470_v31  ;;  %v2669_v47 = vcombine.high %v2653_v57, %v2653_v57  ;;  %v2670_v53 = vcombine.high %v2660_v40, %v2660_v40 }
 0x1df   : > { %v5675_v28 = vrot.slane %v2865_v15, %v5470_v31  ;;  %v3079_v25 = vcombine.low %v2660_v40, %v2668_v14  ;;  %v3088_v19 = vrot.slane %v3078_v39, %v5470_v31  ;;  %v3244_v44 = vmul.f32 %v2622_v5, %v2622_v5 }
 0x1e0   : > { %v5679_v36 = vrot.slane %v3398_v26, %v5470_v31  ;;  %v3080_v41 = vcombine.low %v2670_v53, %v2653_v57  ;;  %v3081_v58 = vcombine.low %v2667_v45, %v2669_v47  ;;  %v3245_v50 = vmul.f32 %v2646_v22, %v2646_v22 }
 0x1e1   : > { %v3095_v55 = vrot.slane %v3079_v25, %v5470_v31  ;;  %v3246_v33 = vmul.f32 %v2660_v40, %v2660_v40  ;;  %v3247_v10 = vmul.f32 %v2668_v14, %v2668_v14  ;;  %v3248_v3 = vmul.f32 %v2670_v53, %v2670_v53 }
 0x1e2   : > { %v3102_v51 = vrot.slane %v3080_v41, %v5470_v31  ;;  %v3109_v59 = vrot.slane %v3081_v58, %v5470_v31  ;;  %v3249_v5 = vmul.f32 %v2653_v57, %v2653_v57  ;;  %v3250_v16 = vmul.f32 %v2667_v45, %v2667_v45 }
 0x1e3   : > { %v3110_v1 = vcombine.low %v3088_v19, %v3095_v55  ;;  %v3251_v15 = vmul.f32 %v2669_v47, %v2669_v47  ;;  %v3659_v27 = vcombine.low %v3244_v44, %v3245_v50  ;;  %v3660_v35 = vcombine.low %v3246_v33, %v3247_v10 }
 0x1e4   : > { %v3111_v22 = vcombine.low %v3102_v51, %v3109_v59  ;;  %v3661_v26 = vcombine.low %v3248_v3, %v3249_v5  ;;  %v2219_v39 = vadd.f32 %v5495_v12, %v5457_v56  ;;  %v2783_v40 = vcombine.low %v5521_v24, %v5524_v2 }
 0x1e5   : > { %v3118_v14 = vrot.slane %v3110_v1, %v5470_v31  ;;  %v3662_v53 = vcombine.low %v3250_v16, %v3251_v15  ;;  %v3669_v25 = vrot.slane %v3659_v27, %v5470_v31  ;;  %v3676_v57 = vrot.slane %v3660_v35, %v5470_v31 }
 0x1e6   : > { %v3125_v45 = vrot.slane %v3111_v22, %v5470_v31  ;;  %v3683_v47 = vrot.slane %v3661_v26, %v5470_v31  ;;  %v2381_v19 = vcombine.high %v2219_v39, %v2219_v39  ;;  %v2388_v44 = vrot.slane %v2219_v39, %v5470_v31 }
 0x1e7   : > { %v3690_v56 = vrot.slane %v3662_v53, %v5470_v31  ;;  %v3691_v12 = vcombine.low %v3669_v25, %v3676_v57  ;;  %v2832_v24 = vcombine.low %v5608_v11, %v2831_v60  ;;  %v4153_v2 = vcombine.high %v5625_v38, %v5633_v43 }
 0x1e8   : > { %v5709_v41 = vcombine.low %v3118_v14, %v3125_v45  ;;  %v2395_v58 = vrot.slane %v2381_v19, %v5470_v31  ;;  %v2396_v50 = vcombine.high %v2388_v44, %v2388_v44  ;;  %v2404_v55 = vrot.slane %v2388_v44, %v5470_v31 }
 0x1e9   : > { %v3692_v33 = vcombine.low %v3683_v47, %v3690_v56  ;;  %v5714_v11 = vrot.slane %v3691_v12, %v5470_v31  ;;  %v2857_v38 = vrot.slane %v4153_v2, %v5470_v31  ;;  %v4180_v43 = vpack.c.bf16 %v2832_v24, %v2783_v40 }
 0x1ea   : > { %v4195_v60 = vpack.c.bf16 %v5709_v41, %v5619_v34  ;;  %v2397_v10 = vcombine.high %v2395_v58, %v2395_v58  ;;  %v2411_v3 = vrot.slane %v2395_v58, %v5470_v31  ;;  %v2418_v51 = vrot.slane %v2396_v50, %v5470_v31 }
 0x1eb   : > { %v5722_v59 = vrot.slane %v3692_v33, %v5470_v31  ;;  %4181 = vst [vmem:[%s5707_s9] sm:$0xff] %v4180_v43   ;;  %v3175_v5 = vadd.f32 %v2832_v24, %v2783_v40  ;;  %v3210_v16 = vmul.f32 %v2404_v55, %v2404_v55  ;;  %v3364_v1 = vcombine.low %v5529_v4, %v5553_v17 }
 0x1ec   : > { %4199 = vst [vmem:[%s5707_s9 + $0x18] sm:$0xff] %v4195_v60   ;;  %v2425_v15 = vrot.slane %v2397_v10, %v5470_v31  ;;  %v2426_v27 = vcombine.high %v2411_v3, %v2411_v3  ;;  %v2427_v35 = vcombine.high %v2418_v51, %v2418_v51  ;;  %v2836_v22 = vcombine.low %v2404_v55, %v2418_v51 }
 0x1ed   : > { %v3707_v26 = vcombine.low %v5714_v11, %v5722_v59  ;;  %v3211_v39 = vmul.f32 %v2418_v51, %v2418_v51  ;;  %v3213_v14 = vmul.f32 %v2411_v3, %v2411_v3  ;;  %v3413_v53 = vcombine.low %v5616_v20, %v5679_v36 }
 0x1ee   : > { %v2864_v40 = vrot.slane %v2836_v22, %v5470_v31  ;;  %v2882_v25 = vcombine.low %v2427_v35, %v2411_v3  ;;  %v2883_v57 = vcombine.low %v2425_v15, %v2426_v27  ;;  %v3212_v45 = vmul.f32 %v2427_v35, %v2427_v35 }
 0x1ef   : > { %v3214_v4 = vmul.f32 %v2425_v15, %v2425_v15  ;;  %v3215_v17 = vmul.f32 %v2426_v27, %v2426_v27  ;;  %v3416_v47 = vcombine.low %v5655_v21, %v5658_v61  ;;  %v3417_v19 = vcombine.low %v3210_v16, %v3211_v39 }
 0x1f0   : > { %v3446_v44 = vcombine.low %v5671_v30, %v5667_v42  ;;  %v2866_v56 = vcombine.low %v2857_v38, %v2864_v40  ;;  %v2892_v12 = vrot.slane %v2882_v25, %v5470_v31  ;;  %v3463_v24 = vcombine.low %v3212_v45, %v3213_v14 }
 0x1f1   : > { %v3438_v20 = vrot.slane %v3416_v47, %v5470_v31  ;;  %v3445_v36 = vrot.slane %v3417_v19, %v5470_v31  ;;  %v3464_v2 = vcombine.low %v3214_v4, %v3215_v17  ;;  %v3716_v58 = vadd.f32 %v3413_v53, %v3364_v1 }
 0x1f2   : > { %v2880_v50 = vrot.slane %v2866_v56, %v5470_v31  ;;  %v2899_v55 = vrot.slane %v2883_v57, %v5470_v31  ;;  %v3473_v21 = vrot.slane %v3463_v24, %v5470_v31  ;;  %v2220_v61 = vadd.f32 %v5507_v52, %v5459_v0 }
 0x1f3   : > { %v3447_v42 = vcombine.low %v3438_v20, %v3445_v36  ;;  %v3480_v30 = vrot.slane %v3464_v2, %v5470_v31  ;;  %v2428_v33 = vcombine.high %v2425_v15, %v2425_v15  ;;  %v2221_v38 = vadd.f32 %v5526_v54, %v5461_v6 }
 0x1f4   : > { %v5753_v43 = vrot.slane %v3563_v18, %v5470_v31  ;;  %v5756_v60 = vcombine.low %v5675_v28, %v2880_v50  ;;  %v2429_v10 = vcombine.high %v2220_v61, %v2220_v61  ;;  %v2436_v3 = vrot.slane %v2220_v61, %v5470_v31 }
 0x1f5   : > { %v5763_v0 = vrot.slane %v3564_v32, %v5470_v31  ;;  %v3454_v6 = vrot.slane %v3446_v44, %v5470_v31  ;;  %v3461_v52 = vrot.slane %v3447_v42, %v5470_v31  ;;  %v2477_v54 = vcombine.high %v2221_v38, %v2221_v38 }
 0x1f6   : > { %v3176_v49 = vadd.f32 %v3175_v5, %v5756_v60  ;;  %v2443_v62 = vrot.slane %v2429_v10, %v5470_v31  ;;  %v2444_v18 = vcombine.high %v2436_v3, %v2436_v3  ;;  %v2452_v28 = vrot.slane %v2436_v3, %v5470_v31 }
 0x1f7   : > { %v2914_v51 = vcombine.low %v2892_v12, %v2899_v55  ;;  %v3462_v16 = vcombine.low %v3454_v6, %v3461_v52  ;;  %v3495_v1 = vcombine.low %v3473_v21, %v3480_v30  ;;  %v3216_v15 = vmul.f32 %v2428_v33, %v2428_v33 }
 0x1f8   : > { %v2445_v27 = vcombine.high %v2443_v62, %v2443_v62  ;;  %v2459_v7 = vrot.slane %v2443_v62, %v5470_v31  ;;  %v2466_v23 = vrot.slane %v2444_v18, %v5470_v31  ;;  %v2474_v32 = vcombine.high %v2452_v28, %v2452_v28 }
 0x1f9   : > { %v3717_v35 = vadd.f32 %v3716_v58, %v3462_v16  ;;  %v2884_v22 = vcombine.low %v2428_v33, %v2452_v28  ;;  %v3217_v39 = vmul.f32 %v2452_v28, %v2452_v28  ;;  %v2484_v5 = vrot.slane %v2221_v38, %v5470_v31 }
 0x1fa   : > { %v2473_v14 = vrot.slane %v2445_v27, %v5470_v31  ;;  %v2885_v53 = vcombine.low %v2466_v23, %v2474_v32  ;;  %v3218_v40 = vmul.f32 %v2466_v23, %v2466_v23  ;;  %v2491_v25 = vrot.slane %v2477_v54, %v5470_v31 }
 0x1fb   : > { %v2475_v57 = vcombine.high %v2459_v7, %v2459_v7  ;;  %v2906_v45 = vrot.slane %v2884_v22, %v5470_v31  ;;  %v3219_v4 = vmul.f32 %v2474_v32, %v2474_v32  ;;  %v3465_v17 = vcombine.low %v3216_v15, %v3217_v39 }
 0x1fc   : > { %v2476_v47 = vcombine.high %v2473_v14, %v2473_v14  ;;  %v2913_v19 = vrot.slane %v2885_v53, %v5470_v31  ;;  %v2931_v44 = vcombine.low %v2459_v7, %v2473_v14  ;;  %v4154_v56 = vcombine.high %v2459_v7, %v2473_v14 }
 0x1fd   : > { %v3221_v12 = vmul.f32 %v2473_v14, %v2473_v14  ;;  %v3466_v24 = vcombine.low %v3218_v40, %v3219_v4  ;;  %v3487_v20 = vrot.slane %v3465_v17, %v5470_v31  ;;  %v2492_v36 = vcombine.high %v2484_v5, %v2484_v5 }
 0x1fe   : > { %v2915_v2 = vcombine.low %v2906_v45, %v2913_v19  ;;  %v2941_v58 = vrot.slane %v2931_v44, %v5470_v31  ;;  %v2948_v50 = vrot.slane %v4154_v56, %v5470_v31  ;;  %v3223_v55 = vmul.f32 %v2476_v47, %v2476_v47 }
 0x1ff   : > { %v2922_v21 = vrot.slane %v2914_v51, %v5470_v31  ;;  %v3494_v61 = vrot.slane %v3466_v24, %v5470_v31  ;;  %v2493_v42 = vcombine.high %v2491_v25, %v2491_v25  ;;  %v2500_v30 = vrot.slane %v2484_v5, %v5470_v31 }
 0x200   : > { %v2929_v33 = vrot.slane %v2915_v2, %v5470_v31  ;;  %v3220_v38 = vmul.f32 %v2459_v7, %v2459_v7  ;;  %v3222_v10 = vmul.f32 %v2475_v57, %v2475_v57  ;;  %v2507_v3 = vrot.slane %v2491_v25, %v5470_v31 }
 0x201   : > { %v3503_v6 = vrot.slane %v3495_v1, %v5470_v31  ;;  %v3496_v52 = vcombine.low %v3487_v20, %v3494_v61  ;;  %v2514_v54 = vrot.slane %v2492_v36, %v5470_v31  ;;  %v2521_v62 = vrot.slane %v2493_v42, %v5470_v31 }
 0x202   : > { %v2930_v18 = vcombine.low %v2922_v21, %v2929_v33  ;;  %v2963_v28 = vcombine.low %v2941_v58, %v2948_v50  ;;  %v3512_v51 = vcombine.low %v3220_v38, %v3221_v12  ;;  %v3513_v16 = vcombine.low %v3222_v10, %v3223_v55 }
 0x203   : > { %v3510_v15 = vrot.slane %v3496_v52, %v5470_v31  ;;  %v2522_v27 = vcombine.high %v2500_v30, %v2500_v30  ;;  %v2523_v23 = vcombine.high %v2507_v3, %v2507_v3  ;;  %v2525_v7 = vcombine.high %v2521_v62, %v2521_v62 }
 0x204   : > { %v4185_v32 = vpack.c.bf16 %v2930_v18, %v5756_v60  ;;  %v3177_v22 = vadd.f32 %v3176_v49, %v2930_v18  ;;  %v2524_v39 = vcombine.high %v2514_v54, %v2514_v54  ;;  %v2933_v1 = vcombine.low %v2500_v30, %v2514_v54 }
 0x205   : > { %v3511_v5 = vcombine.low %v3503_v6, %v3510_v15  ;;  %v4155_v14 = vcombine.high %v2500_v30, %v2514_v54  ;;  %v2980_v53 = vcombine.low %v2521_v62, %v2523_v23  ;;  %v2981_v40 = vcombine.low %v2525_v7, %v5483_v63 }
 0x206   : > { %4197 = vst [vmem:[%s5707_s9 + $0x8] sm:$0xff] %v4185_v32   ;;  %v3529_v25 = vrot.slane %v3513_v16, %v5470_v31  ;;  %v2955_v57 = vrot.slane %v2933_v1, %v5470_v31  ;;  %v3224_v45 = vmul.f32 %v2500_v30, %v2500_v30  ;;  %v3225_v4 = vmul.f32 %v2514_v54, %v2514_v54 }
 0x207   : > { %v3718_v17 = vadd.f32 %v3717_v35, %v3511_v5  ;;  %v2962_v47 = vrot.slane %v4155_v14, %v5470_v31  ;;  %v2990_v60 = vrot.slane %v2980_v53, %v5470_v31  ;;  %v2997_v49 = vrot.slane %v2981_v40, %v5470_v31 }
 0x208   : > { %v3226_v19 = vmul.f32 %v2522_v27, %v2522_v27  ;;  %v3227_v44 = vmul.f32 %v2524_v39, %v2524_v39  ;;  %v3228_v56 = vmul.f32 %v2521_v62, %v2521_v62  ;;  %v3229_v12 = vmul.f32 %v2523_v23, %v2523_v23 }
 0x209   : > { %v2964_v24 = vcombine.low %v2955_v57, %v2962_v47  ;;  %v3012_v63 = vcombine.low %v2990_v60, %v2997_v49  ;;  %v3230_v20 = vmul.f32 %v2525_v7, %v2525_v7  ;;  %v3514_v36 = vcombine.low %v3224_v45, %v3225_v4 }
 0x20a   : > { %v3027_v2 = vrot.slane %v3013_v37, %v5470_v31  ;;  %v3522_v35 = vrot.slane %v3512_v51, %v5470_v31  ;;  %v3515_v58 = vcombine.low %v3226_v19, %v3227_v44  ;;  %v3561_v50 = vcombine.low %v3228_v56, %v3229_v12 }
 0x20b   : > { %v2971_v55 = vrot.slane %v2963_v28, %v5470_v31  ;;  %v2978_v21 = vrot.slane %v2964_v24, %v5470_v31  ;;  %v3020_v61 = vrot.slane %v3012_v63, %v5470_v31  ;;  %v3562_v42 = vcombine.low %v3230_v20, %v5533_v9 }
 0x20c   : > { %v3594_v30 = vcombine.low %v5753_v43, %v5763_v0  ;;  %v3544_v33 = vcombine.low %v3522_v35, %v3529_v25  ;;  %v3536_v8 = vrot.slane %v3514_v36, %v5470_v31  ;;  %v3543_v13 = vrot.slane %v3515_v58, %v5470_v31 }
 0x20d   : > { %v2979_v37 = vcombine.low %v2971_v55, %v2978_v21  ;;  %v3028_v38 = vcombine.low %v3020_v61, %v3027_v2  ;;  %v3571_v10 = vrot.slane %v3561_v50, %v5470_v31  ;;  %v3578_v3 = vrot.slane %v3562_v42, %v5470_v31 }
 0x20e   : > { %v3545_v6 = vcombine.low %v3536_v8, %v3543_v13  ;;  %v3552_v9 = vrot.slane %v3544_v33, %v5470_v31  ;;  %v3608_v43 = vrot.slane %v3594_v30, %v5470_v31 }
 0x20f   : > { %v4190_v52 = vpack.c.bf16 %v3028_v38, %v2979_v37  ;;  %v3178_v54 = vadd.f32 %v3177_v22, %v2979_v37  ;;  %v3593_v62 = vcombine.low %v3571_v10, %v3578_v3 }
 0x210   : > { %v3559_v18 = vrot.slane %v3545_v6, %v5470_v31 }
 0x211   : > { %4198 = vst [vmem:[%s5707_s9 + $0x10] sm:$0xff] %v4190_v52   ;;  %v3179_v0 = vadd.f32 %v3178_v54, %v3028_v38  ;;  %v3601_v28 = vrot.slane %v3593_v62, %v5470_v31 }
 0x212   : > { %v3560_v51 = vcombine.low %v3552_v9, %v3559_v18 }
 0x213   : > { %v3180_v16 = vadd.f32 %v3179_v0, %v5619_v34  ;;  %v3609_v15 = vcombine.low %v3601_v28, %v3608_v43 }
 0x214   : > { %v3719_v27 = vadd.f32 %v3718_v17, %v3560_v51 }
 0x215   : > { %v3181_v23 = vadd.f32 %v3180_v16, %v5709_v41 }
 0x216   : > { %v3720_v7 = vadd.f32 %v3719_v27, %v3609_v15 }
 0x217   : > { %v3182_v32 = vrot.slane %v3181_v23, 4 }
 0x218   : > { %v3721_v22 = vadd.f32 %v3720_v7, %v3658_v46 }
 0x219   : > { %v3183_v39 = vadd.f32 %v3182_v32, %v3181_v23 }
 0x21a   : > { %v3722_v1 = vadd.f32 %v3721_v22, %v3707_v26 }
 0x21b   : > { %v3184_v31 = vrot.slane %v3183_v39, 2 }
 0x21c   : > { %v3723_v5 = vrot.slane %v3722_v1, 4 }
 0x21d   : > { %v3185_v14 = vadd.f32 %v3184_v31, %v3183_v39 }
 0x21e   : > { %v3724_v34 = vadd.f32 %v3723_v5, %v3722_v1 }
 0x21f   : > { %v3186_v40 = vrot.slane %v3185_v14, 1 }
 0x220   : > { %v3725_v53 = vrot.slane %v3724_v34, 2 }
 0x221   : > { %v3187_v29 = vadd.f32 %v3186_v40, %v3185_v14 }
 0x222   : > { %v3726_v25 = vadd.f32 %v3725_v53, %v3724_v34 }
 0x224   : > { %v3727_v41 = vrot.slane %v3726_v25, 1 }
 0x226   : > { %v3728_v48 = vadd.f32 %v3727_v41, %v3726_v25 }
 0x228   : > { %v3730_v46 = vsel %vm3729_vm3, %v3187_v29, %v3728_v48 }
 0x229   : > { %3731 = vst [vmem:[%s440_s19] sm:$0x3] %v3730_v46 }
 0x22a PF: > { %s14_s16 = sadd.s32 1, %s4854_s16   ;;  %s5848_s12 = smov %s4842_s13 }
 0x22b   : > { %p11_p10 = scmp.ge.s32.totalorder %s14_s16, 4   ;;  %s5849_s13 = smov %s4914_s20 }
 0x22c   : > { %s5850_s14 = smov %s4850_s15  ;;  %s5851_s15 = smov %s5853_s17 }
 0x22d   :  { %13 = sbr.rel (!%p11_p10) target bundleno = 3 (0x3), region = 127 }

// kernel: bottleneck_forward.9
= control target key start
LH: loop header
LB: loop body
LE: loop exit
PB: predicated region body
PF: predicated region fallthrough
CT: control target
= control target key end

     0   :  { %s647_s0 = inlined_call_operand.vmem [shape: bf16[128,128], index: 0, kind: input, shape index: {}]   ;;  %s648_s1 = inlined_call_operand.vmem [shape: f32[1,128], index: 1, kind: input, shape index: {}]   ;;  %s649_s2 = inlined_call_operand.vmem [shape: f32[1,128], index: 2, kind: input, shape index: {}]   ;;  %s650_s3 = inlined_call_operand.vmem [shape: bf16[128,128], index: 3, kind: input, shape index: {}]   ;;  %s651_s4 = inlined_call_operand.vmem [shape: f32[1,128], index: 4, kind: input, shape index: {}]   ;;  %s652_s5 = inlined_call_operand.vmem [shape: f32[1,128], index: 5, kind: input, shape index: {}]   ;;  %s653_s6 = inlined_call_operand.vmem [shape: bf16[128,128], index: 6, kind: output, shape index: {}]  }
   0x1   :  { %v332_v0 = vld [vmem:[%s647_s0] sm:$0xff]   ;;  %v435_v9 = vld [vmem:[%s647_s0 + $0x8] sm:$0xff]   ;;  %v436_v15 = vld [vmem:[%s647_s0 + $0x10] sm:$0xff]  }
   0x2   :  { %v497_v1 = vld [vmem:[%s648_s1] ss:$0 sm:$0xff]  ;;  %v333_v2 = vunpack.c.l.bf16 %v332_v0  ;;  %v334_v3 = vunpack.c.h.bf16 %v332_v0  ;;  %v442_v10 = vld [vmem:[%s650_s3 + $0x8] sm:$0xff]   ;;  %v337_v13 = vunpack.c.l.bf16 %v435_v9  ;;  %v338_v14 = vunpack.c.h.bf16 %v435_v9  ;;  %v443_v24 = vld [vmem:[%s650_s3 + $0x10] sm:$0xff]  }
   0x3   :  { %v364_v4 = vld [vmem:[%s650_s3] sm:$0xff]   ;;  %v369_v18 = vunpack.c.l.bf16 %v442_v10  ;;  %v370_v19 = vunpack.c.h.bf16 %v442_v10  ;;  %v341_v28 = vunpack.c.l.bf16 %v436_v15  ;;  %v342_v29 = vunpack.c.h.bf16 %v436_v15  ;;  %v437_v42 = vld [vmem:[%s647_s0 + $0x18] sm:$0xff]   ;;  %v439_v9 = vld [vmem:[%s647_s0 + $0x28] sm:$0xff]  }
   0x4   :  { %v505_v5 = vld [vmem:[%s651_s4] ss:$0 sm:$0xff]  ;;  %v365_v7 = vunpack.c.l.bf16 %v364_v4  ;;  %v366_v8 = vunpack.c.h.bf16 %v364_v4  ;;  %v62_v11 = vmul.f32 %v333_v2, %v497_v1  ;;  %v63_v12 = vmul.f32 %v334_v3, %v497_v1  ;;  %v444_v47 = vld [vmem:[%s650_s3 + $0x18] sm:$0xff]  }
   0x5   :  { %v510_v6 = vld [vmem:[%s649_s2] ss:$0 sm:$0xff]  ;;  %v64_v22 = vmul.f32 %v337_v13, %v497_v1  ;;  %v65_v23 = vmul.f32 %v338_v14, %v497_v1  ;;  %v142_v26 = vmul.f32 %v369_v18, %v505_v5  ;;  %v143_v27 = vmul.f32 %v370_v19, %v505_v5 }
   0x6   :  { %v140_v16 = vmul.f32 %v365_v7, %v505_v5  ;;  %v141_v17 = vmul.f32 %v366_v8, %v505_v5  ;;  %v85_v20 = vadd.f32 %v510_v6, %v62_v11  ;;  %v86_v21 = vadd.f32 %v510_v6, %v63_v12  ;;  %v535_v25 = vld [vmem:[%s652_s5] ss:$0 sm:$0xff] }
   0x7   :  { %v87_v32 = vadd.f32 %v510_v6, %v64_v22  ;;  %v88_v33 = vadd.f32 %v510_v6, %v65_v23  ;;  %v66_v34 = vmul.f32 %v341_v28, %v497_v1  ;;  %v67_v35 = vmul.f32 %v342_v29, %v497_v1  ;;  %v438_v56 = vld [vmem:[%s647_s0 + $0x20] sm:$0xff]   ;;  %v446_v22 = vld [vmem:[%s650_s3 + $0x28] sm:$0xff]  }
   0x8   :  { %v156_v30 = vadd.f32 %v140_v16, %v85_v20  ;;  %v157_v31 = vadd.f32 %v141_v17, %v86_v21  ;;  %v373_v36 = vunpack.c.l.bf16 %v443_v24  ;;  %v374_v37 = vunpack.c.h.bf16 %v443_v24  ;;  %v445_v2 = vld [vmem:[%s650_s3 + $0x20] sm:$0xff]  }
   0x9   :  { %v158_v40 = vadd.f32 %v142_v26, %v87_v32  ;;  %v159_v41 = vadd.f32 %v143_v27, %v88_v33  ;;  %v89_v43 = vadd.f32 %v510_v6, %v66_v34  ;;  %v90_v44 = vadd.f32 %v510_v6, %v67_v35 }
   0xa   :  { %v179_v38 = vadd.f32 %v535_v25, %v156_v30  ;;  %v180_v39 = vadd.f32 %v535_v25, %v157_v31  ;;  %v144_v45 = vmul.f32 %v373_v36, %v505_v5  ;;  %v145_v46 = vmul.f32 %v374_v37, %v505_v5  ;;  %v440_v36 = vld [vmem:[%s647_s0 + $0x30] sm:$0xff]  }
   0xb   :  { %v181_v50 = vadd.f32 %v535_v25, %v158_v40  ;;  %v182_v51 = vadd.f32 %v535_v25, %v159_v41  ;;  %v345_v54 = vunpack.c.l.bf16 %v437_v42  ;;  %v346_v55 = vunpack.c.h.bf16 %v437_v42 }
   0xc   :  { %v195_v48 = vmax.f32 %v179_v38, 0.0  ;;  %v196_v49 = vmax.f32 %v180_v39, 0.0  ;;  %v160_v52 = vadd.f32 %v144_v45, %v89_v43  ;;  %v161_v53 = vadd.f32 %v145_v46, %v90_v44  ;;  %v447_v45 = vld [vmem:[%s650_s3 + $0x30] sm:$0xff]  }
   0xd   :  { %v197_v58 = vmax.f32 %v181_v50, 0.0  ;;  %v198_v59 = vmax.f32 %v182_v51, 0.0  ;;  %v377_v60 = vunpack.c.l.bf16 %v444_v47  ;;  %v68_v63 = vmul.f32 %v345_v54, %v497_v1  ;;  %v441_v50 = vld [vmem:[%s647_s0 + $0x38] sm:$0xff]  }
   0xe   :  { %v398_v57 = vpack.c.bf16 %v196_v49, %v195_v48  ;;  %v183_v61 = vadd.f32 %v535_v25, %v160_v52  ;;  %v184_v62 = vadd.f32 %v535_v25, %v161_v53  ;;  %v69_v0 = vmul.f32 %v346_v55, %v497_v1 }
   0xf   :  { %v403_v3 = vpack.c.bf16 %v198_v59, %v197_v58  ;;  %v378_v4 = vunpack.c.h.bf16 %v444_v47  ;;  %v146_v7 = vmul.f32 %v377_v60, %v505_v5  ;;  %v349_v8 = vunpack.c.l.bf16 %v438_v56 }
  0x10   :  { %399 = vst [vmem:[%s653_s6] sm:$0xff] %v398_v57   ;;  %v199_v10 = vmax.f32 %v183_v61, 0.0  ;;  %v200_v11 = vmax.f32 %v184_v62, 0.0  ;;  %v91_v12 = vadd.f32 %v510_v6, %v68_v63  ;;  %v92_v13 = vadd.f32 %v510_v6, %v69_v0  ;;  %v448_v63 = vld [vmem:[%s650_s3 + $0x38] sm:$0xff]  }
  0x11   :  { %449 = vst [vmem:[%s653_s6 + $0x8] sm:$0xff] %v403_v3   ;;  %v147_v14 = vmul.f32 %v378_v4, %v505_v5  ;;  %v350_v15 = vunpack.c.h.bf16 %v438_v56  ;;  %v70_v16 = vmul.f32 %v349_v8, %v497_v1  ;;  %v381_v17 = vunpack.c.l.bf16 %v445_v2 }
  0x12   :  { %v408_v18 = vpack.c.bf16 %v200_v11, %v199_v10  ;;  %v162_v19 = vadd.f32 %v146_v7, %v91_v12  ;;  %v382_v20 = vunpack.c.h.bf16 %v445_v2  ;;  %v353_v21 = vunpack.c.l.bf16 %v439_v9 }
  0x13   :  { %v163_v23 = vadd.f32 %v147_v14, %v92_v13  ;;  %v71_v24 = vmul.f32 %v350_v15, %v497_v1  ;;  %v93_v26 = vadd.f32 %v510_v6, %v70_v16  ;;  %v148_v27 = vmul.f32 %v381_v17, %v505_v5 }
  0x14   :  { %450 = vst [vmem:[%s653_s6 + $0x10] sm:$0xff] %v408_v18   ;;  %v185_v28 = vadd.f32 %v535_v25, %v162_v19  ;;  %v149_v29 = vmul.f32 %v382_v20, %v505_v5  ;;  %v354_v30 = vunpack.c.h.bf16 %v439_v9  ;;  %v72_v31 = vmul.f32 %v353_v21, %v497_v1 }
  0x15   :  { %v186_v32 = vadd.f32 %v535_v25, %v163_v23  ;;  %v94_v33 = vadd.f32 %v510_v6, %v71_v24  ;;  %v164_v34 = vadd.f32 %v148_v27, %v93_v26  ;;  %v385_v35 = vunpack.c.l.bf16 %v446_v22 }
  0x16   :  { %v201_v37 = vmax.f32 %v185_v28, 0.0  ;;  %v73_v38 = vmul.f32 %v354_v30, %v497_v1  ;;  %v95_v39 = vadd.f32 %v510_v6, %v72_v31  ;;  %v386_v40 = vunpack.c.h.bf16 %v446_v22 }
  0x17   :  { %v202_v41 = vmax.f32 %v186_v32, 0.0  ;;  %v165_v42 = vadd.f32 %v149_v29, %v94_v33  ;;  %v187_v43 = vadd.f32 %v535_v25, %v164_v34  ;;  %v150_v44 = vmul.f32 %v385_v35, %v505_v5 }
  0x18   :  { %v96_v46 = vadd.f32 %v510_v6, %v73_v38  ;;  %v151_v47 = vmul.f32 %v386_v40, %v505_v5  ;;  %v357_v48 = vunpack.c.l.bf16 %v440_v36  ;;  %v358_v49 = vunpack.c.h.bf16 %v440_v36 }
  0x19   :  { %v413_v51 = vpack.c.bf16 %v202_v41, %v201_v37  ;;  %v188_v52 = vadd.f32 %v535_v25, %v165_v42  ;;  %v203_v53 = vmax.f32 %v187_v43, 0.0  ;;  %v166_v54 = vadd.f32 %v150_v44, %v95_v39 }
  0x1a   :  { %v167_v55 = vadd.f32 %v151_v47, %v96_v46  ;;  %v74_v56 = vmul.f32 %v357_v48, %v497_v1  ;;  %v75_v57 = vmul.f32 %v358_v49, %v497_v1  ;;  %v389_v58 = vunpack.c.l.bf16 %v447_v45 }
  0x1b   :  { %451 = vst [vmem:[%s653_s6 + $0x18] sm:$0xff] %v413_v51   ;;  %v204_v59 = vmax.f32 %v188_v52, 0.0  ;;  %v189_v60 = vadd.f32 %v535_v25, %v166_v54  ;;  %v390_v61 = vunpack.c.h.bf16 %v447_v45  ;;  %v361_v62 = vunpack.c.l.bf16 %v441_v50 }
  0x1c   :  { %v190_v0 = vadd.f32 %v535_v25, %v167_v55  ;;  %v97_v2 = vadd.f32 %v510_v6, %v74_v56  ;;  %v98_v3 = vadd.f32 %v510_v6, %v75_v57  ;;  %v152_v4 = vmul.f32 %v389_v58, %v505_v5 }
  0x1d   :  { %v418_v7 = vpack.c.bf16 %v204_v59, %v203_v53  ;;  %v205_v8 = vmax.f32 %v189_v60, 0.0  ;;  %v153_v9 = vmul.f32 %v390_v61, %v505_v5  ;;  %v362_v10 = vunpack.c.h.bf16 %v441_v50 }
  0x1e   :  { %v206_v11 = vmax.f32 %v190_v0, 0.0  ;;  %v168_v12 = vadd.f32 %v152_v4, %v97_v2  ;;  %v76_v13 = vmul.f32 %v361_v62, %v497_v1  ;;  %v393_v14 = vunpack.c.l.bf16 %v448_v63 }
  0x1f   :  { %452 = vst [vmem:[%s653_s6 + $0x20] sm:$0xff] %v418_v7   ;;  %v169_v15 = vadd.f32 %v153_v9, %v98_v3  ;;  %v77_v16 = vmul.f32 %v362_v10, %v497_v1  ;;  %v394_v17 = vunpack.c.h.bf16 %v448_v63 }
  0x20   :  { %v423_v18 = vpack.c.bf16 %v206_v11, %v205_v8  ;;  %v191_v19 = vadd.f32 %v535_v25, %v168_v12  ;;  %v99_v20 = vadd.f32 %v510_v6, %v76_v13  ;;  %v154_v21 = vmul.f32 %v393_v14, %v505_v5 }
  0x21   :  { %v192_v22 = vadd.f32 %v535_v25, %v169_v15  ;;  %v100_v23 = vadd.f32 %v510_v6, %v77_v16  ;;  %v155_v24 = vmul.f32 %v394_v17, %v505_v5 }
  0x22   :  { %453 = vst [vmem:[%s653_s6 + $0x28] sm:$0xff] %v423_v18   ;;  %v207_v26 = vmax.f32 %v191_v19, 0.0  ;;  %v170_v1 = vadd.f32 %v154_v21, %v99_v20 }
  0x23   :  { %v208_v27 = vmax.f32 %v192_v22, 0.0  ;;  %v171_v28 = vadd.f32 %v155_v24, %v100_v23 }
  0x24   :  { %v193_v29 = vadd.f32 %v535_v25, %v170_v1 }
  0x25   :  { %v428_v30 = vpack.c.bf16 %v208_v27, %v207_v26  ;;  %v194_v31 = vadd.f32 %v535_v25, %v171_v28 }
  0x26   :  { %v209_v32 = vmax.f32 %v193_v29, 0.0 }
  0x27   :  { %454 = vst [vmem:[%s653_s6 + $0x30] sm:$0xff] %v428_v30   ;;  %v210_v6 = vmax.f32 %v194_v31, 0.0 }
  0x29   :  { %v433_v5 = vpack.c.bf16 %v210_v6, %v209_v32 }
  0x2b   :  { %455 = vst [vmem:[%s653_s6 + $0x38] sm:$0xff] %v433_v5  }

// kernel: bottleneck_forward.8
= control target key start
LH: loop header
LB: loop body
LE: loop exit
PB: predicated region body
PF: predicated region fallthrough
CT: control target
= control target key end

     0   :  { %vm734_vm0 = vcmask 1040384   ;;  %s1398_s3 = inlined_call_operand.vmem [shape: bf16[128,128], index: 3, kind: input, shape index: {}]   ;;  %s1399_s5 = inlined_call_operand.vmem [shape: bf16[128,128], index: 5, kind: input, shape index: {}]   ;;  %s1400_s0 = inlined_call_operand.vmem [shape: bf16[128,128], index: 0, kind: input, shape index: {}]   ;;  %s1401_s1 = inlined_call_operand.vmem [shape: f32[1,128], index: 1, kind: input, shape index: {}]   ;;  %s1402_s2 = inlined_call_operand.vmem [shape: f32[1,128], index: 2, kind: input, shape index: {}]   ;;  %s1403_s4 = inlined_call_operand.vmem [shape: bf16[128,128], index: 4, kind: input, shape index: {}]   ;;  %s1404_s6 = inlined_call_operand.vmem [shape: bf16[128,128], index: 6, kind: output, shape index: {0}]   ;;  %s1405_s7 = inlined_call_operand.vmem [shape: bf16[128,128], index: 7, kind: output, shape index: {1}]   ;;  %s1406_s8 = inlined_call_operand.vmem [shape: f32[1,2,128], index: 8, kind: output, shape index: {2}]   ;;  %s1407_s9 = inlined_call_operand.vmem [shape: f32[1,2,128], index: 9, kind: output, shape index: {3}]  }
   0x1   :  { %v1132_v0 = vld [vmem:[%s1398_s3 + $0x38] sm:$0xff]   ;;  %v1134_v2 = vld [vmem:[%s1398_s3 + $0x30] sm:$0xff]   ;;  %v1136_v4 = vld [vmem:[%s1398_s3 + $0x28] sm:$0xff]  }
   0x2   :  { %v1133_v1 = vld [vmem:[%s1399_s5 + $0x38] sm:$0xff]   ;;  %1068 = vmatprep.subr.bf16.mxu0 %v1132_v0  ;;  %v1135_v3 = vld [vmem:[%s1399_s5 + $0x30] sm:$0xff]   ;;  %v1137_v5 = vld [vmem:[%s1399_s5 + $0x28] sm:$0xff]  }
   0x3   :  { %1100 = vmatprep.subr.bf16.mxu1 %v1133_v1  ;;  %1069 = vmatpush3.bf16.msra.mxu0 %v1132_v0  ;;  %v1138_v6 = vld [vmem:[%s1398_s3 + $0x20] sm:$0xff]   ;;  %v1140_v8 = vld [vmem:[%s1398_s3 + $0x18] sm:$0xff]   ;;  %v1142_v10 = vld [vmem:[%s1398_s3 + $0x10] sm:$0xff]  }
   0x4   :  { %1101 = vmatpush3.bf16.msra.mxu1 %v1133_v1  ;;  %1070 = vmatprep.subr.bf16.mxu0 %v1134_v2  ;;  %v1139_v7 = vld [vmem:[%s1399_s5 + $0x20] sm:$0xff]   ;;  %v1141_v9 = vld [vmem:[%s1399_s5 + $0x18] sm:$0xff]   ;;  %v1143_v11 = vld [vmem:[%s1399_s5 + $0x10] sm:$0xff]  }
   0x5   :  { %1102 = vmatprep.subr.bf16.mxu1 %v1135_v3  ;;  %v904_v12 = vld [vmem:[%s1400_s0] sm:$0xff]   ;;  %v1015_v18 = vld [vmem:[%s1400_s0 + $0x8] sm:$0xff]   ;;  %v1016_v23 = vld [vmem:[%s1400_s0 + $0x10] sm:$0xff]  }
   0x6   :  { %v1248_v13 = vld [vmem:[%s1401_s1] ss:$0 sm:$0xff]  ;;  %v905_v15 = vunpack.c.l.bf16 %v904_v12  ;;  %v906_v16 = vunpack.c.h.bf16 %v904_v12  ;;  %v909_v21 = vunpack.c.l.bf16 %v1015_v18  ;;  %v910_v22 = vunpack.c.h.bf16 %v1015_v18  ;;  %v1144_v24 = vld [vmem:[%s1398_s3 + $0x8] sm:$0xff]   ;;  %v1017_v27 = vld [vmem:[%s1400_s0 + $0x18] sm:$0xff]  }
   0x7   :  { %1071 = vmatpush3.bf16.msra.mxu0 %v1134_v2  ;;  %v1253_v14 = vld [vmem:[%s1402_s2] ss:$0 sm:$0xff]  ;;  %v913_v25 = vunpack.c.l.bf16 %v1016_v23  ;;  %v914_v26 = vunpack.c.h.bf16 %v1016_v23  ;;  %v1145_v28 = vld [vmem:[%s1399_s5 + $0x8] sm:$0xff]   ;;  %v917_v35 = vunpack.c.l.bf16 %v1017_v27  ;;  %v918_v36 = vunpack.c.h.bf16 %v1017_v27  ;;  %v1020_v58 = vld [vmem:[%s1400_s0 + $0x30] sm:$0xff]  }
   0x8   :  { %1103 = vmatpush3.bf16.msra.mxu1 %v1135_v3  ;;  %1072 = vmatprep.subr.bf16.mxu0 %v1136_v4  ;;  %v1148_v17 = vld [vmem:[%s1403_s4] sm:$0xff]   ;;  %v67_v19 = vmul.f32 %v905_v15, %v1248_v13  ;;  %v68_v20 = vmul.f32 %v906_v16, %v1248_v13  ;;  %v69_v31 = vmul.f32 %v909_v21, %v1248_v13  ;;  %v1019_v56 = vld [vmem:[%s1400_s0 + $0x28] sm:$0xff]   ;;  %v1151_v23 = vld [vmem:[%s1403_s4 + $0x18] sm:$0xff]  }
   0x9   :  { %1104 = vmatprep.subr.bf16.mxu1 %v1137_v5  ;;  %1116 = vmatprep.mubr.bf16.mxu1 %v1148_v17  ;;  %v70_v32 = vmul.f32 %v910_v22, %v1248_v13  ;;  %v71_v33 = vmul.f32 %v913_v25, %v1248_v13  ;;  %v72_v34 = vmul.f32 %v914_v26, %v1248_v13  ;;  %v1018_v37 = vld [vmem:[%s1400_s0 + $0x20] sm:$0xff]   ;;  %v925_v63 = vunpack.c.l.bf16 %v1019_v56  ;;  %v1149_v1 = vld [vmem:[%s1403_s4 + $0x8] sm:$0xff]  }
   0xa   :  { %v90_v29 = vadd.f32 %v1253_v14, %v67_v19  ;;  %v91_v30 = vadd.f32 %v1253_v14, %v68_v20  ;;  %v92_v40 = vadd.f32 %v1253_v14, %v69_v31  ;;  %v1146_v42 = vld [vmem:[%s1398_s3] sm:$0xff]   ;;  %v921_v46 = vunpack.c.l.bf16 %v1018_v37 }
   0xb   :  { %1073 = vmatpush3.bf16.msra.mxu0 %v1136_v4  ;;  %v93_v41 = vadd.f32 %v1253_v14, %v70_v32  ;;  %v1147_v43 = vld [vmem:[%s1399_s5] sm:$0xff]   ;;  %v94_v44 = vadd.f32 %v1253_v14, %v71_v33  ;;  %v95_v45 = vadd.f32 %v1253_v14, %v72_v34  ;;  %v73_v50 = vmul.f32 %v917_v35, %v1248_v13 }
   0xc   :  { %1105 = vmatpush3.bf16.msra.mxu1 %v1137_v5  ;;  %1074 = vmatprep.subr.bf16.mxu0 %v1138_v6  ;;  %v106_v38 = vmax.f32 %v90_v29, 0.0  ;;  %v107_v39 = vmax.f32 %v91_v30, 0.0  ;;  %v108_v48 = vmax.f32 %v92_v40, 0.0  ;;  %v74_v53 = vmul.f32 %v918_v36, %v1248_v13  ;;  %v1152_v27 = vld [vmem:[%s1403_s4 + $0x20] sm:$0xff]  }
   0xd   :  { %1106 = vmatprep.subr.bf16.mxu1 %v1139_v7  ;;  %v109_v49 = vmax.f32 %v93_v41, 0.0  ;;  %v110_v51 = vmax.f32 %v94_v44, 0.0  ;;  %v111_v52 = vmax.f32 %v95_v45, 0.0  ;;  %v922_v54 = vunpack.c.h.bf16 %v1018_v37  ;;  %v1153_v37 = vld [vmem:[%s1403_s4 + $0x28] sm:$0xff]  }
   0xe   :  { %v122_v47 = vpack.c.bf16 %v107_v39, %v106_v38  ;;  %v75_v55 = vmul.f32 %v921_v46, %v1248_v13  ;;  %v96_v60 = vadd.f32 %v1253_v14, %v73_v50  ;;  %v97_v62 = vadd.f32 %v1253_v14, %v74_v53  ;;  %v1154_v39 = vld [vmem:[%s1403_s4 + $0x30] sm:$0xff]  }
   0xf   :  { %1075 = vmatpush3.bf16.msra.mxu0 %v1138_v6  ;;  %v76_v57 = vmul.f32 %v922_v54, %v1248_v13  ;;  %v123_v59 = vpack.c.bf16 %v109_v49, %v108_v48  ;;  %v124_v61 = vpack.c.bf16 %v111_v52, %v110_v51  ;;  %v926_v0 = vunpack.c.h.bf16 %v1019_v56  ;;  %v1150_v6 = vld [vmem:[%s1403_s4 + $0x10] sm:$0xff]  }
  0x10   :  { %1107 = vmatpush3.bf16.msra.mxu1 %v1139_v7  ;;  %1076 = vmatprep.subr.bf16.mxu0 %v1140_v8  ;;  %v98_v2 = vadd.f32 %v1253_v14, %v75_v55  ;;  %v929_v4 = vunpack.c.l.bf16 %v1020_v58  ;;  %v930_v5 = vunpack.c.h.bf16 %v1020_v58  ;;  %v112_v7 = vmax.f32 %v96_v60, 0.0 }
  0x11   :  { %1108 = vmatprep.subr.bf16.mxu1 %v1141_v9  ;;  %1084 = vmatprep.mubr.bf16.mxu0 %v122_v47  ;;  %v99_v3 = vadd.f32 %v1253_v14, %v76_v57 }
  0x12   :  { %v114_v12 = vmax.f32 %v98_v2, 0.0  ;;  %v79_v16 = vmul.f32 %v929_v4, %v1248_v13  ;;  %v80_v17 = vmul.f32 %v930_v5, %v1248_v13 }
  0x13   :  { %1077 = vmatpush3.bf16.msra.mxu0 %v1140_v8  ;;  %v113_v8 = vmax.f32 %v97_v62, 0.0  ;;  %v115_v15 = vmax.f32 %v99_v3, 0.0 }
  0x14   :  { %1109 = vmatpush3.bf16.msra.mxu1 %v1141_v9  ;;  %1078 = vmatprep.subr.bf16.mxu0 %v1142_v10  ;;  %v77_v9 = vmul.f32 %v925_v63, %v1248_v13  ;;  %v102_v25 = vadd.f32 %v1253_v14, %v79_v16  ;;  %v103_v26 = vadd.f32 %v1253_v14, %v80_v17 }
  0x15   :  { %1110 = vmatprep.subr.bf16.mxu1 %v1143_v11  ;;  %v125_v19 = vpack.c.bf16 %v113_v8, %v112_v7 }
  0x16   :  { %v100_v20 = vadd.f32 %v1253_v14, %v77_v9  ;;  %v118_v32 = vmax.f32 %v102_v25, 0.0  ;;  %v119_v33 = vmax.f32 %v103_v26, 0.0 }
  0x17   :  { %1079 = vmatpush3.bf16.msra.mxu0 %v1142_v10  ;;  %v78_v10 = vmul.f32 %v926_v0, %v1248_v13 }
  0x18   :  { %1111 = vmatpush3.bf16.msra.mxu1 %v1143_v11  ;;  %1080 = vmatprep.subr.bf16.mxu0 %v1144_v24  ;;  %v1021_v11 = vld [vmem:[%s1400_s0 + $0x38] sm:$0xff]   ;;  %v128_v38 = vpack.c.bf16 %v119_v33, %v118_v32 }
  0x19   :  { %1112 = vmatprep.subr.bf16.mxu1 %v1145_v28  ;;  %v933_v18 = vunpack.c.l.bf16 %v1021_v11  ;;  %v101_v21 = vadd.f32 %v1253_v14, %v78_v10  ;;  %v934_v22 = vunpack.c.h.bf16 %v1021_v11 }
  0x1b   :  { %1081 = vmatpush3.bf16.msra.mxu0 %v1144_v24  ;;  %v126_v24 = vpack.c.bf16 %v115_v15, %v114_v12  ;;  %v117_v29 = vmax.f32 %v101_v21, 0.0  ;;  %v81_v30 = vmul.f32 %v933_v18, %v1248_v13  ;;  %v82_v31 = vmul.f32 %v934_v22, %v1248_v13 }
  0x1c   :  { %1113 = vmatpush3.bf16.msra.mxu1 %v1145_v28  ;;  %1082 = vmatprep.subr.bf16.mxu0 %v1146_v42  ;;  %v116_v28 = vmax.f32 %v100_v20, 0.0 }
  0x1d   :  { %1114 = vmatprep.subr.bf16.mxu1 %v1147_v43  ;;  %v104_v35 = vadd.f32 %v1253_v14, %v81_v30  ;;  %v105_v36 = vadd.f32 %v1253_v14, %v82_v31  ;;  %v1155_v14 = vld [vmem:[%s1403_s4 + $0x38] sm:$0xff]  }
  0x1e   :  { %v127_v34 = vpack.c.bf16 %v117_v29, %v116_v28 }
  0x1f   :  { %1083 = vmatpush3.bf16.msra.mxu0 %v1146_v42  ;;  %v120_v13 = vmax.f32 %v104_v35, 0.0  ;;  %v121_v40 = vmax.f32 %v105_v36, 0.0 }
  0x20   :  { %1115 = vmatpush3.bf16.msra.mxu1 %v1147_v43 }
  0x21   :  { %v129_v41 = vpack.c.bf16 %v121_v40, %v120_v13 }
  0x22   :  { %1085 = vmatmul.mubr.bf16.vlgmr.msra.gmra.mxu0 %v123_v59 }
  0x23   :  { %1117 = vmatmul.mubr.bf16.vlgmr.msra.gmra.mxu1 %v1149_v1  ;;  %1088 = vmatprep.mubr.bf16.mxu0 %v124_v61 }
  0x24   :  { %1120 = vmatprep.mubr.bf16.mxu1 %v1150_v6 }
  0x2a   :  { %1089 = vmatmul.mubr.bf16.gmra.mxu0 %v125_v19 }
  0x2b   :  { %1121 = vmatmul.mubr.bf16.gmra.mxu1 %v1151_v23  ;;  %1092 = vmatprep.mubr.bf16.mxu0 %v126_v24 }
  0x2c   :  { %1124 = vmatprep.mubr.bf16.mxu1 %v1152_v27 }
  0x32   :  { %1093 = vmatmul.mubr.bf16.gmra.mxu0 %v127_v34 }
  0x33   :  { %1125 = vmatmul.mubr.bf16.gmra.mxu1 %v1153_v37  ;;  %1096 = vmatprep.mubr.bf16.mxu0 %v128_v38 }
  0x34   :  { %1128 = vmatprep.mubr.bf16.mxu1 %v1154_v39 }
  0x3a   :  { %1097 = vmatmul.mubr.bf16.gmra.mxu0 %v129_v41 }
  0x3b   :  { %1129 = vmatmul.mubr.bf16.gmra.mxu1 %v1155_v14 }
  0xe2   :  { %v1086_v42 = vpop.f32.mrf.mxu0 }
  0xe3   :  { %v1118_v43 = vpop.f32.mrf.mxu1  ;;  %v699_v61 = vmul.f32 %v1086_v42, %v1086_v42 }
  0xe4   :  { %v228_v44 = vpop.f32.mrf.mxu0  ;;  %v760_v1 = vmul.f32 %v1118_v43, %v1118_v43 }
  0xe5   :  { %v453_v45 = vpop.f32.mrf.mxu1  ;;  %v697_v51 = vmul.f32 %v228_v44, %v228_v44 }
  0xe6   :  { %v1087_v46 = vpop.f32.mrf.mxu0  ;;  %v758_v56 = vmul.f32 %v453_v45, %v453_v45 }
  0xe7   :  { %v943_v47 = vpack.c.bf16 %v1087_v46, %v1086_v42  ;;  %v1119_v48 = vpop.f32.mrf.mxu1  ;;  %v700_v5 = vmul.f32 %v1087_v46, %v1087_v46 }
  0xe8   :  { %v983_v49 = vpack.c.bf16 %v1119_v48, %v1118_v43  ;;  %v231_v50 = vpop.f32.mrf.mxu0  ;;  %v761_v9 = vmul.f32 %v1119_v48, %v1119_v48 }
  0xe9   :  { %1022 = vst [vmem:[%s1404_s6 + $0x8] sm:$0xff] %v943_v47   ;;  %v938_v52 = vpack.c.bf16 %v231_v50, %v228_v44  ;;  %v676_v53 = vadd.f32 %v231_v50, %v228_v44  ;;  %v698_v54 = vmul.f32 %v231_v50, %v231_v50  ;;  %v456_v55 = vpop.f32.mrf.mxu1 }
  0xea   :  { %1029 = vst [vmem:[%s1405_s7 + $0x8] sm:$0xff] %v983_v49   ;;  %v978_v57 = vpack.c.bf16 %v456_v55, %v453_v45  ;;  %v737_v58 = vadd.f32 %v456_v55, %v453_v45  ;;  %v759_v59 = vmul.f32 %v456_v55, %v456_v55  ;;  %v1090_v60 = vpop.f32.mrf.mxu0 }
  0xeb   :  { %939 = vst [vmem:[%s1404_s6] sm:$0xff] %v938_v52   ;;  %v677_v62 = vadd.f32 %v1086_v42, %v676_v53  ;;  %v713_v63 = vadd.f32 %v698_v54, %v697_v51  ;;  %v1122_v0 = vpop.f32.mrf.mxu1  ;;  %v703_v35 = vmul.f32 %v1090_v60, %v1090_v60 }
  0xec   :  { %979 = vst [vmem:[%s1405_s7] sm:$0xff] %v978_v57   ;;  %v738_v2 = vadd.f32 %v1118_v43, %v737_v58  ;;  %v774_v3 = vadd.f32 %v759_v59, %v758_v56  ;;  %v244_v4 = vpop.f32.mrf.mxu0  ;;  %v764_v39 = vmul.f32 %v1122_v0, %v1122_v0 }
  0xed   :  { %v714_v6 = vadd.f32 %v713_v63, %v699_v61  ;;  %v678_v7 = vadd.f32 %v1087_v46, %v677_v62  ;;  %v469_v8 = vpop.f32.mrf.mxu1  ;;  %v701_v16 = vmul.f32 %v244_v4, %v244_v4 }
  0xee   :  { %v775_v10 = vadd.f32 %v774_v3, %v760_v1  ;;  %v739_v11 = vadd.f32 %v1119_v48, %v738_v2  ;;  %v1091_v12 = vpop.f32.mrf.mxu0  ;;  %v762_v21 = vmul.f32 %v469_v8, %v469_v8 }
  0xef   :  { %v679_v15 = vadd.f32 %v678_v7, %v244_v4  ;;  %v715_v17 = vadd.f32 %v714_v6, %v700_v5  ;;  %v953_v18 = vpack.c.bf16 %v1091_v12, %v1090_v60  ;;  %v1123_v19 = vpop.f32.mrf.mxu1  ;;  %v704_v14 = vmul.f32 %v1091_v12, %v1091_v12 }
  0xf0   :  { %v740_v20 = vadd.f32 %v739_v11, %v469_v8  ;;  %v776_v22 = vadd.f32 %v775_v10, %v761_v9  ;;  %v993_v23 = vpack.c.bf16 %v1123_v19, %v1122_v0  ;;  %v247_v24 = vpop.f32.mrf.mxu0  ;;  %v765_v45 = vmul.f32 %v1123_v19, %v1123_v19 }
  0xf1   :  { %v716_v25 = vadd.f32 %v715_v17, %v701_v16  ;;  %1024 = vst [vmem:[%s1404_s6 + $0x18] sm:$0xff] %v953_v18   ;;  %v948_v26 = vpack.c.bf16 %v247_v24, %v244_v4  ;;  %v680_v27 = vadd.f32 %v679_v15, %v247_v24  ;;  %v702_v28 = vmul.f32 %v247_v24, %v247_v24  ;;  %v472_v29 = vpop.f32.mrf.mxu1 }
  0xf2   :  { %v777_v30 = vadd.f32 %v776_v22, %v762_v21  ;;  %1031 = vst [vmem:[%s1405_s7 + $0x18] sm:$0xff] %v993_v23   ;;  %v988_v31 = vpack.c.bf16 %v472_v29, %v469_v8  ;;  %v741_v32 = vadd.f32 %v740_v20, %v472_v29  ;;  %v763_v33 = vmul.f32 %v472_v29, %v472_v29  ;;  %v1094_v34 = vpop.f32.mrf.mxu0 }
  0xf3   :  { %1023 = vst [vmem:[%s1404_s6 + $0x10] sm:$0xff] %v948_v26   ;;  %v681_v36 = vadd.f32 %v1090_v60, %v680_v27  ;;  %v717_v37 = vadd.f32 %v716_v25, %v702_v28  ;;  %v1126_v38 = vpop.f32.mrf.mxu1  ;;  %v707_v5 = vmul.f32 %v1094_v34, %v1094_v34 }
  0xf4   :  { %1030 = vst [vmem:[%s1405_s7 + $0x10] sm:$0xff] %v988_v31   ;;  %v742_v13 = vadd.f32 %v1122_v0, %v741_v32  ;;  %v778_v40 = vadd.f32 %v777_v30, %v763_v33  ;;  %v260_v41 = vpop.f32.mrf.mxu0  ;;  %v768_v9 = vmul.f32 %v1126_v38, %v1126_v38 }
  0xf5   :  { %v718_v42 = vadd.f32 %v717_v37, %v703_v35  ;;  %v682_v43 = vadd.f32 %v1091_v12, %v681_v36  ;;  %v485_v44 = vpop.f32.mrf.mxu1  ;;  %v705_v50 = vmul.f32 %v260_v41, %v260_v41 }
  0xf6   :  { %v779_v46 = vadd.f32 %v778_v40, %v764_v39  ;;  %v743_v47 = vadd.f32 %v1123_v19, %v742_v13  ;;  %v1095_v48 = vpop.f32.mrf.mxu0  ;;  %v766_v55 = vmul.f32 %v485_v44, %v485_v44 }
  0xf7   :  { %v683_v49 = vadd.f32 %v682_v43, %v260_v41  ;;  %v719_v51 = vadd.f32 %v718_v42, %v704_v14  ;;  %v963_v52 = vpack.c.bf16 %v1095_v48, %v1094_v34  ;;  %v1127_v53 = vpop.f32.mrf.mxu1  ;;  %v708_v15 = vmul.f32 %v1095_v48, %v1095_v48 }
  0xf8   :  { %v744_v54 = vadd.f32 %v743_v47, %v485_v44  ;;  %v780_v56 = vadd.f32 %v779_v46, %v765_v45  ;;  %v1003_v57 = vpack.c.bf16 %v1127_v53, %v1126_v38  ;;  %v263_v58 = vpop.f32.mrf.mxu0  ;;  %v769_v19 = vmul.f32 %v1127_v53, %v1127_v53 }
  0xf9   :  { %v720_v59 = vadd.f32 %v719_v51, %v705_v50  ;;  %1026 = vst [vmem:[%s1404_s6 + $0x28] sm:$0xff] %v963_v52   ;;  %v958_v60 = vpack.c.bf16 %v263_v58, %v260_v41  ;;  %v684_v61 = vadd.f32 %v683_v49, %v263_v58  ;;  %v706_v62 = vmul.f32 %v263_v58, %v263_v58  ;;  %v488_v63 = vpop.f32.mrf.mxu1 }
  0xfa   :  { %v781_v0 = vadd.f32 %v780_v56, %v766_v55  ;;  %1033 = vst [vmem:[%s1405_s7 + $0x28] sm:$0xff] %v1003_v57   ;;  %v998_v1 = vpack.c.bf16 %v488_v63, %v485_v44  ;;  %v745_v2 = vadd.f32 %v744_v54, %v488_v63  ;;  %v767_v3 = vmul.f32 %v488_v63, %v488_v63  ;;  %v1098_v4 = vpop.f32.mrf.mxu0 }
  0xfb   :  { %1025 = vst [vmem:[%s1404_s6 + $0x20] sm:$0xff] %v958_v60   ;;  %v685_v6 = vadd.f32 %v1094_v34, %v684_v61  ;;  %v721_v7 = vadd.f32 %v720_v59, %v706_v62  ;;  %v1130_v8 = vpop.f32.mrf.mxu1  ;;  %v711_v41 = vmul.f32 %v1098_v4, %v1098_v4 }
  0xfc   :  { %1032 = vst [vmem:[%s1405_s7 + $0x20] sm:$0xff] %v998_v1   ;;  %v746_v10 = vadd.f32 %v1126_v38, %v745_v2  ;;  %v782_v11 = vadd.f32 %v781_v0, %v767_v3  ;;  %v276_v12 = vpop.f32.mrf.mxu0  ;;  %v772_v43 = vmul.f32 %v1130_v8, %v1130_v8 }
  0xfd   :  { %v722_v16 = vadd.f32 %v721_v7, %v707_v5  ;;  %v686_v17 = vadd.f32 %v1095_v48, %v685_v6  ;;  %v501_v18 = vpop.f32.mrf.mxu1  ;;  %v709_v24 = vmul.f32 %v276_v12, %v276_v12 }
  0xfe   :  { %v783_v20 = vadd.f32 %v782_v11, %v768_v9  ;;  %v747_v21 = vadd.f32 %v1127_v53, %v746_v10  ;;  %v1099_v22 = vpop.f32.mrf.mxu0  ;;  %v770_v29 = vmul.f32 %v501_v18, %v501_v18 }
  0xff   :  { %v687_v23 = vadd.f32 %v686_v17, %v276_v12  ;;  %v723_v25 = vadd.f32 %v722_v16, %v708_v15  ;;  %v973_v26 = vpack.c.bf16 %v1099_v22, %v1098_v4  ;;  %v1131_v27 = vpop.f32.mrf.mxu1  ;;  %v712_v46 = vmul.f32 %v1099_v22, %v1099_v22 }
 0x100   :  { %v748_v28 = vadd.f32 %v747_v21, %v501_v18  ;;  %v784_v30 = vadd.f32 %v783_v20, %v769_v19  ;;  %v1013_v31 = vpack.c.bf16 %v1131_v27, %v1130_v8  ;;  %v279_v32 = vpop.f32.mrf.mxu0  ;;  %v773_v49 = vmul.f32 %v1131_v27, %v1131_v27 }
 0x101   :  { %v724_v33 = vadd.f32 %v723_v25, %v709_v24  ;;  %1028 = vst [vmem:[%s1404_s6 + $0x38] sm:$0xff] %v973_v26   ;;  %v968_v34 = vpack.c.bf16 %v279_v32, %v276_v12  ;;  %v688_v35 = vadd.f32 %v687_v23, %v279_v32  ;;  %v710_v36 = vmul.f32 %v279_v32, %v279_v32  ;;  %v504_v37 = vpop.f32.mrf.mxu1 }
 0x102   :  { %v785_v38 = vadd.f32 %v784_v30, %v770_v29  ;;  %1035 = vst [vmem:[%s1405_s7 + $0x38] sm:$0xff] %v1013_v31   ;;  %v1008_v39 = vpack.c.bf16 %v504_v37, %v501_v18  ;;  %v749_v13 = vadd.f32 %v748_v28, %v504_v37  ;;  %v771_v40 = vmul.f32 %v504_v37, %v504_v37 }
 0x103   :  { %1027 = vst [vmem:[%s1404_s6 + $0x30] sm:$0xff] %v968_v34   ;;  %v689_v14 = vadd.f32 %v1098_v4, %v688_v35  ;;  %v725_v42 = vadd.f32 %v724_v33, %v710_v36 }
 0x104   :  { %1034 = vst [vmem:[%s1405_s7 + $0x30] sm:$0xff] %v1008_v39   ;;  %v750_v44 = vadd.f32 %v1130_v8, %v749_v13  ;;  %v786_v45 = vadd.f32 %v785_v38, %v771_v40 }
 0x105   :  { %v690_v47 = vadd.f32 %v1099_v22, %v689_v14  ;;  %v726_v48 = vadd.f32 %v725_v42, %v711_v41 }
 0x106   :  { %v751_v50 = vadd.f32 %v1131_v27, %v750_v44  ;;  %v787_v51 = vadd.f32 %v786_v45, %v772_v43 }
 0x107   :  { %v691_v52 = vrot.slane %v690_v47, 4  ;;  %v727_v53 = vadd.f32 %v726_v48, %v712_v46 }
 0x108   :  { %v752_v54 = vrot.slane %v751_v50, 4  ;;  %v788_v55 = vadd.f32 %v787_v51, %v773_v49 }
 0x109   :  { %v692_v56 = vadd.f32 %v691_v52, %v690_v47  ;;  %v728_v57 = vrot.slane %v727_v53, 4 }
 0x10a   :  { %v753_v58 = vadd.f32 %v752_v54, %v751_v50  ;;  %v789_v59 = vrot.slane %v788_v55, 4 }
 0x10b   :  { %v693_v60 = vrot.slane %v692_v56, 2  ;;  %v729_v61 = vadd.f32 %v728_v57, %v727_v53 }
 0x10c   :  { %v754_v62 = vrot.slane %v753_v58, 2  ;;  %v790_v63 = vadd.f32 %v789_v59, %v788_v55 }
 0x10d   :  { %v694_v0 = vadd.f32 %v693_v60, %v692_v56  ;;  %v730_v1 = vrot.slane %v729_v61, 2 }
 0x10e   :  { %v755_v2 = vadd.f32 %v754_v62, %v753_v58  ;;  %v791_v3 = vrot.slane %v790_v63, 2 }
 0x10f   :  { %v695_v4 = vrot.slane %v694_v0, 1  ;;  %v731_v5 = vadd.f32 %v730_v1, %v729_v61 }
 0x110   :  { %v756_v6 = vrot.slane %v755_v2, 1  ;;  %v792_v7 = vadd.f32 %v791_v3, %v790_v63 }
 0x111   :  { %v732_v8 = vrot.slane %v731_v5, 1  ;;  %v696_v10 = vadd.f32 %v695_v4, %v694_v0 }
 0x112   :  { %v793_v9 = vrot.slane %v792_v7, 1  ;;  %v757_v12 = vadd.f32 %v756_v6, %v755_v2 }
 0x113   :  { %v733_v11 = vadd.f32 %v732_v8, %v731_v5 }
 0x114   :  { %v794_v15 = vadd.f32 %v793_v9, %v792_v7 }
 0x115   :  { %v735_v16 = vsel %vm734_vm0, %v696_v10, %v733_v11 }
 0x116   :  { %736 = vst [vmem:[%s1406_s8] sm:$0x3] %v735_v16  ;;  %v795_v17 = vsel %vm734_vm0, %v757_v12, %v794_v15 }
 0x117   :  { %796 = vst [vmem:[%s1407_s9] sm:$0x3] %v795_v17 }

</bundles_post_ra>
